<compile_context>
chip_gen: v7x
topology: tpu7x:2x2x1
jax: 0.10.0
libtpu: 0.0.40
codegen_flags: <defaults>
</compile_context>

<pallas_src>
import jax
import jax.numpy as jnp
import numpy as np
from jax import lax
from jax.experimental import pallas as pl
from jax.experimental.pallas import tpu as pltpu

# Problem sizes (small, consistent with the module).
N = 2              # batch
CIN = 4            # in_size
COUT = 8           # out_size
H = W = 16         # spatial
HW = H * W         # 256 pixels per image
NHW = N * HW       # 512 lanes after folding batch into the lane axis
HO = WO = H // 2
NDOWN = N * HO * WO   # 128 lanes -> lane-dense downsample output
SLOPE = 0.2        # relu_slope

OFF3 = tuple((dy - 1, dx - 1) for dy in range(3) for dx in range(3))  # 3x3, pad 1
OFF4 = tuple((ky - 1, kx - 1) for ky in range(4) for kx in range(4))  # 4x4, pad 1

# Packed per-tap weight layout along the leading axis of a (36, COUT, COUT) array.
W1_BASE, W2_BASE, WID_IDX, WM_IDX, WD_BASE = 0, 9, 18, 19, 20


def _leaky(x, slope=SLOPE):
    # slope in (0,1): max(x, slope*x) == LeakyReLU(x); 2 VPU ops.
    return jnp.maximum(x, slope * x)


def _mask_idx(a, b):
    # offsets a, b in {-1, 0, 1, 2}
    return (a + 1) * 4 + (b + 1)


# --------------------------------------------------------------------------
# Fused kernel. All tensors are (channels, N*H*W): channels on sublanes,
# batch-folded flattened pixels on lanes (lane-dense). One grid step total.
# --------------------------------------------------------------------------
def block_kernel(x_ref, w_ref, bias_ref, mask_ref, sel_ref,
                 out_merge_ref, out_down_ref):
    x = x_ref[...]                                      # (8, 512); rows >= CIN are zero

    def conv_acc(v, offsets, w_base, acc=None):
        """acc + sum_k mask_k * (W[w_base+k] @ roll_k(v)); one small MXU push per tap."""
        for k, (a, b) in enumerate(offsets):
            shift = (-(a * W + b)) % NHW
            t = pltpu.roll(v, shift=shift, axis=1) if shift else v
            prod = jnp.dot(w_ref[w_base + k], t,
                           preferred_element_type=jnp.float32)
            if (a, b) != (0, 0):
                # per-lane border / batch-seam mask; exact to apply after the matmul
                prod = prod * mask_ref[_mask_idx(a, b)]
            acc = prod if acc is None else acc + prod
        return acc

    # ---- conv_1 (3x3, pad 1) + bias + LeakyReLU: 9 accumulating (8,8)x(8,512) ----
    c1 = _leaky(conv_acc(x, OFF3, W1_BASE, bias_ref[0]))

    # ---- conv_2 (3x3, pad 1) + bias + LeakyReLU ----------------------------------
    c2 = _leaky(conv_acc(c1, OFF3, W2_BASE, bias_ref[1]))

    # ---- identity (1x1) + residual add; `pre` never leaves VMEM ------------------
    pre = (c2
           + jnp.dot(w_ref[WID_IDX], x, preferred_element_type=jnp.float32)
           + bias_ref[2])

    # ---- conv_before_merge (1x1) -> `out` ----------------------------------------
    out_merge_ref[...] = (jnp.dot(w_ref[WM_IDX], pre,
                                  preferred_element_type=jnp.float32)
                          + bias_ref[3])

    # ---- downsample 4x4 / stride 2 / pad 1 / no bias -----------------------------
    # Stride-1 accumulation over 16 taps, then an even-pixel selection matmul on
    # the otherwise idle MXU (keeps the output 128 lanes wide; no strided gathers).
    full = conv_acc(pre, OFF4, WD_BASE)                 # (8, 512)
    out_down_ref[...] = jnp.dot(full, sel_ref[...],
                                preferred_element_type=jnp.float32)  # (8, 128)


# --------------------------------------------------------------------------
# Wrapper: tiny layout plumbing (transpose/pad of ~16 KB) + one pallas_call.
# --------------------------------------------------------------------------
@jax.jit
def unet_ev_conv_block(x_nchw, params):
    assert x_nchw.shape == (N, CIN, H, W)
    # NCHW -> (channels, N*H*W); pad channels to 8 sublanes so every matmul is a
    # uniform (8,8)x(8,512).
    xf = jnp.transpose(x_nchw, (1, 0, 2, 3)).reshape(CIN, NHW).astype(jnp.float32)
    xf = jnp.pad(xf, ((0, COUT - CIN), (0, 0)))

    out_merge, out_down = pl.pallas_call(
        block_kernel,
        grid=(1,),                                      # whole forward = one grid step
        in_specs=[
            pl.BlockSpec((COUT, NHW), lambda i: (0, 0)),            # x
            pl.BlockSpec((36, COUT, COUT), lambda i: (0, 0, 0)),    # packed tap weights
            pl.BlockSpec((4, COUT, NHW), lambda i: (0, 0, 0)),      # pre-broadcast biases
            pl.BlockSpec((16, COUT, NHW), lambda i: (0, 0, 0)),     # border/seam masks
            pl.BlockSpec((NHW, NDOWN), lambda i: (0, 0)),           # even-pixel selection
        ],
        out_specs=(
            pl.BlockSpec((COUT, NHW), lambda i: (0, 0)),
            pl.BlockSpec((COUT, NDOWN), lambda i: (0, 0)),
        ),
        out_shape=(
            jax.ShapeDtypeStruct((COUT, NHW), jnp.float32),
            jax.ShapeDtypeStruct((COUT, NDOWN), jnp.float32),
        ),
        compiler_params=pltpu.CompilerParams(dimension_semantics=("arbitrary",)),
    )(xf, params["w"], params["bias"], params["masks"], params["sel"])

    # PyTorch convention: forward returns (out_down, out).
    out_down = jnp.transpose(out_down.reshape(COUT, N, HO, WO), (1, 0, 2, 3))
    out_merge = jnp.transpose(out_merge.reshape(COUT, N, H, W), (1, 0, 2, 3))
    return out_down, out_merge


# --------------------------------------------------------------------------
# Deterministic parameter init (PyTorch weight layout (O, I, Kh, Kw)) and
# repacking into the kernel's per-tap / pre-broadcast form.
# --------------------------------------------------------------------------
def init_params(key):
    ks = jax.random.split(key, 9)
    torch_layout = {
        "w1": jax.random.normal(ks[0], (COUT, CIN, 3, 3), jnp.float32) * 0.1,
        "b1": jax.random.normal(ks[1], (COUT,), jnp.float32) * 0.05,
        "w2": jax.random.normal(ks[2], (COUT, COUT, 3, 3), jnp.float32) * 0.1,
        "b2": jax.random.normal(ks[3], (COUT,), jnp.float32) * 0.05,
        "wid": jax.random.normal(ks[4], (COUT, CIN, 1, 1), jnp.float32) * 0.1,
        "bid": jax.random.normal(ks[5], (COUT,), jnp.float32) * 0.05,
        "wm": jax.random.normal(ks[6], (COUT, COUT, 1, 1), jnp.float32) * 0.1,
        "bm": jax.random.normal(ks[7], (COUT,), jnp.float32) * 0.05,
        "wd": jax.random.normal(ks[8], (COUT, COUT, 4, 4), jnp.float32) * 0.1,
    }

    def taps_of(w):       # (O, I, kh, kw) -> (kh*kw, O, I), tap-major (row-major taps)
        o, i, kh, kw = w.shape
        return jnp.transpose(w, (2, 3, 0, 1)).reshape(kh * kw, o, i)

    def pad_in(wt):       # (T, O, I) -> (T, O, COUT): zero-pad input-channel columns
        return jnp.pad(wt, ((0, 0), (0, 0), (0, COUT - wt.shape[2])))

    w_packed = jnp.concatenate([
        pad_in(taps_of(torch_layout["w1"])),                  # [0:9]   conv_1 taps
        taps_of(torch_layout["w2"]),                          # [9:18]  conv_2 taps
        pad_in(torch_layout["wid"][:, :, 0, 0][None]),        # [18]    identity
        torch_layout["wm"][:, :, 0, 0][None],                 # [19]    conv_before_merge
        taps_of(torch_layout["wd"]),                          # [20:36] downsample taps
    ], axis=0).astype(jnp.float32)                            # (36, 8, 8)

    bias_packed = jnp.broadcast_to(
        jnp.stack([torch_layout["b1"], torch_layout["b2"],
                   torch_layout["bid"], torch_layout["bm"]])[:, :, None],
        (4, COUT, NHW)).astype(jnp.float32)                   # (4, 8, 512)

    # Per-offset border masks over the folded lane axis; row/col derived from
    # (p % HW) so they also zero roll wrap-around across the batch seam.
    p = np.arange(NHW)
    row = (p % HW) // W
    col = p % W
    masks = np.zeros((16, COUT, NHW), np.float32)
    for a in (-1, 0, 1, 2):
        for b in (-1, 0, 1, 2):
            valid = np.ones(NHW, bool)
            if a < 0:
                valid &= row >= -a
            if a > 0:
                valid &= row < H - a
            if b < 0:
                valid &= col >= -b
            if b > 0:
                valid &= col < W - b
            masks[_mask_idx(a, b)] = np.broadcast_to(
                valid.astype(np.float32), (COUT, NHW))

    # Even-pixel selection (block-diagonal over the batch fold): picks the
    # stride-2 anchors out of the stride-1 downsample accumulation.
    sel = np.zeros((NHW, NDOWN), np.float32)
    for n in range(N):
        for oi in range(HO):
            for oj in range(WO):
                sel[n * HW + (2 * oi) * W + 2 * oj,
                    n * HO * WO + oi * WO + oj] = 1.0

    packed = {"w": w_packed, "bias": bias_packed,
              "masks": jnp.asarray(masks), "sel": jnp.asarray(sel)}
    return torch_layout, packed


# --------------------------------------------------------------------------
# Pure-JAX reference (lax.conv) for correctness checking.
# --------------------------------------------------------------------------
def reference(x_nchw, p_t):
    x = jnp.transpose(x_nchw, (0, 2, 3, 1)).astype(jnp.float32)

    def conv(inp, w_oihw, b=None, stride=1, pad=1):
        w = jnp.transpose(w_oihw, (2, 3, 1, 0))  # HWIO
        y = lax.conv_general_dilated(inp, w, (stride, stride),
                                     [(pad, pad), (pad, pad)],
                                     dimension_numbers=("NHWC", "HWIO", "NHWC"))
        return y if b is None else y + b

    out_c1 = _leaky(conv(x, p_t["w1"], p_t["b1"], 1, 1))
    out_c2 = _leaky(conv(out_c1, p_t["w2"], p_t["b2"], 1, 1))
    out = out_c2 + conv(x, p_t["wid"], p_t["bid"], 1, 0)
    out_down = conv(out, p_t["wd"], None, 2, 1)
    out_m = conv(out, p_t["wm"], p_t["bm"], 1, 0)
    return (jnp.transpose(out_down, (0, 3, 1, 2)),
            jnp.transpose(out_m, (0, 3, 1, 2)))


if __name__ == "__main__":
    key = jax.random.PRNGKey(0)
    k_x, k_p = jax.random.split(key)
    x = jax.random.normal(k_x, (N, CIN, H, W), jnp.float32)   # NCHW, like PyTorch

    torch_params, packed_params = init_params(k_p)

    out_down, out_merge = unet_ev_conv_block(x, packed_params)
    out_down = jax.block_until_ready(out_down)
    out_merge = jax.block_until_ready(out_merge)

    ref_down, ref_merge = reference(x, torch_params)
    np.testing.assert_allclose(np.asarray(out_down), np.asarray(ref_down),
                               rtol=1e-4, atol=1e-4)
    np.testing.assert_allclose(np.asarray(out_merge), np.asarray(ref_merge),
                               rtol=1e-4, atol=1e-4)

    assert out_down.shape == (N, COUT, H // 2, W // 2)
    assert out_merge.shape == (N, COUT, H, W)
    print("KERNEL_OK")
</pallas_src>

<mosaic_0001>
module attributes {stable_mosaic.version = 11 : i64} {
  func.func @block_kernel(%arg0: i32, %arg1: memref<8x512xf32, #tpu.memory_space<vmem>>, %arg2: memref<36x8x8xf32, #tpu.memory_space<vmem>>, %arg3: memref<4x8x512xf32, #tpu.memory_space<vmem>>, %arg4: memref<16x8x512xf32, #tpu.memory_space<vmem>>, %arg5: memref<512x128xf32, #tpu.memory_space<vmem>>, %arg6: memref<8x512xf32, #tpu.memory_space<vmem>>, %arg7: memref<8x128xf32, #tpu.memory_space<vmem>>) attributes {dimension_semantics = [#tpu.dimension_semantics<arbitrary>], iteration_bounds = array<i64: 1>, scalar_prefetch = 0 : i64, scratch_operands = 0 : i64, tpu.core_type = #tpu.core_type<tc>, window_params = [{pipeline_mode = #tpu.pipeline_mode<synchronous>, transform_indices = @transform_0, window_bounds = array<i64: 8, 512>}, {pipeline_mode = #tpu.pipeline_mode<synchronous>, transform_indices = @transform_1, window_bounds = array<i64: 36, 8, 8>}, {pipeline_mode = #tpu.pipeline_mode<synchronous>, transform_indices = @transform_2, window_bounds = array<i64: 4, 8, 512>}, {pipeline_mode = #tpu.pipeline_mode<synchronous>, transform_indices = @transform_3, window_bounds = array<i64: 16, 8, 512>}, {pipeline_mode = #tpu.pipeline_mode<synchronous>, transform_indices = @transform_4, window_bounds = array<i64: 512, 128>}, {pipeline_mode = #tpu.pipeline_mode<synchronous>, transform_indices = @transform_5, window_bounds = array<i64: 8, 512>}, {pipeline_mode = #tpu.pipeline_mode<synchronous>, transform_indices = @transform_6, window_bounds = array<i64: 8, 128>}]} {
    %c0 = arith.constant 0 : index
    %c0_0 = arith.constant 0 : index
    %0 = vector.load %arg1[%c0, %c0_0] : memref<8x512xf32, #tpu.memory_space<vmem>>, vector<8x512xf32>
    %c0_1 = arith.constant 0 : index
    %c0_2 = arith.constant 0 : index
    %c0_3 = arith.constant 0 : index
    %1 = vector.load %arg3[%c0_1, %c0_2, %c0_3] : memref<4x8x512xf32, #tpu.memory_space<vmem>>, vector<1x8x512xf32>
    %2 = vector.shape_cast %1 : vector<1x8x512xf32> to vector<8x512xf32>
    %c17_i32 = arith.constant 17 : i32
    %3 = tpu.dynamic_rotate %0 by %c17_i32 dim 1 : vector<8x512xf32>, i32 -> vector<8x512xf32>
    %c0_4 = arith.constant 0 : index
    %c0_5 = arith.constant 0 : index
    %c0_6 = arith.constant 0 : index
    %4 = vector.load %arg2[%c0_4, %c0_5, %c0_6] : memref<36x8x8xf32, #tpu.memory_space<vmem>>, vector<1x8x8xf32>
    %5 = vector.shape_cast %4 : vector<1x8x8xf32> to vector<8x8xf32>
    %cst = arith.constant dense<0.000000e+00> : vector<8x512xf32>
    %6 = tpu.matmul %5, %3, %cst {dimension_numbers = #tpu.dot_dimension_numbers<[1], [0], [0], [1], [0, 0, 1, 1], [], []>} : vector<8x8xf32>, vector<8x512xf32>, vector<8x512xf32> -> vector<8x512xf32>
    %c0_7 = arith.constant 0 : index
    %c0_8 = arith.constant 0 : index
    %c0_9 = arith.constant 0 : index
    %7 = vector.load %arg4[%c0_7, %c0_8, %c0_9] : memref<16x8x512xf32, #tpu.memory_space<vmem>>, vector<1x8x512xf32>
    %8 = vector.shape_cast %7 : vector<1x8x512xf32> to vector<8x512xf32>
    %9 = arith.mulf %6, %8 : vector<8x512xf32>
    %10 = arith.addf %2, %9 : vector<8x512xf32>
    %c16_i32 = arith.constant 16 : i32
    %11 = tpu.dynamic_rotate %0 by %c16_i32 dim 1 : vector<8x512xf32>, i32 -> vector<8x512xf32>
    %c1 = arith.constant 1 : index
    %c0_10 = arith.constant 0 : index
    %c0_11 = arith.constant 0 : index
    %12 = vector.load %arg2[%c1, %c0_10, %c0_11] : memref<36x8x8xf32, #tpu.memory_space<vmem>>, vector<1x8x8xf32>
    %13 = vector.shape_cast %12 : vector<1x8x8xf32> to vector<8x8xf32>
    %cst_12 = arith.constant dense<0.000000e+00> : vector<8x512xf32>
    %14 = tpu.matmul %13, %11, %cst_12 {dimension_numbers = #tpu.dot_dimension_numbers<[1], [0], [0], [1], [0, 0, 1, 1], [], []>} : vector<8x8xf32>, vector<8x512xf32>, vector<8x512xf32> -> vector<8x512xf32>
    %c1_13 = arith.constant 1 : index
    %c0_14 = arith.constant 0 : index
    %c0_15 = arith.constant 0 : index
    %15 = vector.load %arg4[%c1_13, %c0_14, %c0_15] : memref<16x8x512xf32, #tpu.memory_space<vmem>>, vector<1x8x512xf32>
    %16 = vector.shape_cast %15 : vector<1x8x512xf32> to vector<8x512xf32>
    %17 = arith.mulf %14, %16 : vector<8x512xf32>
    %18 = arith.addf %10, %17 : vector<8x512xf32>
    %c15_i32 = arith.constant 15 : i32
    %19 = tpu.dynamic_rotate %0 by %c15_i32 dim 1 : vector<8x512xf32>, i32 -> vector<8x512xf32>
    %c2 = arith.constant 2 : index
    %c0_16 = arith.constant 0 : index
    %c0_17 = arith.constant 0 : index
    %20 = vector.load %arg2[%c2, %c0_16, %c0_17] : memref<36x8x8xf32, #tpu.memory_space<vmem>>, vector<1x8x8xf32>
    %21 = vector.shape_cast %20 : vector<1x8x8xf32> to vector<8x8xf32>
    %cst_18 = arith.constant dense<0.000000e+00> : vector<8x512xf32>
    %22 = tpu.matmul %21, %19, %cst_18 {dimension_numbers = #tpu.dot_dimension_numbers<[1], [0], [0], [1], [0, 0, 1, 1], [], []>} : vector<8x8xf32>, vector<8x512xf32>, vector<8x512xf32> -> vector<8x512xf32>
    %c2_19 = arith.constant 2 : index
    %c0_20 = arith.constant 0 : index
    %c0_21 = arith.constant 0 : index
    %23 = vector.load %arg4[%c2_19, %c0_20, %c0_21] : memref<16x8x512xf32, #tpu.memory_space<vmem>>, vector<1x8x512xf32>
    %24 = vector.shape_cast %23 : vector<1x8x512xf32> to vector<8x512xf32>
    %25 = arith.mulf %22, %24 : vector<8x512xf32>
    %26 = arith.addf %18, %25 : vector<8x512xf32>
    %c1_i32 = arith.constant 1 : i32
    %27 = tpu.dynamic_rotate %0 by %c1_i32 dim 1 : vector<8x512xf32>, i32 -> vector<8x512xf32>
    %c3 = arith.constant 3 : index
    %c0_22 = arith.constant 0 : index
    %c0_23 = arith.constant 0 : index
    %28 = vector.load %arg2[%c3, %c0_22, %c0_23] : memref<36x8x8xf32, #tpu.memory_space<vmem>>, vector<1x8x8xf32>
    %29 = vector.shape_cast %28 : vector<1x8x8xf32> to vector<8x8xf32>
    %cst_24 = arith.constant dense<0.000000e+00> : vector<8x512xf32>
    %30 = tpu.matmul %29, %27, %cst_24 {dimension_numbers = #tpu.dot_dimension_numbers<[1], [0], [0], [1], [0, 0, 1, 1], [], []>} : vector<8x8xf32>, vector<8x512xf32>, vector<8x512xf32> -> vector<8x512xf32>
    %c4 = arith.constant 4 : index
    %c0_25 = arith.constant 0 : index
    %c0_26 = arith.constant 0 : index
    %31 = vector.load %arg4[%c4, %c0_25, %c0_26] : memref<16x8x512xf32, #tpu.memory_space<vmem>>, vector<1x8x512xf32>
    %32 = vector.shape_cast %31 : vector<1x8x512xf32> to vector<8x512xf32>
    %33 = arith.mulf %30, %32 : vector<8x512xf32>
    %34 = arith.addf %26, %33 : vector<8x512xf32>
    %c4_27 = arith.constant 4 : index
    %c0_28 = arith.constant 0 : index
    %c0_29 = arith.constant 0 : index
    %35 = vector.load %arg2[%c4_27, %c0_28, %c0_29] : memref<36x8x8xf32, #tpu.memory_space<vmem>>, vector<1x8x8xf32>
    %36 = vector.shape_cast %35 : vector<1x8x8xf32> to vector<8x8xf32>
    %cst_30 = arith.constant dense<0.000000e+00> : vector<8x512xf32>
    %37 = tpu.matmul %36, %0, %cst_30 {dimension_numbers = #tpu.dot_dimension_numbers<[1], [0], [0], [1], [0, 0, 1, 1], [], []>} : vector<8x8xf32>, vector<8x512xf32>, vector<8x512xf32> -> vector<8x512xf32>
    %38 = arith.addf %34, %37 : vector<8x512xf32>
    %c511_i32 = arith.constant 511 : i32
    %39 = tpu.dynamic_rotate %0 by %c511_i32 dim 1 : vector<8x512xf32>, i32 -> vector<8x512xf32>
    %c5 = arith.constant 5 : index
    %c0_31 = arith.constant 0 : index
    %c0_32 = arith.constant 0 : index
    %40 = vector.load %arg2[%c5, %c0_31, %c0_32] : memref<36x8x8xf32, #tpu.memory_space<vmem>>, vector<1x8x8xf32>
    %41 = vector.shape_cast %40 : vector<1x8x8xf32> to vector<8x8xf32>
    %cst_33 = arith.constant dense<0.000000e+00> : vector<8x512xf32>
    %42 = tpu.matmul %41, %39, %cst_33 {dimension_numbers = #tpu.dot_dimension_numbers<[1], [0], [0], [1], [0, 0, 1, 1], [], []>} : vector<8x8xf32>, vector<8x512xf32>, vector<8x512xf32> -> vector<8x512xf32>
    %c6 = arith.constant 6 : index
    %c0_34 = arith.constant 0 : index
    %c0_35 = arith.constant 0 : index
    %43 = vector.load %arg4[%c6, %c0_34, %c0_35] : memref<16x8x512xf32, #tpu.memory_space<vmem>>, vector<1x8x512xf32>
    %44 = vector.shape_cast %43 : vector<1x8x512xf32> to vector<8x512xf32>
    %45 = arith.mulf %42, %44 : vector<8x512xf32>
    %46 = arith.addf %38, %45 : vector<8x512xf32>
    %c497_i32 = arith.constant 497 : i32
    %47 = tpu.dynamic_rotate %0 by %c497_i32 dim 1 : vector<8x512xf32>, i32 -> vector<8x512xf32>
    %c6_36 = arith.constant 6 : index
    %c0_37 = arith.constant 0 : index
    %c0_38 = arith.constant 0 : index
    %48 = vector.load %arg2[%c6_36, %c0_37, %c0_38] : memref<36x8x8xf32, #tpu.memory_space<vmem>>, vector<1x8x8xf32>
    %49 = vector.shape_cast %48 : vector<1x8x8xf32> to vector<8x8xf32>
    %cst_39 = arith.constant dense<0.000000e+00> : vector<8x512xf32>
    %50 = tpu.matmul %49, %47, %cst_39 {dimension_numbers = #tpu.dot_dimension_numbers<[1], [0], [0], [1], [0, 0, 1, 1], [], []>} : vector<8x8xf32>, vector<8x512xf32>, vector<8x512xf32> -> vector<8x512xf32>
    %c8 = arith.constant 8 : index
    %c0_40 = arith.constant 0 : index
    %c0_41 = arith.constant 0 : index
    %51 = vector.load %arg4[%c8, %c0_40, %c0_41] : memref<16x8x512xf32, #tpu.memory_space<vmem>>, vector<1x8x512xf32>
    %52 = vector.shape_cast %51 : vector<1x8x512xf32> to vector<8x512xf32>
    %53 = arith.mulf %50, %52 : vector<8x512xf32>
    %54 = arith.addf %46, %53 : vector<8x512xf32>
    %c496_i32 = arith.constant 496 : i32
    %55 = tpu.dynamic_rotate %0 by %c496_i32 dim 1 : vector<8x512xf32>, i32 -> vector<8x512xf32>
    %c7 = arith.constant 7 : index
    %c0_42 = arith.constant 0 : index
    %c0_43 = arith.constant 0 : index
    %56 = vector.load %arg2[%c7, %c0_42, %c0_43] : memref<36x8x8xf32, #tpu.memory_space<vmem>>, vector<1x8x8xf32>
    %57 = vector.shape_cast %56 : vector<1x8x8xf32> to vector<8x8xf32>
    %cst_44 = arith.constant dense<0.000000e+00> : vector<8x512xf32>
    %58 = tpu.matmul %57, %55, %cst_44 {dimension_numbers = #tpu.dot_dimension_numbers<[1], [0], [0], [1], [0, 0, 1, 1], [], []>} : vector<8x8xf32>, vector<8x512xf32>, vector<8x512xf32> -> vector<8x512xf32>
    %c9 = arith.constant 9 : index
    %c0_45 = arith.constant 0 : index
    %c0_46 = arith.constant 0 : index
    %59 = vector.load %arg4[%c9, %c0_45, %c0_46] : memref<16x8x512xf32, #tpu.memory_space<vmem>>, vector<1x8x512xf32>
    %60 = vector.shape_cast %59 : vector<1x8x512xf32> to vector<8x512xf32>
    %61 = arith.mulf %58, %60 : vector<8x512xf32>
    %62 = arith.addf %54, %61 : vector<8x512xf32>
    %c495_i32 = arith.constant 495 : i32
    %63 = tpu.dynamic_rotate %0 by %c495_i32 dim 1 : vector<8x512xf32>, i32 -> vector<8x512xf32>
    %c8_47 = arith.constant 8 : index
    %c0_48 = arith.constant 0 : index
    %c0_49 = arith.constant 0 : index
    %64 = vector.load %arg2[%c8_47, %c0_48, %c0_49] : memref<36x8x8xf32, #tpu.memory_space<vmem>>, vector<1x8x8xf32>
    %65 = vector.shape_cast %64 : vector<1x8x8xf32> to vector<8x8xf32>
    %cst_50 = arith.constant dense<0.000000e+00> : vector<8x512xf32>
    %66 = tpu.matmul %65, %63, %cst_50 {dimension_numbers = #tpu.dot_dimension_numbers<[1], [0], [0], [1], [0, 0, 1, 1], [], []>} : vector<8x8xf32>, vector<8x512xf32>, vector<8x512xf32> -> vector<8x512xf32>
    %c10 = arith.constant 10 : index
    %c0_51 = arith.constant 0 : index
    %c0_52 = arith.constant 0 : index
    %67 = vector.load %arg4[%c10, %c0_51, %c0_52] : memref<16x8x512xf32, #tpu.memory_space<vmem>>, vector<1x8x512xf32>
    %68 = vector.shape_cast %67 : vector<1x8x512xf32> to vector<8x512xf32>
    %69 = arith.mulf %66, %68 : vector<8x512xf32>
    %70 = arith.addf %62, %69 : vector<8x512xf32>
    %cst_53 = arith.constant 2.000000e-01 : f32
    %71 = vector.broadcast %cst_53 : f32 to vector<8x512xf32>
    %72 = arith.mulf %71, %70 : vector<8x512xf32>
    %73 = arith.maximumf %70, %72 : vector<8x512xf32>
    %c1_54 = arith.constant 1 : index
    %c0_55 = arith.constant 0 : index
    %c0_56 = arith.constant 0 : index
    %74 = vector.load %arg3[%c1_54, %c0_55, %c0_56] : memref<4x8x512xf32, #tpu.memory_space<vmem>>, vector<1x8x512xf32>
    %75 = vector.shape_cast %74 : vector<1x8x512xf32> to vector<8x512xf32>
    %c17_i32_57 = arith.constant 17 : i32
    %76 = tpu.dynamic_rotate %73 by %c17_i32_57 dim 1 : vector<8x512xf32>, i32 -> vector<8x512xf32>
    %c9_58 = arith.constant 9 : index
    %c0_59 = arith.constant 0 : index
    %c0_60 = arith.constant 0 : index
    %77 = vector.load %arg2[%c9_58, %c0_59, %c0_60] : memref<36x8x8xf32, #tpu.memory_space<vmem>>, vector<1x8x8xf32>
    %78 = vector.shape_cast %77 : vector<1x8x8xf32> to vector<8x8xf32>
    %cst_61 = arith.constant dense<0.000000e+00> : vector<8x512xf32>
    %79 = tpu.matmul %78, %76, %cst_61 {dimension_numbers = #tpu.dot_dimension_numbers<[1], [0], [0], [1], [0, 0, 1, 1], [], []>} : vector<8x8xf32>, vector<8x512xf32>, vector<8x512xf32> -> vector<8x512xf32>
    %c0_62 = arith.constant 0 : index
    %c0_63 = arith.constant 0 : index
    %c0_64 = arith.constant 0 : index
    %80 = vector.load %arg4[%c0_62, %c0_63, %c0_64] : memref<16x8x512xf32, #tpu.memory_space<vmem>>, vector<1x8x512xf32>
    %81 = vector.shape_cast %80 : vector<1x8x512xf32> to vector<8x512xf32>
    %82 = arith.mulf %79, %81 : vector<8x512xf32>
    %83 = arith.addf %75, %82 : vector<8x512xf32>
    %c16_i32_65 = arith.constant 16 : i32
    %84 = tpu.dynamic_rotate %73 by %c16_i32_65 dim 1 : vector<8x512xf32>, i32 -> vector<8x512xf32>
    %c10_66 = arith.constant 10 : index
    %c0_67 = arith.constant 0 : index
    %c0_68 = arith.constant 0 : index
    %85 = vector.load %arg2[%c10_66, %c0_67, %c0_68] : memref<36x8x8xf32, #tpu.memory_space<vmem>>, vector<1x8x8xf32>
    %86 = vector.shape_cast %85 : vector<1x8x8xf32> to vector<8x8xf32>
    %cst_69 = arith.constant dense<0.000000e+00> : vector<8x512xf32>
    %87 = tpu.matmul %86, %84, %cst_69 {dimension_numbers = #tpu.dot_dimension_numbers<[1], [0], [0], [1], [0, 0, 1, 1], [], []>} : vector<8x8xf32>, vector<8x512xf32>, vector<8x512xf32> -> vector<8x512xf32>
    %c1_70 = arith.constant 1 : index
    %c0_71 = arith.constant 0 : index
    %c0_72 = arith.constant 0 : index
    %88 = vector.load %arg4[%c1_70, %c0_71, %c0_72] : memref<16x8x512xf32, #tpu.memory_space<vmem>>, vector<1x8x512xf32>
    %89 = vector.shape_cast %88 : vector<1x8x512xf32> to vector<8x512xf32>
    %90 = arith.mulf %87, %89 : vector<8x512xf32>
    %91 = arith.addf %83, %90 : vector<8x512xf32>
    %c15_i32_73 = arith.constant 15 : i32
    %92 = tpu.dynamic_rotate %73 by %c15_i32_73 dim 1 : vector<8x512xf32>, i32 -> vector<8x512xf32>
    %c11 = arith.constant 11 : index
    %c0_74 = arith.constant 0 : index
    %c0_75 = arith.constant 0 : index
    %93 = vector.load %arg2[%c11, %c0_74, %c0_75] : memref<36x8x8xf32, #tpu.memory_space<vmem>>, vector<1x8x8xf32>
    %94 = vector.shape_cast %93 : vector<1x8x8xf32> to vector<8x8xf32>
    %cst_76 = arith.constant dense<0.000000e+00> : vector<8x512xf32>
    %95 = tpu.matmul %94, %92, %cst_76 {dimension_numbers = #tpu.dot_dimension_numbers<[1], [0], [0], [1], [0, 0, 1, 1], [], []>} : vector<8x8xf32>, vector<8x512xf32>, vector<8x512xf32> -> vector<8x512xf32>
    %c2_77 = arith.constant 2 : index
    %c0_78 = arith.constant 0 : index
    %c0_79 = arith.constant 0 : index
    %96 = vector.load %arg4[%c2_77, %c0_78, %c0_79] : memref<16x8x512xf32, #tpu.memory_space<vmem>>, vector<1x8x512xf32>
    %97 = vector.shape_cast %96 : vector<1x8x512xf32> to vector<8x512xf32>
    %98 = arith.mulf %95, %97 : vector<8x512xf32>
    %99 = arith.addf %91, %98 : vector<8x512xf32>
    %c1_i32_80 = arith.constant 1 : i32
    %100 = tpu.dynamic_rotate %73 by %c1_i32_80 dim 1 : vector<8x512xf32>, i32 -> vector<8x512xf32>
    %c12 = arith.constant 12 : index
    %c0_81 = arith.constant 0 : index
    %c0_82 = arith.constant 0 : index
    %101 = vector.load %arg2[%c12, %c0_81, %c0_82] : memref<36x8x8xf32, #tpu.memory_space<vmem>>, vector<1x8x8xf32>
    %102 = vector.shape_cast %101 : vector<1x8x8xf32> to vector<8x8xf32>
    %cst_83 = arith.constant dense<0.000000e+00> : vector<8x512xf32>
    %103 = tpu.matmul %102, %100, %cst_83 {dimension_numbers = #tpu.dot_dimension_numbers<[1], [0], [0], [1], [0, 0, 1, 1], [], []>} : vector<8x8xf32>, vector<8x512xf32>, vector<8x512xf32> -> vector<8x512xf32>
    %c4_84 = arith.constant 4 : index
    %c0_85 = arith.constant 0 : index
    %c0_86 = arith.constant 0 : index
    %104 = vector.load %arg4[%c4_84, %c0_85, %c0_86] : memref<16x8x512xf32, #tpu.memory_space<vmem>>, vector<1x8x512xf32>
    %105 = vector.shape_cast %104 : vector<1x8x512xf32> to vector<8x512xf32>
    %106 = arith.mulf %103, %105 : vector<8x512xf32>
    %107 = arith.addf %99, %106 : vector<8x512xf32>
    %c13 = arith.constant 13 : index
    %c0_87 = arith.constant 0 : index
    %c0_88 = arith.constant 0 : index
    %108 = vector.load %arg2[%c13, %c0_87, %c0_88] : memref<36x8x8xf32, #tpu.memory_space<vmem>>, vector<1x8x8xf32>
    %109 = vector.shape_cast %108 : vector<1x8x8xf32> to vector<8x8xf32>
    %cst_89 = arith.constant dense<0.000000e+00> : vector<8x512xf32>
    %110 = tpu.matmul %109, %73, %cst_89 {dimension_numbers = #tpu.dot_dimension_numbers<[1], [0], [0], [1], [0, 0, 1, 1], [], []>} : vector<8x8xf32>, vector<8x512xf32>, vector<8x512xf32> -> vector<8x512xf32>
    %111 = arith.addf %107, %110 : vector<8x512xf32>
    %c511_i32_90 = arith.constant 511 : i32
    %112 = tpu.dynamic_rotate %73 by %c511_i32_90 dim 1 : vector<8x512xf32>, i32 -> vector<8x512xf32>
    %c14 = arith.constant 14 : index
    %c0_91 = arith.constant 0 : index
    %c0_92 = arith.constant 0 : index
    %113 = vector.load %arg2[%c14, %c0_91, %c0_92] : memref<36x8x8xf32, #tpu.memory_space<vmem>>, vector<1x8x8xf32>
    %114 = vector.shape_cast %113 : vector<1x8x8xf32> to vector<8x8xf32>
    %cst_93 = arith.constant dense<0.000000e+00> : vector<8x512xf32>
    %115 = tpu.matmul %114, %112, %cst_93 {dimension_numbers = #tpu.dot_dimension_numbers<[1], [0], [0], [1], [0, 0, 1, 1], [], []>} : vector<8x8xf32>, vector<8x512xf32>, vector<8x512xf32> -> vector<8x512xf32>
    %c6_94 = arith.constant 6 : index
    %c0_95 = arith.constant 0 : index
    %c0_96 = arith.constant 0 : index
    %116 = vector.load %arg4[%c6_94, %c0_95, %c0_96] : memref<16x8x512xf32, #tpu.memory_space<vmem>>, vector<1x8x512xf32>
    %117 = vector.shape_cast %116 : vector<1x8x512xf32> to vector<8x512xf32>
    %118 = arith.mulf %115, %117 : vector<8x512xf32>
    %119 = arith.addf %111, %118 : vector<8x512xf32>
    %c497_i32_97 = arith.constant 497 : i32
    %120 = tpu.dynamic_rotate %73 by %c497_i32_97 dim 1 : vector<8x512xf32>, i32 -> vector<8x512xf32>
    %c15 = arith.constant 15 : index
    %c0_98 = arith.constant 0 : index
    %c0_99 = arith.constant 0 : index
    %121 = vector.load %arg2[%c15, %c0_98, %c0_99] : memref<36x8x8xf32, #tpu.memory_space<vmem>>, vector<1x8x8xf32>
    %122 = vector.shape_cast %121 : vector<1x8x8xf32> to vector<8x8xf32>
    %cst_100 = arith.constant dense<0.000000e+00> : vector<8x512xf32>
    %123 = tpu.matmul %122, %120, %cst_100 {dimension_numbers = #tpu.dot_dimension_numbers<[1], [0], [0], [1], [0, 0, 1, 1], [], []>} : vector<8x8xf32>, vector<8x512xf32>, vector<8x512xf32> -> vector<8x512xf32>
    %c8_101 = arith.constant 8 : index
    %c0_102 = arith.constant 0 : index
    %c0_103 = arith.constant 0 : index
    %124 = vector.load %arg4[%c8_101, %c0_102, %c0_103] : memref<16x8x512xf32, #tpu.memory_space<vmem>>, vector<1x8x512xf32>
    %125 = vector.shape_cast %124 : vector<1x8x512xf32> to vector<8x512xf32>
    %126 = arith.mulf %123, %125 : vector<8x512xf32>
    %127 = arith.addf %119, %126 : vector<8x512xf32>
    %c496_i32_104 = arith.constant 496 : i32
    %128 = tpu.dynamic_rotate %73 by %c496_i32_104 dim 1 : vector<8x512xf32>, i32 -> vector<8x512xf32>
    %c16 = arith.constant 16 : index
    %c0_105 = arith.constant 0 : index
    %c0_106 = arith.constant 0 : index
    %129 = vector.load %arg2[%c16, %c0_105, %c0_106] : memref<36x8x8xf32, #tpu.memory_space<vmem>>, vector<1x8x8xf32>
    %130 = vector.shape_cast %129 : vector<1x8x8xf32> to vector<8x8xf32>
    %cst_107 = arith.constant dense<0.000000e+00> : vector<8x512xf32>
    %131 = tpu.matmul %130, %128, %cst_107 {dimension_numbers = #tpu.dot_dimension_numbers<[1], [0], [0], [1], [0, 0, 1, 1], [], []>} : vector<8x8xf32>, vector<8x512xf32>, vector<8x512xf32> -> vector<8x512xf32>
    %c9_108 = arith.constant 9 : index
    %c0_109 = arith.constant 0 : index
    %c0_110 = arith.constant 0 : index
    %132 = vector.load %arg4[%c9_108, %c0_109, %c0_110] : memref<16x8x512xf32, #tpu.memory_space<vmem>>, vector<1x8x512xf32>
    %133 = vector.shape_cast %132 : vector<1x8x512xf32> to vector<8x512xf32>
    %134 = arith.mulf %131, %133 : vector<8x512xf32>
    %135 = arith.addf %127, %134 : vector<8x512xf32>
    %c495_i32_111 = arith.constant 495 : i32
    %136 = tpu.dynamic_rotate %73 by %c495_i32_111 dim 1 : vector<8x512xf32>, i32 -> vector<8x512xf32>
    %c17 = arith.constant 17 : index
    %c0_112 = arith.constant 0 : index
    %c0_113 = arith.constant 0 : index
    %137 = vector.load %arg2[%c17, %c0_112, %c0_113] : memref<36x8x8xf32, #tpu.memory_space<vmem>>, vector<1x8x8xf32>
    %138 = vector.shape_cast %137 : vector<1x8x8xf32> to vector<8x8xf32>
    %cst_114 = arith.constant dense<0.000000e+00> : vector<8x512xf32>
    %139 = tpu.matmul %138, %136, %cst_114 {dimension_numbers = #tpu.dot_dimension_numbers<[1], [0], [0], [1], [0, 0, 1, 1], [], []>} : vector<8x8xf32>, vector<8x512xf32>, vector<8x512xf32> -> vector<8x512xf32>
    %c10_115 = arith.constant 10 : index
    %c0_116 = arith.constant 0 : index
    %c0_117 = arith.constant 0 : index
    %140 = vector.load %arg4[%c10_115, %c0_116, %c0_117] : memref<16x8x512xf32, #tpu.memory_space<vmem>>, vector<1x8x512xf32>
    %141 = vector.shape_cast %140 : vector<1x8x512xf32> to vector<8x512xf32>
    %142 = arith.mulf %139, %141 : vector<8x512xf32>
    %143 = arith.addf %135, %142 : vector<8x512xf32>
    %cst_118 = arith.constant 2.000000e-01 : f32
    %144 = vector.broadcast %cst_118 : f32 to vector<8x512xf32>
    %145 = arith.mulf %144, %143 : vector<8x512xf32>
    %146 = arith.maximumf %143, %145 : vector<8x512xf32>
    %c18 = arith.constant 18 : index
    %c0_119 = arith.constant 0 : index
    %c0_120 = arith.constant 0 : index
    %147 = vector.load %arg2[%c18, %c0_119, %c0_120] : memref<36x8x8xf32, #tpu.memory_space<vmem>>, vector<1x8x8xf32>
    %148 = vector.shape_cast %147 : vector<1x8x8xf32> to vector<8x8xf32>
    %cst_121 = arith.constant dense<0.000000e+00> : vector<8x512xf32>
    %149 = tpu.matmul %148, %0, %cst_121 {dimension_numbers = #tpu.dot_dimension_numbers<[1], [0], [0], [1], [0, 0, 1, 1], [], []>} : vector<8x8xf32>, vector<8x512xf32>, vector<8x512xf32> -> vector<8x512xf32>
    %150 = arith.addf %146, %149 : vector<8x512xf32>
    %c2_122 = arith.constant 2 : index
    %c0_123 = arith.constant 0 : index
    %c0_124 = arith.constant 0 : index
    %151 = vector.load %arg3[%c2_122, %c0_123, %c0_124] : memref<4x8x512xf32, #tpu.memory_space<vmem>>, vector<1x8x512xf32>
    %152 = vector.shape_cast %151 : vector<1x8x512xf32> to vector<8x512xf32>
    %153 = arith.addf %150, %152 : vector<8x512xf32>
    %c19 = arith.constant 19 : index
    %c0_125 = arith.constant 0 : index
    %c0_126 = arith.constant 0 : index
    %154 = vector.load %arg2[%c19, %c0_125, %c0_126] : memref<36x8x8xf32, #tpu.memory_space<vmem>>, vector<1x8x8xf32>
    %155 = vector.shape_cast %154 : vector<1x8x8xf32> to vector<8x8xf32>
    %cst_127 = arith.constant dense<0.000000e+00> : vector<8x512xf32>
    %156 = tpu.matmul %155, %153, %cst_127 {dimension_numbers = #tpu.dot_dimension_numbers<[1], [0], [0], [1], [0, 0, 1, 1], [], []>} : vector<8x8xf32>, vector<8x512xf32>, vector<8x512xf32> -> vector<8x512xf32>
    %c3_128 = arith.constant 3 : index
    %c0_129 = arith.constant 0 : index
    %c0_130 = arith.constant 0 : index
    %157 = vector.load %arg3[%c3_128, %c0_129, %c0_130] : memref<4x8x512xf32, #tpu.memory_space<vmem>>, vector<1x8x512xf32>
    %158 = vector.shape_cast %157 : vector<1x8x512xf32> to vector<8x512xf32>
    %159 = arith.addf %156, %158 : vector<8x512xf32>
    %c0_131 = arith.constant 0 : index
    %c0_132 = arith.constant 0 : index
    %160 = vector.load %arg6[%c0_131, %c0_132] : memref<8x512xf32, #tpu.memory_space<vmem>>, vector<8x512xf32>
    tpu.vector_store %arg6[%c0_131, %c0_132], %159 {strides = array<i32>} : memref<8x512xf32, #tpu.memory_space<vmem>>, vector<8x512xf32>,
    %c17_i32_133 = arith.constant 17 : i32
    %161 = tpu.dynamic_rotate %153 by %c17_i32_133 dim 1 : vector<8x512xf32>, i32 -> vector<8x512xf32>
    %c20 = arith.constant 20 : index
    %c0_134 = arith.constant 0 : index
    %c0_135 = arith.constant 0 : index
    %162 = vector.load %arg2[%c20, %c0_134, %c0_135] : memref<36x8x8xf32, #tpu.memory_space<vmem>>, vector<1x8x8xf32>
    %163 = vector.shape_cast %162 : vector<1x8x8xf32> to vector<8x8xf32>
    %cst_136 = arith.constant dense<0.000000e+00> : vector<8x512xf32>
    %164 = tpu.matmul %163, %161, %cst_136 {dimension_numbers = #tpu.dot_dimension_numbers<[1], [0], [0], [1], [0, 0, 1, 1], [], []>} : vector<8x8xf32>, vector<8x512xf32>, vector<8x512xf32> -> vector<8x512xf32>
    %c0_137 = arith.constant 0 : index
    %c0_138 = arith.constant 0 : index
    %c0_139 = arith.constant 0 : index
    %165 = vector.load %arg4[%c0_137, %c0_138, %c0_139] : memref<16x8x512xf32, #tpu.memory_space<vmem>>, vector<1x8x512xf32>
    %166 = vector.shape_cast %165 : vector<1x8x512xf32> to vector<8x512xf32>
    %167 = arith.mulf %164, %166 : vector<8x512xf32>
    %c16_i32_140 = arith.constant 16 : i32
    %168 = tpu.dynamic_rotate %153 by %c16_i32_140 dim 1 : vector<8x512xf32>, i32 -> vector<8x512xf32>
    %c21 = arith.constant 21 : index
    %c0_141 = arith.constant 0 : index
    %c0_142 = arith.constant 0 : index
    %169 = vector.load %arg2[%c21, %c0_141, %c0_142] : memref<36x8x8xf32, #tpu.memory_space<vmem>>, vector<1x8x8xf32>
    %170 = vector.shape_cast %169 : vector<1x8x8xf32> to vector<8x8xf32>
    %cst_143 = arith.constant dense<0.000000e+00> : vector<8x512xf32>
    %171 = tpu.matmul %170, %168, %cst_143 {dimension_numbers = #tpu.dot_dimension_numbers<[1], [0], [0], [1], [0, 0, 1, 1], [], []>} : vector<8x8xf32>, vector<8x512xf32>, vector<8x512xf32> -> vector<8x512xf32>
    %c1_144 = arith.constant 1 : index
    %c0_145 = arith.constant 0 : index
    %c0_146 = arith.constant 0 : index
    %172 = vector.load %arg4[%c1_144, %c0_145, %c0_146] : memref<16x8x512xf32, #tpu.memory_space<vmem>>, vector<1x8x512xf32>
    %173 = vector.shape_cast %172 : vector<1x8x512xf32> to vector<8x512xf32>
    %174 = arith.mulf %171, %173 : vector<8x512xf32>
    %175 = arith.addf %167, %174 : vector<8x512xf32>
    %c15_i32_147 = arith.constant 15 : i32
    %176 = tpu.dynamic_rotate %153 by %c15_i32_147 dim 1 : vector<8x512xf32>, i32 -> vector<8x512xf32>
    %c22 = arith.constant 22 : index
    %c0_148 = arith.constant 0 : index
    %c0_149 = arith.constant 0 : index
    %177 = vector.load %arg2[%c22, %c0_148, %c0_149] : memref<36x8x8xf32, #tpu.memory_space<vmem>>, vector<1x8x8xf32>
    %178 = vector.shape_cast %177 : vector<1x8x8xf32> to vector<8x8xf32>
    %cst_150 = arith.constant dense<0.000000e+00> : vector<8x512xf32>
    %179 = tpu.matmul %178, %176, %cst_150 {dimension_numbers = #tpu.dot_dimension_numbers<[1], [0], [0], [1], [0, 0, 1, 1], [], []>} : vector<8x8xf32>, vector<8x512xf32>, vector<8x512xf32> -> vector<8x512xf32>
    %c2_151 = arith.constant 2 : index
    %c0_152 = arith.constant 0 : index
    %c0_153 = arith.constant 0 : index
    %180 = vector.load %arg4[%c2_151, %c0_152, %c0_153] : memref<16x8x512xf32, #tpu.memory_space<vmem>>, vector<1x8x512xf32>
    %181 = vector.shape_cast %180 : vector<1x8x512xf32> to vector<8x512xf32>
    %182 = arith.mulf %179, %181 : vector<8x512xf32>
    %183 = arith.addf %175, %182 : vector<8x512xf32>
    %c14_i32 = arith.constant 14 : i32
    %184 = tpu.dynamic_rotate %153 by %c14_i32 dim 1 : vector<8x512xf32>, i32 -> vector<8x512xf32>
    %c23 = arith.constant 23 : index
    %c0_154 = arith.constant 0 : index
    %c0_155 = arith.constant 0 : index
    %185 = vector.load %arg2[%c23, %c0_154, %c0_155] : memref<36x8x8xf32, #tpu.memory_space<vmem>>, vector<1x8x8xf32>
    %186 = vector.shape_cast %185 : vector<1x8x8xf32> to vector<8x8xf32>
    %cst_156 = arith.constant dense<0.000000e+00> : vector<8x512xf32>
    %187 = tpu.matmul %186, %184, %cst_156 {dimension_numbers = #tpu.dot_dimension_numbers<[1], [0], [0], [1], [0, 0, 1, 1], [], []>} : vector<8x8xf32>, vector<8x512xf32>, vector<8x512xf32> -> vector<8x512xf32>
    %c3_157 = arith.constant 3 : index
    %c0_158 = arith.constant 0 : index
    %c0_159 = arith.constant 0 : index
    %188 = vector.load %arg4[%c3_157, %c0_158, %c0_159] : memref<16x8x512xf32, #tpu.memory_space<vmem>>, vector<1x8x512xf32>
    %189 = vector.shape_cast %188 : vector<1x8x512xf32> to vector<8x512xf32>
    %190 = arith.mulf %187, %189 : vector<8x512xf32>
    %191 = arith.addf %183, %190 : vector<8x512xf32>
    %c1_i32_160 = arith.constant 1 : i32
    %192 = tpu.dynamic_rotate %153 by %c1_i32_160 dim 1 : vector<8x512xf32>, i32 -> vector<8x512xf32>
    %c24 = arith.constant 24 : index
    %c0_161 = arith.constant 0 : index
    %c0_162 = arith.constant 0 : index
    %193 = vector.load %arg2[%c24, %c0_161, %c0_162] : memref<36x8x8xf32, #tpu.memory_space<vmem>>, vector<1x8x8xf32>
    %194 = vector.shape_cast %193 : vector<1x8x8xf32> to vector<8x8xf32>
    %cst_163 = arith.constant dense<0.000000e+00> : vector<8x512xf32>
    %195 = tpu.matmul %194, %192, %cst_163 {dimension_numbers = #tpu.dot_dimension_numbers<[1], [0], [0], [1], [0, 0, 1, 1], [], []>} : vector<8x8xf32>, vector<8x512xf32>, vector<8x512xf32> -> vector<8x512xf32>
    %c4_164 = arith.constant 4 : index
    %c0_165 = arith.constant 0 : index
    %c0_166 = arith.constant 0 : index
    %196 = vector.load %arg4[%c4_164, %c0_165, %c0_166] : memref<16x8x512xf32, #tpu.memory_space<vmem>>, vector<1x8x512xf32>
    %197 = vector.shape_cast %196 : vector<1x8x512xf32> to vector<8x512xf32>
    %198 = arith.mulf %195, %197 : vector<8x512xf32>
    %199 = arith.addf %191, %198 : vector<8x512xf32>
    %c25 = arith.constant 25 : index
    %c0_167 = arith.constant 0 : index
    %c0_168 = arith.constant 0 : index
    %200 = vector.load %arg2[%c25, %c0_167, %c0_168] : memref<36x8x8xf32, #tpu.memory_space<vmem>>, vector<1x8x8xf32>
    %201 = vector.shape_cast %200 : vector<1x8x8xf32> to vector<8x8xf32>
    %cst_169 = arith.constant dense<0.000000e+00> : vector<8x512xf32>
    %202 = tpu.matmul %201, %153, %cst_169 {dimension_numbers = #tpu.dot_dimension_numbers<[1], [0], [0], [1], [0, 0, 1, 1], [], []>} : vector<8x8xf32>, vector<8x512xf32>, vector<8x512xf32> -> vector<8x512xf32>
    %203 = arith.addf %199, %202 : vector<8x512xf32>
    %c511_i32_170 = arith.constant 511 : i32
    %204 = tpu.dynamic_rotate %153 by %c511_i32_170 dim 1 : vector<8x512xf32>, i32 -> vector<8x512xf32>
    %c26 = arith.constant 26 : index
    %c0_171 = arith.constant 0 : index
    %c0_172 = arith.constant 0 : index
    %205 = vector.load %arg2[%c26, %c0_171, %c0_172] : memref<36x8x8xf32, #tpu.memory_space<vmem>>, vector<1x8x8xf32>
    %206 = vector.shape_cast %205 : vector<1x8x8xf32> to vector<8x8xf32>
    %cst_173 = arith.constant dense<0.000000e+00> : vector<8x512xf32>
    %207 = tpu.matmul %206, %204, %cst_173 {dimension_numbers = #tpu.dot_dimension_numbers<[1], [0], [0], [1], [0, 0, 1, 1], [], []>} : vector<8x8xf32>, vector<8x512xf32>, vector<8x512xf32> -> vector<8x512xf32>
    %c6_174 = arith.constant 6 : index
    %c0_175 = arith.constant 0 : index
    %c0_176 = arith.constant 0 : index
    %208 = vector.load %arg4[%c6_174, %c0_175, %c0_176] : memref<16x8x512xf32, #tpu.memory_space<vmem>>, vector<1x8x512xf32>
    %209 = vector.shape_cast %208 : vector<1x8x512xf32> to vector<8x512xf32>
    %210 = arith.mulf %207, %209 : vector<8x512xf32>
    %211 = arith.addf %203, %210 : vector<8x512xf32>
    %c510_i32 = arith.constant 510 : i32
    %212 = tpu.dynamic_rotate %153 by %c510_i32 dim 1 : vector<8x512xf32>, i32 -> vector<8x512xf32>
    %c27 = arith.constant 27 : index
    %c0_177 = arith.constant 0 : index
    %c0_178 = arith.constant 0 : index
    %213 = vector.load %arg2[%c27, %c0_177, %c0_178] : memref<36x8x8xf32, #tpu.memory_space<vmem>>, vector<1x8x8xf32>
    %214 = vector.shape_cast %213 : vector<1x8x8xf32> to vector<8x8xf32>
    %cst_179 = arith.constant dense<0.000000e+00> : vector<8x512xf32>
    %215 = tpu.matmul %214, %212, %cst_179 {dimension_numbers = #tpu.dot_dimension_numbers<[1], [0], [0], [1], [0, 0, 1, 1], [], []>} : vector<8x8xf32>, vector<8x512xf32>, vector<8x512xf32> -> vector<8x512xf32>
    %c7_180 = arith.constant 7 : index
    %c0_181 = arith.constant 0 : index
    %c0_182 = arith.constant 0 : index
    %216 = vector.load %arg4[%c7_180, %c0_181, %c0_182] : memref<16x8x512xf32, #tpu.memory_space<vmem>>, vector<1x8x512xf32>
    %217 = vector.shape_cast %216 : vector<1x8x512xf32> to vector<8x512xf32>
    %218 = arith.mulf %215, %217 : vector<8x512xf32>
    %219 = arith.addf %211, %218 : vector<8x512xf32>
    %c497_i32_183 = arith.constant 497 : i32
    %220 = tpu.dynamic_rotate %153 by %c497_i32_183 dim 1 : vector<8x512xf32>, i32 -> vector<8x512xf32>
    %c28 = arith.constant 28 : index
    %c0_184 = arith.constant 0 : index
    %c0_185 = arith.constant 0 : index
    %221 = vector.load %arg2[%c28, %c0_184, %c0_185] : memref<36x8x8xf32, #tpu.memory_space<vmem>>, vector<1x8x8xf32>
    %222 = vector.shape_cast %221 : vector<1x8x8xf32> to vector<8x8xf32>
    %cst_186 = arith.constant dense<0.000000e+00> : vector<8x512xf32>
    %223 = tpu.matmul %222, %220, %cst_186 {dimension_numbers = #tpu.dot_dimension_numbers<[1], [0], [0], [1], [0, 0, 1, 1], [], []>} : vector<8x8xf32>, vector<8x512xf32>, vector<8x512xf32> -> vector<8x512xf32>
    %c8_187 = arith.constant 8 : index
    %c0_188 = arith.constant 0 : index
    %c0_189 = arith.constant 0 : index
    %224 = vector.load %arg4[%c8_187, %c0_188, %c0_189] : memref<16x8x512xf32, #tpu.memory_space<vmem>>, vector<1x8x512xf32>
    %225 = vector.shape_cast %224 : vector<1x8x512xf32> to vector<8x512xf32>
    %226 = arith.mulf %223, %225 : vector<8x512xf32>
    %227 = arith.addf %219, %226 : vector<8x512xf32>
    %c496_i32_190 = arith.constant 496 : i32
    %228 = tpu.dynamic_rotate %153 by %c496_i32_190 dim 1 : vector<8x512xf32>, i32 -> vector<8x512xf32>
    %c29 = arith.constant 29 : index
    %c0_191 = arith.constant 0 : index
    %c0_192 = arith.constant 0 : index
    %229 = vector.load %arg2[%c29, %c0_191, %c0_192] : memref<36x8x8xf32, #tpu.memory_space<vmem>>, vector<1x8x8xf32>
    %230 = vector.shape_cast %229 : vector<1x8x8xf32> to vector<8x8xf32>
    %cst_193 = arith.constant dense<0.000000e+00> : vector<8x512xf32>
    %231 = tpu.matmul %230, %228, %cst_193 {dimension_numbers = #tpu.dot_dimension_numbers<[1], [0], [0], [1], [0, 0, 1, 1], [], []>} : vector<8x8xf32>, vector<8x512xf32>, vector<8x512xf32> -> vector<8x512xf32>
    %c9_194 = arith.constant 9 : index
    %c0_195 = arith.constant 0 : index
    %c0_196 = arith.constant 0 : index
    %232 = vector.load %arg4[%c9_194, %c0_195, %c0_196] : memref<16x8x512xf32, #tpu.memory_space<vmem>>, vector<1x8x512xf32>
    %233 = vector.shape_cast %232 : vector<1x8x512xf32> to vector<8x512xf32>
    %234 = arith.mulf %231, %233 : vector<8x512xf32>
    %235 = arith.addf %227, %234 : vector<8x512xf32>
    %c495_i32_197 = arith.constant 495 : i32
    %236 = tpu.dynamic_rotate %153 by %c495_i32_197 dim 1 : vector<8x512xf32>, i32 -> vector<8x512xf32>
    %c30 = arith.constant 30 : index
    %c0_198 = arith.constant 0 : index
    %c0_199 = arith.constant 0 : index
    %237 = vector.load %arg2[%c30, %c0_198, %c0_199] : memref<36x8x8xf32, #tpu.memory_space<vmem>>, vector<1x8x8xf32>
    %238 = vector.shape_cast %237 : vector<1x8x8xf32> to vector<8x8xf32>
    %cst_200 = arith.constant dense<0.000000e+00> : vector<8x512xf32>
    %239 = tpu.matmul %238, %236, %cst_200 {dimension_numbers = #tpu.dot_dimension_numbers<[1], [0], [0], [1], [0, 0, 1, 1], [], []>} : vector<8x8xf32>, vector<8x512xf32>, vector<8x512xf32> -> vector<8x512xf32>
    %c10_201 = arith.constant 10 : index
    %c0_202 = arith.constant 0 : index
    %c0_203 = arith.constant 0 : index
    %240 = vector.load %arg4[%c10_201, %c0_202, %c0_203] : memref<16x8x512xf32, #tpu.memory_space<vmem>>, vector<1x8x512xf32>
    %241 = vector.shape_cast %240 : vector<1x8x512xf32> to vector<8x512xf32>
    %242 = arith.mulf %239, %241 : vector<8x512xf32>
    %243 = arith.addf %235, %242 : vector<8x512xf32>
    %c494_i32 = arith.constant 494 : i32
    %244 = tpu.dynamic_rotate %153 by %c494_i32 dim 1 : vector<8x512xf32>, i32 -> vector<8x512xf32>
    %c31 = arith.constant 31 : index
    %c0_204 = arith.constant 0 : index
    %c0_205 = arith.constant 0 : index
    %245 = vector.load %arg2[%c31, %c0_204, %c0_205] : memref<36x8x8xf32, #tpu.memory_space<vmem>>, vector<1x8x8xf32>
    %246 = vector.shape_cast %245 : vector<1x8x8xf32> to vector<8x8xf32>
    %cst_206 = arith.constant dense<0.000000e+00> : vector<8x512xf32>
    %247 = tpu.matmul %246, %244, %cst_206 {dimension_numbers = #tpu.dot_dimension_numbers<[1], [0], [0], [1], [0, 0, 1, 1], [], []>} : vector<8x8xf32>, vector<8x512xf32>, vector<8x512xf32> -> vector<8x512xf32>
    %c11_207 = arith.constant 11 : index
    %c0_208 = arith.constant 0 : index
    %c0_209 = arith.constant 0 : index
    %248 = vector.load %arg4[%c11_207, %c0_208, %c0_209] : memref<16x8x512xf32, #tpu.memory_space<vmem>>, vector<1x8x512xf32>
    %249 = vector.shape_cast %248 : vector<1x8x512xf32> to vector<8x512xf32>
    %250 = arith.mulf %247, %249 : vector<8x512xf32>
    %251 = arith.addf %243, %250 : vector<8x512xf32>
    %c481_i32 = arith.constant 481 : i32
    %252 = tpu.dynamic_rotate %153 by %c481_i32 dim 1 : vector<8x512xf32>, i32 -> vector<8x512xf32>
    %c32 = arith.constant 32 : index
    %c0_210 = arith.constant 0 : index
    %c0_211 = arith.constant 0 : index
    %253 = vector.load %arg2[%c32, %c0_210, %c0_211] : memref<36x8x8xf32, #tpu.memory_space<vmem>>, vector<1x8x8xf32>
    %254 = vector.shape_cast %253 : vector<1x8x8xf32> to vector<8x8xf32>
    %cst_212 = arith.constant dense<0.000000e+00> : vector<8x512xf32>
    %255 = tpu.matmul %254, %252, %cst_212 {dimension_numbers = #tpu.dot_dimension_numbers<[1], [0], [0], [1], [0, 0, 1, 1], [], []>} : vector<8x8xf32>, vector<8x512xf32>, vector<8x512xf32> -> vector<8x512xf32>
    %c12_213 = arith.constant 12 : index
    %c0_214 = arith.constant 0 : index
    %c0_215 = arith.constant 0 : index
    %256 = vector.load %arg4[%c12_213, %c0_214, %c0_215] : memref<16x8x512xf32, #tpu.memory_space<vmem>>, vector<1x8x512xf32>
    %257 = vector.shape_cast %256 : vector<1x8x512xf32> to vector<8x512xf32>
    %258 = arith.mulf %255, %257 : vector<8x512xf32>
    %259 = arith.addf %251, %258 : vector<8x512xf32>
    %c480_i32 = arith.constant 480 : i32
    %260 = tpu.dynamic_rotate %153 by %c480_i32 dim 1 : vector<8x512xf32>, i32 -> vector<8x512xf32>
    %c33 = arith.constant 33 : index
    %c0_216 = arith.constant 0 : index
    %c0_217 = arith.constant 0 : index
    %261 = vector.load %arg2[%c33, %c0_216, %c0_217] : memref<36x8x8xf32, #tpu.memory_space<vmem>>, vector<1x8x8xf32>
    %262 = vector.shape_cast %261 : vector<1x8x8xf32> to vector<8x8xf32>
    %cst_218 = arith.constant dense<0.000000e+00> : vector<8x512xf32>
    %263 = tpu.matmul %262, %260, %cst_218 {dimension_numbers = #tpu.dot_dimension_numbers<[1], [0], [0], [1], [0, 0, 1, 1], [], []>} : vector<8x8xf32>, vector<8x512xf32>, vector<8x512xf32> -> vector<8x512xf32>
    %c13_219 = arith.constant 13 : index
    %c0_220 = arith.constant 0 : index
    %c0_221 = arith.constant 0 : index
    %264 = vector.load %arg4[%c13_219, %c0_220, %c0_221] : memref<16x8x512xf32, #tpu.memory_space<vmem>>, vector<1x8x512xf32>
    %265 = vector.shape_cast %264 : vector<1x8x512xf32> to vector<8x512xf32>
    %266 = arith.mulf %263, %265 : vector<8x512xf32>
    %267 = arith.addf %259, %266 : vector<8x512xf32>
    %c479_i32 = arith.constant 479 : i32
    %268 = tpu.dynamic_rotate %153 by %c479_i32 dim 1 : vector<8x512xf32>, i32 -> vector<8x512xf32>
    %c34 = arith.constant 34 : index
    %c0_222 = arith.constant 0 : index
    %c0_223 = arith.constant 0 : index
    %269 = vector.load %arg2[%c34, %c0_222, %c0_223] : memref<36x8x8xf32, #tpu.memory_space<vmem>>, vector<1x8x8xf32>
    %270 = vector.shape_cast %269 : vector<1x8x8xf32> to vector<8x8xf32>
    %cst_224 = arith.constant dense<0.000000e+00> : vector<8x512xf32>
    %271 = tpu.matmul %270, %268, %cst_224 {dimension_numbers = #tpu.dot_dimension_numbers<[1], [0], [0], [1], [0, 0, 1, 1], [], []>} : vector<8x8xf32>, vector<8x512xf32>, vector<8x512xf32> -> vector<8x512xf32>
    %c14_225 = arith.constant 14 : index
    %c0_226 = arith.constant 0 : index
    %c0_227 = arith.constant 0 : index
    %272 = vector.load %arg4[%c14_225, %c0_226, %c0_227] : memref<16x8x512xf32, #tpu.memory_space<vmem>>, vector<1x8x512xf32>
    %273 = vector.shape_cast %272 : vector<1x8x512xf32> to vector<8x512xf32>
    %274 = arith.mulf %271, %273 : vector<8x512xf32>
    %275 = arith.addf %267, %274 : vector<8x512xf32>
    %c478_i32 = arith.constant 478 : i32
    %276 = tpu.dynamic_rotate %153 by %c478_i32 dim 1 : vector<8x512xf32>, i32 -> vector<8x512xf32>
    %c35 = arith.constant 35 : index
    %c0_228 = arith.constant 0 : index
    %c0_229 = arith.constant 0 : index
    %277 = vector.load %arg2[%c35, %c0_228, %c0_229] : memref<36x8x8xf32, #tpu.memory_space<vmem>>, vector<1x8x8xf32>
    %278 = vector.shape_cast %277 : vector<1x8x8xf32> to vector<8x8xf32>
    %cst_230 = arith.constant dense<0.000000e+00> : vector<8x512xf32>
    %279 = tpu.matmul %278, %276, %cst_230 {dimension_numbers = #tpu.dot_dimension_numbers<[1], [0], [0], [1], [0, 0, 1, 1], [], []>} : vector<8x8xf32>, vector<8x512xf32>, vector<8x512xf32> -> vector<8x512xf32>
    %c15_231 = arith.constant 15 : index
    %c0_232 = arith.constant 0 : index
    %c0_233 = arith.constant 0 : index
    %280 = vector.load %arg4[%c15_231, %c0_232, %c0_233] : memref<16x8x512xf32, #tpu.memory_space<vmem>>, vector<1x8x512xf32>
    %281 = vector.shape_cast %280 : vector<1x8x512xf32> to vector<8x512xf32>
    %282 = arith.mulf %279, %281 : vector<8x512xf32>
    %283 = arith.addf %275, %282 : vector<8x512xf32>
    %c0_234 = arith.constant 0 : index
    %c0_235 = arith.constant 0 : index
    %284 = vector.load %arg5[%c0_234, %c0_235] : memref<512x128xf32, #tpu.memory_space<vmem>>, vector<512x128xf32>
    %cst_236 = arith.constant dense<0.000000e+00> : vector<8x128xf32>
    %285 = tpu.matmul %283, %284, %cst_236 {dimension_numbers = #tpu.dot_dimension_numbers<[1], [0], [0], [1], [0, 0, 1, 1], [], []>} : vector<8x512xf32>, vector<512x128xf32>, vector<8x128xf32> -> vector<8x128xf32>
    %c0_237 = arith.constant 0 : index
    %c0_238 = arith.constant 0 : index
    %286 = vector.load %arg7[%c0_237, %c0_238] : memref<8x128xf32, #tpu.memory_space<vmem>>, vector<8x128xf32>
    tpu.vector_store %arg7[%c0_237, %c0_238], %285 {strides = array<i32>} : memref<8x128xf32, #tpu.memory_space<vmem>>, vector<8x128xf32>,
    return
  }
  func.func @transform_0(%arg0: i32) -> (i32, i32) {
    %c0_i32 = arith.constant 0 : i32
    %c0_i32_0 = arith.constant 0 : i32
    %c0_i32_1 = arith.constant 0 : i32
    return %c0_i32, %c0_i32_0 : i32, i32
  }
  func.func @transform_1(%arg0: i32) -> (i32, i32, i32) {
    %c0_i32 = arith.constant 0 : i32
    %c0_i32_0 = arith.constant 0 : i32
    %c0_i32_1 = arith.constant 0 : i32
    %c0_i32_2 = arith.constant 0 : i32
    return %c0_i32, %c0_i32_0, %c0_i32_1 : i32, i32, i32
  }
  func.func @transform_2(%arg0: i32) -> (i32, i32, i32) {
    %c0_i32 = arith.constant 0 : i32
    %c0_i32_0 = arith.constant 0 : i32
    %c0_i32_1 = arith.constant 0 : i32
    %c0_i32_2 = arith.constant 0 : i32
    return %c0_i32, %c0_i32_0, %c0_i32_1 : i32, i32, i32
  }
  func.func @transform_3(%arg0: i32) -> (i32, i32, i32) {
    %c0_i32 = arith.constant 0 : i32
    %c0_i32_0 = arith.constant 0 : i32
    %c0_i32_1 = arith.constant 0 : i32
    %c0_i32_2 = arith.constant 0 : i32
    return %c0_i32, %c0_i32_0, %c0_i32_1 : i32, i32, i32
  }
  func.func @transform_4(%arg0: i32) -> (i32, i32) {
    %c0_i32 = arith.constant 0 : i32
    %c0_i32_0 = arith.constant 0 : i32
    %c0_i32_1 = arith.constant 0 : i32
    return %c0_i32, %c0_i32_0 : i32, i32
  }
  func.func @transform_5(%arg0: i32) -> (i32, i32) {
    %c0_i32 = arith.constant 0 : i32
    %c0_i32_0 = arith.constant 0 : i32
    %c0_i32_1 = arith.constant 0 : i32
    return %c0_i32, %c0_i32_0 : i32, i32
  }
  func.func @transform_6(%arg0: i32) -> (i32, i32) {
    %c0_i32 = arith.constant 0 : i32
    %c0_i32_0 = arith.constant 0 : i32
    %c0_i32_1 = arith.constant 0 : i32
    return %c0_i32, %c0_i32_0 : i32, i32
  }
}

</mosaic_0001>

<bundles_post_ra>
// kernel: unet_ev_conv_block.1
= control target key start
LH: loop header
LB: loop body
LE: loop exit
PB: predicated region body
PF: predicated region fallthrough
CT: control target
= control target key end

     0   :  { %12 = vsyncpa [#allocation3], 0  ;;  %s6728_s21 = smov [#allocation2]   ;;  %s8006_s0 = inlined_call_operand.vmem [shape: f32[8,512], index: 0, kind: input, shape index: {}]   ;;  %s8007_s1 = inlined_call_operand.vmem [shape: f32[36,8,8], index: 1, kind: input, shape index: {}]   ;;  %s8008_s2 = inlined_call_operand.vmem [shape: f32[4,8,512], index: 2, kind: input, shape index: {}]   ;;  %s8009_s3 = inlined_call_operand.vmem [shape: f32[16,8,512], index: 3, kind: input, shape index: {}]   ;;  %s8010_s4 = inlined_call_operand.hbm [shape: f32[512,128], index: 4, kind: input, shape index: {}]   ;;  %s8011_s5 = inlined_call_operand.vmem [shape: f32[8,512], index: 5, kind: output, shape index: {0}]   ;;  %s8012_s6 = inlined_call_operand.vmem [shape: f32[8,128], index: 6, kind: output, shape index: {1}]  }
   0x1   :  { %s26_s22 = sshll.u32 %s6728_s21, 4  ;;  %s6704_s25 = scalar_lea.hbm %s8010_s4, 8192  ;;  %s27_s22 = int_to_ptr.vmem [resolvable:$true] %s26_s22 }
   0x2   :  { %p6705_p0 = scmp.ne.s32.totalorder %s8010_s4, %s6704_s25  ;;  %p6708_p1 = scmp.lt.u32.totalorder %s6704_s25, %s8010_s4 }
   0x4   :  { %p6710_p2 = pnand %p6708_p1, %p6705_p0 }
   0x6   :  { %6713 = shalt.err (!%p6710_p2)
}
   0x7   :  { %s6714_s30 = scalar_lea.vmem %s27_s22, 8192  ;;  %p6719_p4 = scmp.lt.s32.totalorder %s27_s22, %s27_s22 }
   0x8   :  { %p6715_p3 = scmp.ne.s32.totalorder %s27_s22, %s6714_s30  ;;  %p6720_p5 = scmp.lt.s32.totalorder %s6714_s30, %s6714_s30 }
   0xa   :  { %p6721_p6 = por %p6720_p5, %p6719_p4 }
   0xc   :  { %p6722_p7 = pnand %p6721_p6, %p6715_p3 }
   0xe   :  { %6725 = shalt.err (!%p6722_p7)
}
   0xf   :  { %s6729_s7 = smov 128   ;;  %s6730_s8 = smov 8  }
  0x10   :  { %32 = dma.hbm_to_vmem [thread:$0]  %s8010_s4, 8192, %s27_s22, [#allocation3], %s6729_s7, %s6729_s7, %s6730_s8  }
  0x11   :  { %6726 = dma.done.wait [#allocation3], 8192  }
  0x12   :  { %6727 = vsyncadd [#allocation3], 4294959104  ;;  %v6797_v0 = vld [vmem:[%s8006_s0 + $0x10] sm:$0xff]  ;;  %v6802_v1 = vld [vmem:[%s8006_s0] sm:$0xff]  ;;  %v6731_v2 = vmov 0.0   ;;  %s6732_s15 = smov 17   ;;  %v52_v5 = vlaneseq }
  0x13   :  { %128 = vmatprep.mubr.f32.mxu0 %v6731_v2  ;;  %199 = vmatprep.mubr.f32.mxu1 %v6731_v2  ;;  %v6813_v3 = vld [vmem:[%s8006_s0 + $0x18] sm:$0xff]  ;;  %v6818_v4 = vld [vmem:[%s8006_s0 + $0x8] sm:$0xff]  ;;  %s6733_s19 = smov 16   ;;  %s6734_s20 = smov 15   ;;  %vm60_vm1 = vcmask 64512   ;;  %v59_v15 = vld [vmem:[%s8007_s1] sm:$0xff] }
  0x14   :  { %48 = vrot.lane.b32.xlu1 %v6797_v0, %s6732_s15  ;;  %44 = vrot.lane.b32.xlu0 %v6802_v1, %s6732_s15  ;;  %s6735_s21 = smov 1   ;;  %s6736_s22 = smov 127   ;;  %v6880_v6 = vand.u32 127, %v52_v5  ;;  %v6346_v21 = vld [vmem:[%s8007_s1 + $0x8] sm:$0xff]  ;;  %v6353_v30 = vld [vmem:[%s8007_s1 + $0x10] sm:$0xff] }
  0x15   :  { %s6737_s23 = smov 113   ;;  %s6738_s24 = smov 112   ;;  %v6360_v39 = vld [vmem:[%s8007_s1 + $0x18] sm:$0xff]  ;;  %v6367_v45 = vld [vmem:[%s8007_s1 + $0x20] sm:$0xff]  ;;  %v6370_v51 = vld [vmem:[%s8007_s1 + $0x28] sm:$0xff] }
  0x16   :  { %s6739_s25 = smov 111   ;;  %vm54_vm0 = vcmp.lt.s32.totalorder %v6880_v6, 17  ;;  %vm226_vm2 = vcmp.lt.s32.totalorder %v6880_v6, 16  ;;  %vm399_vm3 = vcmp.lt.s32.totalorder %v6880_v6, 15  ;;  %vm572_vm4 = vcmp.lt.s32.totalorder %v6880_v6, 1  ;;  %v6377_v60 = vld [vmem:[%s8007_s1 + $0x30] sm:$0xff] }
  0x17   :  { %vm896_vm5 = vcmp.lt.s32.totalorder %v6880_v6, 127  ;;  %vm1069_vm6 = vcmp.lt.s32.totalorder %v6880_v6, 113  ;;  %vm1242_vm7 = vcmp.lt.s32.totalorder %v6880_v6, 112  ;;  %vm1415_vm8 = vcmp.lt.s32.totalorder %v6880_v6, 111 }
  0x18   :  { %50 = vrot.lane.b32.xlu1 %v6813_v3, %s6732_s15  ;;  %46 = vrot.lane.b32.xlu0 %v6818_v4, %s6732_s15  ;;  %vm3921_vm9 = vcmp.lt.s32.totalorder %v6880_v6, 14  ;;  %vm4587_vm10 = vcmp.lt.s32.totalorder %v6880_v6, 126  ;;  %vm5273_vm11 = vcmp.lt.s32.totalorder %v6880_v6, 110  ;;  %vm5446_vm12 = vcmp.lt.s32.totalorder %v6880_v6, 97 }
  0x19   :  { %vm5619_vm13 = vcmp.lt.s32.totalorder %v6880_v6, 96  ;;  %vm5792_vm14 = vcmp.lt.s32.totalorder %v6880_v6, 95  ;;  %vm5965_vm15 = vcmp.lt.s32.totalorder %v6880_v6, 94  ;;  %v6147_v6 = vld [vmem:[#allocation2 + $0x88] sm:$0xff] }
  0x1c   :  { %220 = vrot.lane.b32.xlu1 %v6818_v4, %s6733_s19  ;;  %218 = vrot.lane.b32.xlu0 %v6802_v1, %s6733_s19 }
  0x20   :  { %224 = vrot.lane.b32.xlu1 %v6813_v3, %s6733_s19  ;;  %222 = vrot.lane.b32.xlu0 %v6797_v0, %s6733_s19 }
  0x24   :  { %393 = vrot.lane.b32.xlu1 %v6818_v4, %s6734_s20  ;;  %391 = vrot.lane.b32.xlu0 %v6802_v1, %s6734_s20 }
  0x28   :  { %397 = vrot.lane.b32.xlu1 %v6813_v3, %s6734_s20  ;;  %395 = vrot.lane.b32.xlu0 %v6797_v0, %s6734_s20 }
  0x2c   :  { %566 = vrot.lane.b32.xlu1 %v6818_v4, %s6735_s21  ;;  %564 = vrot.lane.b32.xlu0 %v6802_v1, %s6735_s21 }
  0x30   :  { %570 = vrot.lane.b32.xlu1 %v6813_v3, %s6735_s21  ;;  %568 = vrot.lane.b32.xlu0 %v6797_v0, %s6735_s21 }
  0x34   :  { %890 = vrot.lane.b32.xlu1 %v6818_v4, %s6736_s22  ;;  %888 = vrot.lane.b32.xlu0 %v6802_v1, %s6736_s22 }
  0x38   :  { %894 = vrot.lane.b32.xlu1 %v6813_v3, %s6736_s22  ;;  %892 = vrot.lane.b32.xlu0 %v6797_v0, %s6736_s22 }
  0x3c   :  { %1063 = vrot.lane.b32.xlu1 %v6818_v4, %s6737_s23  ;;  %1061 = vrot.lane.b32.xlu0 %v6802_v1, %s6737_s23 }
  0x40   :  { %1067 = vrot.lane.b32.xlu1 %v6813_v3, %s6737_s23  ;;  %1065 = vrot.lane.b32.xlu0 %v6797_v0, %s6737_s23 }
  0x44   :  { %1236 = vrot.lane.b32.xlu1 %v6818_v4, %s6738_s24  ;;  %1234 = vrot.lane.b32.xlu0 %v6802_v1, %s6738_s24 }
  0x48   :  { %1240 = vrot.lane.b32.xlu1 %v6813_v3, %s6738_s24  ;;  %1238 = vrot.lane.b32.xlu0 %v6797_v0, %s6738_s24 }
  0x4c   :  { %1409 = vrot.lane.b32.xlu1 %v6818_v4, %s6739_s25  ;;  %1407 = vrot.lane.b32.xlu0 %v6802_v1, %s6739_s25 }
  0x50   :  { %1413 = vrot.lane.b32.xlu1 %v6813_v3, %s6739_s25  ;;  %1411 = vrot.lane.b32.xlu0 %v6797_v0, %s6739_s25 }
  0x86   :  { %v49_v7 = vpop.permute.xlu1 %48  ;;  %v45_v8 = vpop.permute.xlu0 %44 }
  0x8a   :  { %v51_v9 = vpop.permute.xlu1 %50  ;;  %v47_v10 = vpop.permute.xlu0 %46 }
  0x8b   :  { %v57_v11 = vsel %vm54_vm0, %v45_v8, %v47_v10  ;;  %v55_v12 = vsel %vm54_vm0, %v49_v7, %v51_v9  ;;  %v58_v13 = vsel %vm54_vm0, %v51_v9, %v45_v8  ;;  %v56_v14 = vsel %vm54_vm0, %v47_v10, %v49_v7  ;;  %v6384_v7 = vld [vmem:[%s8007_s1 + $0x38] sm:$0xff] }
  0x8c   :  { %64 = vmatprep.subr.mxu0 %v57_v11  ;;  %135 = vmatprep.subr.mxu1 %v55_v12 }
  0x8d   :  { %65 = vmatpush1.msra.mxu0 %v58_v13  ;;  %136 = vmatpush1.msra.mxu1 %v56_v14 }
  0x8e   :  { %v221_v16 = vpop.permute.xlu1 %220  ;;  %v219_v17 = vpop.permute.xlu0 %218  ;;  %6344 = vmatmul.mubr.msk.f32.vlgmr.msra.gmra.mrb[0].mxu0 %vm60_vm1, %v59_v15  ;;  %6345 = vmatmul.mubr.msk.f32.vlgmr.msra.gmra.mrb[0].mxu1 %vm60_vm1, %v59_v15 }
  0x8f   :  { %v229_v18 = vsel %vm226_vm2, %v219_v17, %v221_v16  ;;  %300 = vmatprep.mubr.f32.mxu0 %v6731_v2  ;;  %371 = vmatprep.mubr.f32.mxu1 %v6731_v2 }
  0x90   :  { %236 = vmatprep.subr.mxu0 %v229_v18  ;;  %v7024_v18 = vld [vmem:[%s8009_s3] sm:$0xff] }
  0x92   :  { %v225_v19 = vpop.permute.xlu1 %224  ;;  %v223_v20 = vpop.permute.xlu0 %222 }
  0x93   :  { %v230_v22 = vsel %vm226_vm2, %v225_v19, %v219_v17  ;;  %v227_v23 = vsel %vm226_vm2, %v223_v20, %v225_v19  ;;  %v228_v24 = vsel %vm226_vm2, %v221_v16, %v223_v20  ;;  %v6391_v16 = vld [vmem:[%s8007_s1 + $0x40] sm:$0xff]  ;;  %v7029_v20 = vld [vmem:[%s8009_s3 + $0x8] sm:$0xff] }
  0x94   :  { %237 = vmatpush1.msra.mxu0 %v230_v22  ;;  %307 = vmatprep.subr.mxu1 %v227_v23  ;;  %v7034_v22 = vld [vmem:[%s8009_s3 + $0x10] sm:$0xff] }
  0x95   :  { %308 = vmatpush1.msra.mxu1 %v228_v24  ;;  %6347 = vmatmul.mubr.msk.f32.vlgmr.msra.gmra.mrb[2].mxu0 %vm60_vm1, %v6346_v21 }
  0x96   :  { %v394_v25 = vpop.permute.xlu1 %393  ;;  %v392_v26 = vpop.permute.xlu0 %391  ;;  %6348 = vmatmul.mubr.msk.f32.vlgmr.msra.gmra.mrb[2].mxu1 %vm60_vm1, %v6346_v21  ;;  %473 = vmatprep.mubr.f32.mxu0 %v6731_v2 }
  0x97   :  { %v402_v27 = vsel %vm399_vm3, %v392_v26, %v394_v25  ;;  %544 = vmatprep.mubr.f32.mxu1 %v6731_v2 }
  0x98   :  { %409 = vmatprep.subr.mxu0 %v402_v27  ;;  %v40_v27 = vld [vmem:[%s8008_s2] sm:$0xff] }
  0x9a   :  { %v398_v28 = vpop.permute.xlu1 %397  ;;  %v396_v29 = vpop.permute.xlu0 %395 }
  0x9b   :  { %v403_v31 = vsel %vm399_vm3, %v398_v28, %v392_v26  ;;  %v400_v32 = vsel %vm399_vm3, %v396_v29, %v398_v28  ;;  %v401_v33 = vsel %vm399_vm3, %v394_v25, %v396_v29  ;;  %v7039_v25 = vld [vmem:[%s8009_s3 + $0x18] sm:$0xff] }
  0x9c   :  { %410 = vmatpush1.msra.mxu0 %v403_v31  ;;  %480 = vmatprep.subr.mxu1 %v400_v32  ;;  %v42_v31 = vld [vmem:[%s8008_s2 + $0x10] sm:$0xff] }
  0x9d   :  { %481 = vmatpush1.msra.mxu1 %v401_v33  ;;  %6354 = vmatmul.mubr.msk.f32.vlgmr.msra.gmra.mrb[4].mxu0 %vm60_vm1, %v6353_v30  ;;  %v7057_v33 = vld [vmem:[%s8009_s3 + $0x20] sm:$0xff] }
  0x9e   :  { %v567_v34 = vpop.permute.xlu1 %566  ;;  %v565_v35 = vpop.permute.xlu0 %564  ;;  %6355 = vmatmul.mubr.msk.f32.vlgmr.msra.gmra.mrb[4].mxu1 %vm60_vm1, %v6353_v30  ;;  %646 = vmatprep.mubr.f32.mxu0 %v6731_v2  ;;  %v41_v30 = vld [vmem:[%s8008_s2 + $0x8] sm:$0xff] }
  0x9f   :  { %v575_v36 = vsel %vm572_vm4, %v565_v35, %v567_v34  ;;  %717 = vmatprep.mubr.f32.mxu1 %v6731_v2 }
  0xa0   :  { %582 = vmatprep.subr.mxu0 %v575_v36  ;;  %v7065_v36 = vld [vmem:[%s8009_s3 + $0x28] sm:$0xff] }
  0xa2   :  { %v571_v37 = vpop.permute.xlu1 %570  ;;  %v569_v38 = vpop.permute.xlu0 %568 }
  0xa3   :  { %v576_v40 = vsel %vm572_vm4, %v571_v37, %v565_v35  ;;  %v573_v41 = vsel %vm572_vm4, %v569_v38, %v571_v37  ;;  %v574_v42 = vsel %vm572_vm4, %v567_v34, %v569_v38  ;;  %v43_v34 = vld [vmem:[%s8008_s2 + $0x18] sm:$0xff]  ;;  %v7070_v37 = vld [vmem:[%s8009_s3 + $0x30] sm:$0xff] }
  0xa4   :  { %583 = vmatpush1.msra.mxu0 %v576_v40  ;;  %653 = vmatprep.subr.mxu1 %v573_v41  ;;  %v7075_v41 = vld [vmem:[%s8009_s3 + $0x38] sm:$0xff] }
  0xa5   :  { %654 = vmatpush1.msra.mxu1 %v574_v42  ;;  %6361 = vmatmul.mubr.msk.f32.vlgmr.msra.gmra.mrb[6].mxu0 %vm60_vm1, %v6360_v39 }
  0xa6   :  { %v891_v43 = vpop.permute.xlu1 %890  ;;  %v889_v44 = vpop.permute.xlu0 %888  ;;  %6362 = vmatmul.mubr.msk.f32.vlgmr.msra.gmra.mrb[6].mxu1 %vm60_vm1, %v6360_v39  ;;  %742 = vmatprep.subr.mxu0 %v6818_v4 }
  0xa7   :  { %743 = vmatpush1.msra.mxu0 %v6802_v1  ;;  %806 = vmatprep.mubr.f32.mxu0 %v6731_v2  ;;  %v899_v52 = vsel %vm896_vm5, %v889_v44, %v891_v43 }
  0xa8   :  { %813 = vmatprep.subr.mxu1 %v6813_v3  ;;  %877 = vmatprep.mubr.f32.mxu1 %v6731_v2 }
  0xa9   :  { %6368 = vmatmul.mubr.msk.f32.vlgmr.msra.gmra.mrb[8].mxu0 %vm60_vm1, %v6367_v45  ;;  %814 = vmatpush1.msra.mxu1 %v6797_v0 }
  0xaa   :  { %v895_v46 = vpop.permute.xlu1 %894  ;;  %v893_v47 = vpop.permute.xlu0 %892  ;;  %6369 = vmatmul.mubr.msk.f32.vlgmr.msra.gmra.mrb[8].mxu1 %vm60_vm1, %v6367_v45  ;;  %970 = vmatprep.mubr.f32.mxu0 %v6731_v2 }
  0xab   :  { %v898_v48 = vsel %vm896_vm5, %v891_v43, %v893_v47  ;;  %v900_v49 = vsel %vm896_vm5, %v895_v46, %v889_v44  ;;  %v897_v50 = vsel %vm896_vm5, %v893_v47, %v895_v46  ;;  %1041 = vmatprep.mubr.f32.mxu1 %v6731_v2 }
  0xac   :  { %906 = vmatprep.subr.mxu0 %v898_v48  ;;  %977 = vmatprep.subr.mxu1 %v900_v49 }
  0xad   :  { %907 = vmatpush1.msra.mxu0 %v899_v52  ;;  %978 = vmatpush1.msra.mxu1 %v897_v50 }
  0xae   :  { %v1064_v53 = vpop.permute.xlu1 %1063  ;;  %v1062_v54 = vpop.permute.xlu0 %1061  ;;  %6371 = vmatmul.mubr.msk.f32.vlgmr.msra.gmra.mrb[10].mxu0 %vm60_vm1, %v6370_v51  ;;  %6372 = vmatmul.mubr.msk.f32.vlgmr.msra.gmra.mrb[10].mxu1 %vm60_vm1, %v6370_v51 }
  0xaf   :  { %1143 = vmatprep.mubr.f32.mxu0 %v6731_v2  ;;  %1214 = vmatprep.mubr.f32.mxu1 %v6731_v2  ;;  %v1072_v61 = vsel %vm1069_vm6, %v1062_v54, %v1064_v53 }
  0xb2   :  { %v1068_v55 = vpop.permute.xlu1 %1067  ;;  %v1066_v56 = vpop.permute.xlu0 %1065 }
  0xb3   :  { %v1071_v57 = vsel %vm1069_vm6, %v1064_v53, %v1066_v56  ;;  %v1073_v58 = vsel %vm1069_vm6, %v1068_v55, %v1062_v54  ;;  %v1070_v59 = vsel %vm1069_vm6, %v1066_v56, %v1068_v55  ;;  %v7084_v54 = vld [vmem:[%s8009_s3 + $0x40] sm:$0xff]  ;;  %v7089_v55 = vld [vmem:[%s8009_s3 + $0x48] sm:$0xff]  ;;  %v7094_v56 = vld [vmem:[%s8009_s3 + $0x50] sm:$0xff] }
  0xb4   :  { %1079 = vmatprep.subr.mxu0 %v1071_v57  ;;  %1150 = vmatprep.subr.mxu1 %v1073_v58  ;;  %v7099_v58 = vld [vmem:[%s8009_s3 + $0x58] sm:$0xff] }
  0xb5   :  { %1080 = vmatpush1.msra.mxu0 %v1072_v61  ;;  %1151 = vmatpush1.msra.mxu1 %v1070_v59 }
  0xb6   :  { %v1237_v62 = vpop.permute.xlu1 %1236  ;;  %6378 = vmatmul.mubr.msk.f32.vlgmr.msra.gmra.mrb[12].mxu0 %vm60_vm1, %v6377_v60  ;;  %6379 = vmatmul.mubr.msk.f32.vlgmr.msra.gmra.mrb[12].mxu1 %vm60_vm1, %v6377_v60  ;;  %v1235_v63 = vpop.permute.xlu0 %1234 }
  0xb7   :  { %1316 = vmatprep.mubr.f32.mxu0 %v6731_v2  ;;  %1387 = vmatprep.mubr.f32.mxu1 %v6731_v2  ;;  %v1245_v8 = vsel %vm1242_vm7, %v1235_v63, %v1237_v62 }
  0xba   :  { %v1241_v0 = vpop.permute.xlu1 %1240  ;;  %v1239_v1 = vpop.permute.xlu0 %1238 }
  0xbb   :  { %v1243_v3 = vsel %vm1242_vm7, %v1239_v1, %v1241_v0  ;;  %v1244_v4 = vsel %vm1242_vm7, %v1237_v62, %v1239_v1  ;;  %v1246_v5 = vsel %vm1242_vm7, %v1241_v0, %v1235_v63 }
  0xbc   :  { %1252 = vmatprep.subr.mxu0 %v1244_v4  ;;  %1323 = vmatprep.subr.mxu1 %v1246_v5 }
  0xbd   :  { %1253 = vmatpush1.msra.mxu0 %v1245_v8  ;;  %1324 = vmatpush1.msra.mxu1 %v1243_v3  ;;  %v7108_v8 = vld [vmem:[%s8009_s3 + $0x80] sm:$0xff] }
  0xbe   :  { %v1410_v9 = vpop.permute.xlu1 %1409  ;;  %6385 = vmatmul.mubr.msk.f32.vlgmr.msra.gmra.mrb[14].mxu0 %vm60_vm1, %v6384_v7  ;;  %6386 = vmatmul.mubr.msk.f32.vlgmr.msra.gmra.mrb[14].mxu1 %vm60_vm1, %v6384_v7  ;;  %v1408_v10 = vpop.permute.xlu0 %1407 }
  0xbf   :  { %1489 = vmatprep.mubr.f32.mxu0 %v6731_v2  ;;  %1560 = vmatprep.mubr.f32.mxu1 %v6731_v2  ;;  %v1418_v17 = vsel %vm1415_vm8, %v1408_v10, %v1410_v9 }
  0xc2   :  { %v1414_v11 = vpop.permute.xlu1 %1413  ;;  %v1412_v12 = vpop.permute.xlu0 %1411 }
  0xc3   :  { %v1416_v13 = vsel %vm1415_vm8, %v1412_v12, %v1414_v11  ;;  %v1417_v14 = vsel %vm1415_vm8, %v1410_v9, %v1412_v12  ;;  %v1419_v15 = vsel %vm1415_vm8, %v1414_v11, %v1408_v10  ;;  %v7113_v9 = vld [vmem:[%s8009_s3 + $0x88] sm:$0xff]  ;;  %v7118_v10 = vld [vmem:[%s8009_s3 + $0x90] sm:$0xff]  ;;  %v7123_v12 = vld [vmem:[%s8009_s3 + $0x98] sm:$0xff] }
  0xc4   :  { %1425 = vmatprep.subr.mxu0 %v1417_v14  ;;  %1496 = vmatprep.subr.mxu1 %v1419_v15 }
  0xc5   :  { %1426 = vmatpush1.msra.mxu0 %v1418_v17  ;;  %1497 = vmatpush1.msra.mxu1 %v1416_v13 }
  0xc6   :  { %6392 = vmatmul.mubr.msk.f32.vlgmr.msra.gmra.mrb[16].mxu0 %vm60_vm1, %v6391_v16  ;;  %6393 = vmatmul.mubr.msk.f32.vlgmr.msra.gmra.mrb[16].mxu1 %vm60_vm1, %v6391_v16 }
  0xc7   :  { %1674 = vmatprep.mubr.f32.mxu0 %v6731_v2  ;;  %1745 = vmatprep.mubr.f32.mxu1 %v6731_v2 }
 0x161   :  { %v130_v19 = vpop.f32.mrb[0].mxu0  ;;  %v201_v21 = vpop.f32.mrb[0].mxu1 }
 0x162   :  { %v132_v23 = vpop.f32.mrb[1].mxu0  ;;  %v203_v24 = vpop.f32.mrb[1].mxu1  ;;  %v210_v26 = vmul.f32 %v7024_v18, %v130_v19  ;;  %v212_v29 = vmul.f32 %v7034_v22, %v201_v21 }
 0x163   :  { %v211_v28 = vmul.f32 %v7029_v20, %v132_v23  ;;  %v213_v32 = vmul.f32 %v7039_v25, %v203_v24 }
 0x164   :  { %v214_v35 = vadd.f32 %v210_v26, %v40_v27  ;;  %v216_v40 = vadd.f32 %v212_v29, %v42_v31 }
 0x165   :  { %v215_v38 = vadd.f32 %v211_v28, %v41_v30  ;;  %v217_v44 = vadd.f32 %v213_v32, %v43_v34 }
 0x168   :  { %v302_v39 = vpop.f32.mrb[2].mxu0 }
 0x169   :  { %v383_v42 = vmul.f32 %v7057_v33, %v302_v39  ;;  %v304_v43 = vpop.f32.mrb[3].mxu0  ;;  %v373_v45 = vpop.f32.mrb[2].mxu1 }
 0x16a   :  { %v384_v46 = vmul.f32 %v7065_v36, %v304_v43  ;;  %v385_v47 = vmul.f32 %v7070_v37, %v373_v45  ;;  %v375_v48 = vpop.f32.mrb[3].mxu1  ;;  %v7147_v43 = vld [vmem:[%s8009_s3 + $0xd8] sm:$0xff] }
 0x16b   :  { %v387_v49 = vadd.f32 %v383_v42, %v214_v35  ;;  %v386_v50 = vmul.f32 %v7075_v41, %v375_v48  ;;  %v7142_v42 = vld [vmem:[%s8009_s3 + $0xc8] sm:$0xff] }
 0x16c   :  { %v388_v51 = vadd.f32 %v384_v46, %v215_v38  ;;  %v389_v52 = vadd.f32 %v385_v47, %v216_v40  ;;  %v7132_v38 = vld [vmem:[%s8009_s3 + $0xc0] sm:$0xff]  ;;  %v7137_v40 = vld [vmem:[%s8009_s3 + $0xd0] sm:$0xff] }
 0x16d   :  { %v390_v53 = vadd.f32 %v386_v50, %v217_v44 }
 0x170   :  { %v475_v57 = vpop.f32.mrb[4].mxu0 }
 0x171   :  { %v556_v59 = vmul.f32 %v7084_v54, %v475_v57  ;;  %v477_v60 = vpop.f32.mrb[5].mxu0  ;;  %v546_v61 = vpop.f32.mrb[4].mxu1 }
 0x172   :  { %v557_v62 = vmul.f32 %v7089_v55, %v477_v60  ;;  %v558_v63 = vmul.f32 %v7094_v56, %v546_v61  ;;  %v548_v0 = vpop.f32.mrb[5].mxu1  ;;  %v7156_v60 = vld [vmem:[%s8009_s3 + $0x100] sm:$0xff]  ;;  %v7161_v61 = vld [vmem:[%s8009_s3 + $0x110] sm:$0xff] }
 0x173   :  { %v560_v1 = vadd.f32 %v556_v59, %v387_v49  ;;  %v559_v3 = vmul.f32 %v7099_v58, %v548_v0 }
 0x174   :  { %v561_v4 = vadd.f32 %v557_v62, %v388_v51  ;;  %v562_v5 = vadd.f32 %v558_v63, %v389_v52  ;;  %v7166_v62 = vld [vmem:[%s8009_s3 + $0x108] sm:$0xff]  ;;  %v7171_v63 = vld [vmem:[%s8009_s3 + $0x118] sm:$0xff] }
 0x175   :  { %v563_v7 = vadd.f32 %v559_v3, %v390_v53 }
 0x178   :  { %v648_v11 = vpop.f32.mrb[6].mxu0 }
 0x179   :  { %v729_v13 = vmul.f32 %v7108_v8, %v648_v11  ;;  %v650_v14 = vpop.f32.mrb[7].mxu0  ;;  %v719_v15 = vpop.f32.mrb[6].mxu1 }
 0x17a   :  { %v730_v16 = vmul.f32 %v7113_v9, %v650_v14  ;;  %v731_v17 = vmul.f32 %v7118_v10, %v719_v15  ;;  %v721_v19 = vpop.f32.mrb[7].mxu1 }
 0x17b   :  { %v733_v21 = vadd.f32 %v729_v13, %v560_v1  ;;  %v732_v23 = vmul.f32 %v7123_v12, %v721_v19  ;;  %v7180_v19 = vld [vmem:[%s8009_s3 + $0x120] sm:$0xff] }
 0x17c   :  { %v808_v24 = vpop.f32.mrb[8].mxu0  ;;  %v734_v26 = vadd.f32 %v730_v16, %v561_v4  ;;  %v735_v27 = vadd.f32 %v731_v17, %v562_v5 }
 0x17d   :  { %v884_v28 = vadd.f32 %v808_v24, %v733_v21  ;;  %v810_v29 = vpop.f32.mrb[9].mxu0  ;;  %v879_v30 = vpop.f32.mrb[8].mxu1  ;;  %v736_v31 = vadd.f32 %v732_v23, %v563_v7  ;;  %v7185_v21 = vld [vmem:[%s8009_s3 + $0x130] sm:$0xff]  ;;  %v7190_v23 = vld [vmem:[%s8009_s3 + $0x128] sm:$0xff]  ;;  %v7195_v24 = vld [vmem:[%s8009_s3 + $0x138] sm:$0xff] }
 0x17e   :  { %v885_v32 = vadd.f32 %v810_v29, %v734_v26  ;;  %v886_v34 = vadd.f32 %v879_v30, %v735_v27  ;;  %v881_v35 = vpop.f32.mrb[9].mxu1 }
 0x17f   :  { %v887_v39 = vadd.f32 %v881_v35, %v736_v31 }
 0x181   :  { %v972_v44 = vpop.f32.mrb[10].mxu0  ;;  %v1043_v45 = vpop.f32.mrb[10].mxu1 }
 0x182   :  { %v1053_v46 = vmul.f32 %v7132_v38, %v972_v44  ;;  %v974_v47 = vpop.f32.mrb[11].mxu0  ;;  %v1055_v48 = vmul.f32 %v7137_v40, %v1043_v45  ;;  %v1045_v49 = vpop.f32.mrb[11].mxu1 }
 0x183   :  { %v1054_v50 = vmul.f32 %v7142_v42, %v974_v47  ;;  %v1056_v51 = vmul.f32 %v7147_v43, %v1045_v49  ;;  %v7209_v47 = vld [vmem:[%s8009_s3 + $0x150] sm:$0xff]  ;;  %v7219_v49 = vld [vmem:[%s8009_s3 + $0x158] sm:$0xff] }
 0x184   :  { %v1057_v52 = vadd.f32 %v1053_v46, %v884_v28  ;;  %v1059_v53 = vadd.f32 %v1055_v48, %v886_v34  ;;  %v7204_v46 = vld [vmem:[%s8009_s3 + $0x140] sm:$0xff]  ;;  %v7214_v48 = vld [vmem:[%s8009_s3 + $0x148] sm:$0xff] }
 0x185   :  { %v1058_v57 = vadd.f32 %v1054_v50, %v885_v32  ;;  %v1060_v59 = vadd.f32 %v1056_v51, %v887_v39 }
 0x189   :  { %v1145_v0 = vpop.f32.mrb[12].mxu0  ;;  %v1216_v1 = vpop.f32.mrb[12].mxu1 }
 0x18a   :  { %v1226_v3 = vmul.f32 %v7156_v60, %v1145_v0  ;;  %v1228_v4 = vmul.f32 %v7161_v61, %v1216_v1  ;;  %v1147_v5 = vpop.f32.mrb[13].mxu0  ;;  %v1218_v7 = vpop.f32.mrb[13].mxu1 }
 0x18b   :  { %v1227_v11 = vmul.f32 %v7166_v62, %v1147_v5  ;;  %v1229_v13 = vmul.f32 %v7171_v63, %v1218_v7 }
 0x18c   :  { %v1230_v14 = vadd.f32 %v1226_v3, %v1057_v52  ;;  %v1232_v15 = vadd.f32 %v1228_v4, %v1059_v53 }
 0x18d   :  { %v1231_v16 = vadd.f32 %v1227_v11, %v1058_v57  ;;  %v1233_v17 = vadd.f32 %v1229_v13, %v1060_v59 }
 0x191   :  { %v1318_v26 = vpop.f32.mrb[14].mxu0  ;;  %v1389_v27 = vpop.f32.mrb[14].mxu1 }
 0x192   :  { %v1399_v28 = vmul.f32 %v7180_v19, %v1318_v26  ;;  %v1401_v29 = vmul.f32 %v7185_v21, %v1389_v27  ;;  %v1320_v30 = vpop.f32.mrb[15].mxu0  ;;  %v1391_v31 = vpop.f32.mrb[15].mxu1 }
 0x193   :  { %v1400_v32 = vmul.f32 %v7190_v23, %v1320_v30  ;;  %v1402_v34 = vmul.f32 %v7195_v24, %v1391_v31 }
 0x194   :  { %v1403_v35 = vadd.f32 %v1399_v28, %v1230_v14  ;;  %v1405_v39 = vadd.f32 %v1401_v29, %v1232_v15 }
 0x195   :  { %v1404_v44 = vadd.f32 %v1400_v32, %v1231_v16  ;;  %v1406_v45 = vadd.f32 %v1402_v34, %v1233_v17  ;;  %v6402_v34 = vld [vmem:[%s8007_s1 + $0x48] sm:$0xff] }
 0x199   :  { %v1491_v50 = vpop.f32.mrb[16].mxu0  ;;  %v1562_v51 = vpop.f32.mrb[16].mxu1 }
 0x19a   :  { %v1572_v52 = vmul.f32 %v7204_v46, %v1491_v50  ;;  %v1574_v53 = vmul.f32 %v7209_v47, %v1562_v51  ;;  %v1493_v57 = vpop.f32.mrb[17].mxu0  ;;  %v1564_v59 = vpop.f32.mrb[17].mxu1 }
 0x19b   :  { %v1573_v0 = vmul.f32 %v7214_v48, %v1493_v57  ;;  %v1575_v1 = vmul.f32 %v7219_v49, %v1564_v59  ;;  %v6405_v57 = vld [vmem:[%s8007_s1 + $0x50] sm:$0xff] }
 0x19c   :  { %v1576_v3 = vadd.f32 %v1572_v52, %v1403_v35  ;;  %v1578_v4 = vadd.f32 %v1574_v53, %v1405_v39 }
 0x19d   :  { %v1577_v5 = vadd.f32 %v1573_v0, %v1404_v44  ;;  %v1579_v7 = vadd.f32 %v1575_v1, %v1406_v45 }
 0x19e   :  { %v1580_v11 = vmul.f32 0.2, %v1576_v3  ;;  %v1582_v15 = vmul.f32 0.2, %v1578_v4 }
 0x19f   :  { %v1581_v13 = vmul.f32 0.2, %v1577_v5  ;;  %v1583_v17 = vmul.f32 0.2, %v1579_v7 }
 0x1a0   :  { %v7225_v14 = vmax.f32 %v1576_v3, %v1580_v11  ;;  %v7233_v26 = vmax.f32 %v1578_v4, %v1582_v15 }
 0x1a1   :  { %v7227_v16 = vmax.f32 %v1577_v5, %v1581_v13  ;;  %v7235_v27 = vmax.f32 %v1579_v7, %v1583_v17  ;;  %v6408_v13 = vld [vmem:[%s8007_s1 + $0x58] sm:$0xff] }
 0x1a2   :  { %1593 = vrot.lane.b32.xlu0 %v7225_v14, %s6732_s15 }
 0x1a3   :  { %1595 = vrot.lane.b32.xlu1 %v7227_v16, %s6732_s15 }
 0x1a6   :  { %1597 = vrot.lane.b32.xlu0 %v7233_v26, %s6732_s15 }
 0x1a7   :  { %1599 = vrot.lane.b32.xlu1 %v7235_v27, %s6732_s15 }
 0x1aa   :  { %1760 = vrot.lane.b32.xlu0 %v7225_v14, %s6733_s19 }
 0x1ab   :  { %1762 = vrot.lane.b32.xlu1 %v7227_v16, %s6733_s19 }
 0x1ae   :  { %1764 = vrot.lane.b32.xlu0 %v7233_v26, %s6733_s19 }
 0x1af   :  { %1766 = vrot.lane.b32.xlu1 %v7235_v27, %s6733_s19 }
 0x1b2   :  { %1927 = vrot.lane.b32.xlu0 %v7225_v14, %s6734_s20 }
 0x1b3   :  { %1929 = vrot.lane.b32.xlu1 %v7227_v16, %s6734_s20 }
 0x1b6   :  { %1931 = vrot.lane.b32.xlu0 %v7233_v26, %s6734_s20 }
 0x1b7   :  { %1933 = vrot.lane.b32.xlu1 %v7235_v27, %s6734_s20 }
 0x1ba   :  { %2094 = vrot.lane.b32.xlu0 %v7225_v14, %s6735_s21 }
 0x1bb   :  { %2096 = vrot.lane.b32.xlu1 %v7227_v16, %s6735_s21 }
 0x1be   :  { %2098 = vrot.lane.b32.xlu0 %v7233_v26, %s6735_s21 }
 0x1bf   :  { %2100 = vrot.lane.b32.xlu1 %v7235_v27, %s6735_s21 }
 0x1c2   :  { %2412 = vrot.lane.b32.xlu0 %v7225_v14, %s6736_s22 }
 0x1c3   :  { %2414 = vrot.lane.b32.xlu1 %v7227_v16, %s6736_s22 }
 0x1c6   :  { %2416 = vrot.lane.b32.xlu0 %v7233_v26, %s6736_s22 }
 0x1c7   :  { %2418 = vrot.lane.b32.xlu1 %v7235_v27, %s6736_s22 }
 0x1ca   :  { %2579 = vrot.lane.b32.xlu0 %v7225_v14, %s6737_s23 }
 0x1cb   :  { %2581 = vrot.lane.b32.xlu1 %v7227_v16, %s6737_s23 }
 0x1ce   :  { %2583 = vrot.lane.b32.xlu0 %v7233_v26, %s6737_s23 }
 0x1cf   :  { %2585 = vrot.lane.b32.xlu1 %v7235_v27, %s6737_s23 }
 0x1d2   :  { %2746 = vrot.lane.b32.xlu0 %v7225_v14, %s6738_s24 }
 0x1d3   :  { %2748 = vrot.lane.b32.xlu1 %v7227_v16, %s6738_s24 }
 0x1d6   :  { %2750 = vrot.lane.b32.xlu0 %v7233_v26, %s6738_s24 }
 0x1d7   :  { %2752 = vrot.lane.b32.xlu1 %v7235_v27, %s6738_s24 }
 0x1da   :  { %2913 = vrot.lane.b32.xlu0 %v7225_v14, %s6739_s25 }
 0x1db   :  { %2915 = vrot.lane.b32.xlu1 %v7227_v16, %s6739_s25 }
 0x1de   :  { %2917 = vrot.lane.b32.xlu0 %v7233_v26, %s6739_s25 }
 0x1df   :  { %2919 = vrot.lane.b32.xlu1 %v7235_v27, %s6739_s25 }
 0x214   :  { %v1594_v28 = vpop.permute.xlu0 %1593 }
 0x215   :  { %v1596_v29 = vpop.permute.xlu1 %1595 }
 0x216   :  { %v1603_v30 = vsel %vm54_vm0, %v1594_v28, %v1596_v29 }
 0x217   :  { %1610 = vmatprep.subr.mxu0 %v1603_v30 }
 0x218   :  { %v1598_v31 = vpop.permute.xlu0 %1597 }
 0x219   :  { %v1600_v32 = vpop.permute.xlu1 %1599  ;;  %v1602_v44 = vsel %vm54_vm0, %v1596_v29, %v1598_v31 }
 0x21a   :  { %v1604_v35 = vsel %vm54_vm0, %v1600_v32, %v1594_v28  ;;  %v1601_v39 = vsel %vm54_vm0, %v1598_v31, %v1600_v32 }
 0x21b   :  { %1611 = vmatpush1.msra.mxu0 %v1604_v35  ;;  %1681 = vmatprep.subr.mxu1 %v1601_v39 }
 0x21c   :  { %v1761_v45 = vpop.permute.xlu0 %1760  ;;  %1682 = vmatpush1.msra.mxu1 %v1602_v44  ;;  %6403 = vmatmul.mubr.msk.f32.vlgmr.msra.gmra.mrb[18].mxu0 %vm60_vm1, %v6402_v34  ;;  %v6411_v44 = vld [vmem:[%s8007_s1 + $0x60] sm:$0xff] }
 0x21d   :  { %v1763_v50 = vpop.permute.xlu1 %1762  ;;  %6404 = vmatmul.mubr.msk.f32.vlgmr.msra.gmra.mrb[18].mxu1 %vm60_vm1, %v6402_v34  ;;  %1841 = vmatprep.mubr.f32.mxu0 %v6731_v2 }
 0x21e   :  { %v1770_v51 = vsel %vm226_vm2, %v1761_v45, %v1763_v50  ;;  %1912 = vmatprep.mubr.f32.mxu1 %v6731_v2 }
 0x21f   :  { %1777 = vmatprep.subr.mxu0 %v1770_v51 }
 0x220   :  { %v1765_v52 = vpop.permute.xlu0 %1764 }
 0x221   :  { %v1767_v53 = vpop.permute.xlu1 %1766  ;;  %v1769_v1 = vsel %vm226_vm2, %v1763_v50, %v1765_v52 }
 0x222   :  { %v1771_v59 = vsel %vm226_vm2, %v1767_v53, %v1761_v45  ;;  %v1768_v0 = vsel %vm226_vm2, %v1765_v52, %v1767_v53  ;;  %v6414_v52 = vld [vmem:[%s8007_s1 + $0x68] sm:$0xff] }
 0x223   :  { %1778 = vmatpush1.msra.mxu0 %v1771_v59  ;;  %1848 = vmatprep.subr.mxu1 %v1768_v0  ;;  %v6417_v59 = vld [vmem:[%s8007_s1 + $0x70] sm:$0xff] }
 0x224   :  { %v1928_v3 = vpop.permute.xlu0 %1927  ;;  %1849 = vmatpush1.msra.mxu1 %v1769_v1  ;;  %6406 = vmatmul.mubr.msk.f32.vlgmr.msra.gmra.mrb[20].mxu0 %vm60_vm1, %v6405_v57 }
 0x225   :  { %v1930_v4 = vpop.permute.xlu1 %1929  ;;  %6407 = vmatmul.mubr.msk.f32.vlgmr.msra.gmra.mrb[20].mxu1 %vm60_vm1, %v6405_v57  ;;  %2008 = vmatprep.mubr.f32.mxu0 %v6731_v2 }
 0x226   :  { %v1937_v5 = vsel %vm399_vm3, %v1928_v3, %v1930_v4  ;;  %2079 = vmatprep.mubr.f32.mxu1 %v6731_v2 }
 0x227   :  { %1944 = vmatprep.subr.mxu0 %v1937_v5 }
 0x228   :  { %v1932_v7 = vpop.permute.xlu0 %1931 }
 0x229   :  { %v1934_v11 = vpop.permute.xlu1 %1933  ;;  %v1936_v28 = vsel %vm399_vm3, %v1930_v4, %v1932_v7 }
 0x22a   :  { %v1938_v15 = vsel %vm399_vm3, %v1934_v11, %v1928_v3  ;;  %v1935_v17 = vsel %vm399_vm3, %v1932_v7, %v1934_v11  ;;  %v6420_v7 = vld [vmem:[%s8007_s1 + $0x78] sm:$0xff] }
 0x22b   :  { %1945 = vmatpush1.msra.mxu0 %v1938_v15  ;;  %2015 = vmatprep.subr.mxu1 %v1935_v17 }
 0x22c   :  { %v2095_v29 = vpop.permute.xlu0 %2094  ;;  %2016 = vmatpush1.msra.mxu1 %v1936_v28  ;;  %6409 = vmatmul.mubr.msk.f32.vlgmr.msra.gmra.mrb[22].mxu0 %vm60_vm1, %v6408_v13 }
 0x22d   :  { %v2097_v30 = vpop.permute.xlu1 %2096  ;;  %6410 = vmatmul.mubr.msk.f32.vlgmr.msra.gmra.mrb[22].mxu1 %vm60_vm1, %v6408_v13  ;;  %2175 = vmatprep.mubr.f32.mxu0 %v6731_v2 }
 0x22e   :  { %v2104_v31 = vsel %vm572_vm4, %v2095_v29, %v2097_v30  ;;  %2246 = vmatprep.mubr.f32.mxu1 %v6731_v2 }
 0x22f   :  { %2111 = vmatprep.subr.mxu0 %v2104_v31 }
 0x230   :  { %v2099_v32 = vpop.permute.xlu0 %2098 }
 0x231   :  { %v2101_v34 = vpop.permute.xlu1 %2100  ;;  %v2103_v45 = vsel %vm572_vm4, %v2097_v30, %v2099_v32 }
 0x232   :  { %v2105_v35 = vsel %vm572_vm4, %v2101_v34, %v2095_v29  ;;  %v2102_v39 = vsel %vm572_vm4, %v2099_v32, %v2101_v34  ;;  %v6423_v32 = vld [vmem:[%s8007_s1 + $0x80] sm:$0xff] }
 0x233   :  { %2112 = vmatpush1.msra.mxu0 %v2105_v35  ;;  %2182 = vmatprep.subr.mxu1 %v2102_v39 }
 0x234   :  { %v2413_v50 = vpop.permute.xlu0 %2412  ;;  %2183 = vmatpush1.msra.mxu1 %v2103_v45  ;;  %2266 = vmatprep.subr.mxu0 %v7227_v16 }
 0x235   :  { %6412 = vmatmul.mubr.msk.f32.vlgmr.msra.gmra.mrb[24].mxu0 %vm60_vm1, %v6411_v44  ;;  %2337 = vmatprep.subr.mxu1 %v7235_v27  ;;  %v2415_v51 = vpop.permute.xlu1 %2414 }
 0x236   :  { %2267 = vmatpush1.msra.mxu0 %v7225_v14  ;;  %6413 = vmatmul.mubr.msk.f32.vlgmr.msra.gmra.mrb[24].mxu1 %vm60_vm1, %v6411_v44  ;;  %v2422_v14 = vsel %vm896_vm5, %v2413_v50, %v2415_v51 }
 0x237   :  { %2338 = vmatpush1.msra.mxu1 %v7233_v26  ;;  %2330 = vmatprep.mubr.f32.mxu0 %v6731_v2 }
 0x238   :  { %v2417_v53 = vpop.permute.xlu0 %2416  ;;  %2401 = vmatprep.mubr.f32.mxu1 %v6731_v2 }
 0x239   :  { %6415 = vmatmul.mubr.msk.f32.vlgmr.msra.gmra.mrb[26].mxu0 %vm60_vm1, %v6414_v52  ;;  %v2419_v16 = vpop.permute.xlu1 %2418  ;;  %v2421_v27 = vsel %vm896_vm5, %v2415_v51, %v2417_v53 }
 0x23a   :  { %v2420_v57 = vsel %vm896_vm5, %v2417_v53, %v2419_v16  ;;  %2429 = vmatprep.subr.mxu0 %v2421_v27  ;;  %v2423_v26 = vsel %vm896_vm5, %v2419_v16, %v2413_v50  ;;  %6416 = vmatmul.mubr.msk.f32.vlgmr.msra.gmra.mrb[26].mxu1 %vm60_vm1, %v6414_v52  ;;  %v6426_v53 = vld [vmem:[%s8007_s1 + $0x88] sm:$0xff] }
 0x23b   :  { %2430 = vmatpush1.msra.mxu0 %v2422_v14  ;;  %2500 = vmatprep.subr.mxu1 %v2423_v26  ;;  %v6429_v26 = vld [vmem:[%s8007_s1 + $0x90] sm:$0xff] }
 0x23c   :  { %v2580_v0 = vpop.permute.xlu0 %2579  ;;  %2493 = vmatprep.mubr.f32.mxu0 %v6731_v2  ;;  %2501 = vmatpush1.msra.mxu1 %v2420_v57  ;;  %v6700_v57 = vld [vmem:[%s8006_s0 + $0x8] sm:$0xff] }
 0x23d   :  { %6418 = vmatmul.mubr.msk.f32.vlgmr.msra.gmra.mrb[28].mxu0 %vm60_vm1, %v6417_v59  ;;  %v2582_v1 = vpop.permute.xlu1 %2581  ;;  %2564 = vmatprep.mubr.f32.mxu1 %v6731_v2 }
 0x23e   :  { %6419 = vmatmul.mubr.msk.f32.vlgmr.msra.gmra.mrb[28].mxu1 %vm60_vm1, %v6417_v59  ;;  %2660 = vmatprep.mubr.f32.mxu0 %v6731_v2  ;;  %v2589_v11 = vsel %vm1069_vm6, %v2580_v0, %v2582_v1  ;;  %v6701_v59 = vld [vmem:[%s8006_s0] sm:$0xff] }
 0x23f   :  { %2731 = vmatprep.mubr.f32.mxu1 %v6731_v2 }
 0x240   :  { %v2584_v3 = vpop.permute.xlu0 %2583 }
 0x241   :  { %v2586_v4 = vpop.permute.xlu1 %2585  ;;  %v2588_v5 = vsel %vm1069_vm6, %v2582_v1, %v2584_v3  ;;  %v6703_v1 = vld [vmem:[%s8006_s0 + $0x10] sm:$0xff] }
 0x242   :  { %v2587_v13 = vsel %vm1069_vm6, %v2584_v3, %v2586_v4  ;;  %2596 = vmatprep.subr.mxu0 %v2588_v5  ;;  %v2590_v15 = vsel %vm1069_vm6, %v2586_v4, %v2580_v0  ;;  %v6702_v0 = vld [vmem:[%s8006_s0 + $0x18] sm:$0xff] }
 0x243   :  { %2597 = vmatpush1.msra.mxu0 %v2589_v11  ;;  %2667 = vmatprep.subr.mxu1 %v2590_v15 }
 0x244   :  { %v2747_v17 = vpop.permute.xlu0 %2746  ;;  %6421 = vmatmul.mubr.msk.f32.vlgmr.msra.gmra.mrb[30].mxu0 %vm60_vm1, %v6420_v7  ;;  %2668 = vmatpush1.msra.mxu1 %v2587_v13  ;;  %v6398_v13 = vld [vmem:[%s8008_s2 + $0x20] sm:$0xff] }
 0x245   :  { %6422 = vmatmul.mubr.msk.f32.vlgmr.msra.gmra.mrb[30].mxu1 %vm60_vm1, %v6420_v7  ;;  %v2749_v28 = vpop.permute.xlu1 %2748  ;;  %2827 = vmatprep.mubr.f32.mxu0 %v6731_v2 }
 0x246   :  { %2898 = vmatprep.mubr.f32.mxu1 %v6731_v2  ;;  %v2756_v34 = vsel %vm1242_vm7, %v2747_v17, %v2749_v28 }
 0x248   :  { %v2751_v29 = vpop.permute.xlu0 %2750 }
 0x249   :  { %v2753_v30 = vpop.permute.xlu1 %2752  ;;  %v2755_v31 = vsel %vm1242_vm7, %v2749_v28, %v2751_v29  ;;  %v6399_v28 = vld [vmem:[%s8008_s2 + $0x28] sm:$0xff] }
 0x24a   :  { %v2754_v35 = vsel %vm1242_vm7, %v2751_v29, %v2753_v30  ;;  %2763 = vmatprep.subr.mxu0 %v2755_v31  ;;  %v2757_v39 = vsel %vm1242_vm7, %v2753_v30, %v2747_v17  ;;  %v6400_v29 = vld [vmem:[%s8008_s2 + $0x30] sm:$0xff] }
 0x24b   :  { %2764 = vmatpush1.msra.mxu0 %v2756_v34  ;;  %2834 = vmatprep.subr.mxu1 %v2757_v39 }
 0x24c   :  { %v2914_v44 = vpop.permute.xlu0 %2913  ;;  %6424 = vmatmul.mubr.msk.f32.vlgmr.msra.gmra.mrb[32].mxu0 %vm60_vm1, %v6423_v32  ;;  %2835 = vmatpush1.msra.mxu1 %v2754_v35 }
 0x24d   :  { %6425 = vmatmul.mubr.msk.f32.vlgmr.msra.gmra.mrb[32].mxu1 %vm60_vm1, %v6423_v32  ;;  %v2916_v45 = vpop.permute.xlu1 %2915  ;;  %2994 = vmatprep.mubr.f32.mxu0 %v6731_v2 }
 0x24e   :  { %3065 = vmatprep.mubr.f32.mxu1 %v6731_v2  ;;  %v2923_v16 = vsel %vm1415_vm8, %v2914_v44, %v2916_v45 }
 0x250   :  { %v2918_v50 = vpop.permute.xlu0 %2917 }
 0x251   :  { %v2920_v51 = vpop.permute.xlu1 %2919  ;;  %v2922_v52 = vsel %vm1415_vm8, %v2916_v45, %v2918_v50 }
 0x252   :  { %v2921_v27 = vsel %vm1415_vm8, %v2918_v50, %v2920_v51  ;;  %2930 = vmatprep.subr.mxu0 %v2922_v52  ;;  %v2924_v14 = vsel %vm1415_vm8, %v2920_v51, %v2914_v44 }
 0x253   :  { %2931 = vmatpush1.msra.mxu0 %v2923_v16  ;;  %3001 = vmatprep.subr.mxu1 %v2924_v14 }
 0x254   :  { %6427 = vmatmul.mubr.msk.f32.vlgmr.msra.gmra.mrb[34].mxu0 %vm60_vm1, %v6426_v53  ;;  %3002 = vmatpush1.msra.mxu1 %v2921_v27 }
 0x255   :  { %6428 = vmatmul.mubr.msk.f32.vlgmr.msra.gmra.mrb[34].mxu1 %vm60_vm1, %v6426_v53  ;;  %3093 = vmatprep.subr.mxu0 %v6700_v57 }
 0x256   :  { %3094 = vmatpush1.msra.mxu0 %v6701_v59  ;;  %3157 = vmatprep.mubr.f32.mxu0 %v6731_v2 }
 0x257   :  { %3164 = vmatprep.subr.mxu1 %v6702_v0  ;;  %3228 = vmatprep.mubr.f32.mxu1 %v6731_v2 }
 0x258   :  { %6430 = vmatmul.mubr.msk.f32.vlgmr.msra.gmra.mrb[36].mxu0 %vm60_vm1, %v6429_v26  ;;  %3165 = vmatpush1.msra.mxu1 %v6703_v1 }
 0x259   :  { %6431 = vmatmul.mubr.msk.f32.vlgmr.msra.gmra.mrb[36].mxu1 %vm60_vm1, %v6429_v26  ;;  %3322 = vmatprep.mubr.f32.mxu0 %v6731_v2 }
 0x25a   :  { %3393 = vmatprep.mubr.f32.mxu1 %v6731_v2 }
 0x2ef   :  { %v1676_v3 = vpop.f32.mrb[18].mxu0 }
 0x2f0   :  { %v1678_v4 = vpop.f32.mrb[19].mxu0  ;;  %v1747_v5 = vpop.f32.mrb[18].mxu1  ;;  %v1752_v11 = vmul.f32 %v1676_v3, %v7024_v18  ;;  %v6401_v18 = vld [vmem:[%s8008_s2 + $0x38] sm:$0xff] }
 0x2f1   :  { %v1749_v7 = vpop.f32.mrb[19].mxu1  ;;  %v1753_v15 = vmul.f32 %v1678_v4, %v7029_v20  ;;  %v1754_v17 = vmul.f32 %v1747_v5, %v7034_v22 }
 0x2f2   :  { %v1755_v30 = vmul.f32 %v1749_v7, %v7039_v25  ;;  %v1756_v31 = vadd.f32 %v6398_v13, %v1752_v11 }
 0x2f3   :  { %v1757_v32 = vadd.f32 %v6399_v28, %v1753_v15  ;;  %v1758_v20 = vadd.f32 %v6400_v29, %v1754_v17 }
 0x2f4   :  { %v1759_v39 = vadd.f32 %v6401_v18, %v1755_v30 }
 0x2f7   :  { %v1843_v34 = vpop.f32.mrb[20].mxu0 }
 0x2f8   :  { %v1919_v22 = vmul.f32 %v7057_v33, %v1843_v34  ;;  %v1845_v35 = vpop.f32.mrb[21].mxu0  ;;  %v1914_v44 = vpop.f32.mrb[20].mxu1 }
 0x2f9   :  { %v1920_v45 = vmul.f32 %v7065_v36, %v1845_v35  ;;  %v1921_v50 = vmul.f32 %v7070_v37, %v1914_v44  ;;  %v1916_v51 = vpop.f32.mrb[21].mxu1 }
 0x2fa   :  { %v1923_v52 = vadd.f32 %v1919_v22, %v1756_v31  ;;  %v1922_v25 = vmul.f32 %v7075_v41, %v1916_v51 }
 0x2fb   :  { %v1924_v53 = vadd.f32 %v1920_v45, %v1757_v32  ;;  %v1925_v16 = vadd.f32 %v1921_v50, %v1758_v20 }
 0x2fc   :  { %v1926_v27 = vadd.f32 %v1922_v25, %v1759_v39 }
 0x2ff   :  { %v2010_v14 = vpop.f32.mrb[22].mxu0 }
 0x300   :  { %v2086_v57 = vmul.f32 %v7084_v54, %v2010_v14  ;;  %v2012_v26 = vpop.f32.mrb[23].mxu0  ;;  %v2081_v59 = vpop.f32.mrb[22].mxu1 }
 0x301   :  { %v2087_v33 = vmul.f32 %v7089_v55, %v2012_v26  ;;  %v2088_v0 = vmul.f32 %v7094_v56, %v2081_v59  ;;  %v2083_v1 = vpop.f32.mrb[23].mxu1 }
 0x302   :  { %v2090_v36 = vadd.f32 %v2086_v57, %v1923_v52  ;;  %v2089_v37 = vmul.f32 %v7099_v58, %v2083_v1 }
 0x303   :  { %v2091_v3 = vadd.f32 %v2087_v33, %v1924_v53  ;;  %v2092_v4 = vadd.f32 %v2088_v0, %v1925_v16 }
 0x304   :  { %v2093_v5 = vadd.f32 %v2089_v37, %v1926_v27 }
 0x308   :  { %v2177_v41 = vpop.f32.mrb[24].mxu0 }
 0x309   :  { %v2253_v7 = vmul.f32 %v7108_v8, %v2177_v41  ;;  %v2179_v11 = vpop.f32.mrb[25].mxu0  ;;  %v2248_v13 = vpop.f32.mrb[24].mxu1 }
 0x30a   :  { %v2254_v54 = vmul.f32 %v7113_v9, %v2179_v11  ;;  %v2255_v15 = vmul.f32 %v7118_v10, %v2248_v13  ;;  %v2250_v17 = vpop.f32.mrb[25].mxu1 }
 0x30b   :  { %v2257_v55 = vadd.f32 %v2253_v7, %v2090_v36  ;;  %v2256_v56 = vmul.f32 %v7123_v12, %v2250_v17 }
 0x30c   :  { %v2332_v28 = vpop.f32.mrb[26].mxu0  ;;  %v2258_v29 = vadd.f32 %v2254_v54, %v2091_v3  ;;  %v2259_v30 = vadd.f32 %v2255_v15, %v2092_v4 }
 0x30d   :  { %v2408_v58 = vadd.f32 %v2332_v28, %v2257_v55  ;;  %v2334_v18 = vpop.f32.mrb[27].mxu0  ;;  %v2403_v31 = vpop.f32.mrb[26].mxu1  ;;  %v2260_v32 = vadd.f32 %v2256_v56, %v2093_v5 }
 0x30e   :  { %v2409_v34 = vadd.f32 %v2334_v18, %v2258_v29  ;;  %v2410_v20 = vadd.f32 %v2403_v31, %v2259_v30  ;;  %v2405_v8 = vpop.f32.mrb[27].mxu1 }
 0x30f   :  { %v2411_v22 = vadd.f32 %v2405_v8, %v2260_v32 }
 0x310   :  { %v2495_v35 = vpop.f32.mrb[28].mxu0 }
 0x311   :  { %v2571_v9 = vmul.f32 %v7132_v38, %v2495_v35  ;;  %v2497_v39 = vpop.f32.mrb[29].mxu0  ;;  %v2566_v10 = vpop.f32.mrb[28].mxu1 }
 0x312   :  { %v2572_v44 = vmul.f32 %v7142_v42, %v2497_v39  ;;  %v2573_v12 = vmul.f32 %v7137_v40, %v2566_v10  ;;  %v2568_v45 = vpop.f32.mrb[29].mxu1  ;;  %v6435_v10 = vld [vmem:[%s8008_s2 + $0x58] sm:$0xff] }
 0x313   :  { %v2575_v50 = vadd.f32 %v2571_v9, %v2408_v58  ;;  %v2574_v51 = vmul.f32 %v7147_v43, %v2568_v45 }
 0x314   :  { %v2576_v52 = vadd.f32 %v2572_v44, %v2409_v34  ;;  %v2577_v25 = vadd.f32 %v2573_v12, %v2410_v20  ;;  %v6434_v12 = vld [vmem:[%s8008_s2 + $0x50] sm:$0xff] }
 0x315   :  { %v2578_v53 = vadd.f32 %v2574_v51, %v2411_v22 }
 0x317   :  { %v2662_v16 = vpop.f32.mrb[30].mxu0 }
 0x318   :  { %v2738_v27 = vmul.f32 %v7156_v60, %v2662_v16  ;;  %v2664_v14 = vpop.f32.mrb[31].mxu0  ;;  %v2733_v57 = vpop.f32.mrb[30].mxu1 }
 0x319   :  { %v2739_v38 = vmul.f32 %v7166_v62, %v2664_v14  ;;  %v2740_v26 = vmul.f32 %v7161_v61, %v2733_v57  ;;  %v2735_v59 = vpop.f32.mrb[31].mxu1 }
 0x31a   :  { %v2742_v42 = vadd.f32 %v2738_v27, %v2575_v50  ;;  %v2741_v40 = vmul.f32 %v7171_v63, %v2735_v59 }
 0x31b   :  { %v2743_v33 = vadd.f32 %v2739_v38, %v2576_v52  ;;  %v2744_v0 = vadd.f32 %v2740_v26, %v2577_v25  ;;  %v6436_v52 = vld [vmem:[%s8007_s1 + $0x98] sm:$0xff]  ;;  %v6443_v38 = vld [vmem:[%s8007_s1 + $0xa0] sm:$0xff] }
 0x31c   :  { %v2745_v1 = vadd.f32 %v2741_v40, %v2578_v53 }
 0x31f   :  { %v2829_v43 = vpop.f32.mrb[32].mxu0 }
 0x320   :  { %v2905_v36 = vmul.f32 %v7180_v19, %v2829_v43  ;;  %v2831_v37 = vpop.f32.mrb[33].mxu0  ;;  %v2900_v3 = vpop.f32.mrb[32].mxu1 }
 0x321   :  { %v2906_v60 = vmul.f32 %v7190_v23, %v2831_v37  ;;  %v2907_v4 = vmul.f32 %v7185_v21, %v2900_v3  ;;  %v2902_v5 = vpop.f32.mrb[33].mxu1 }
 0x322   :  { %v2909_v62 = vadd.f32 %v2905_v36, %v2742_v42  ;;  %v2908_v61 = vmul.f32 %v7195_v24, %v2902_v5  ;;  %v6446_v36 = vld [vmem:[%s8007_s1 + $0xa8] sm:$0xff] }
 0x323   :  { %v2910_v41 = vadd.f32 %v2906_v60, %v2743_v33  ;;  %v2911_v7 = vadd.f32 %v2907_v4, %v2744_v0 }
 0x324   :  { %v2912_v11 = vadd.f32 %v2908_v61, %v2745_v1 }
 0x327   :  { %v2996_v63 = vpop.f32.mrb[34].mxu0 }
 0x328   :  { %v3072_v13 = vmul.f32 %v7204_v46, %v2996_v63  ;;  %v2998_v54 = vpop.f32.mrb[35].mxu0  ;;  %v3067_v15 = vpop.f32.mrb[34].mxu1 }
 0x329   :  { %v3073_v19 = vmul.f32 %v7214_v48, %v2998_v54  ;;  %v3074_v17 = vmul.f32 %v7209_v47, %v3067_v15  ;;  %v3069_v55 = vpop.f32.mrb[35].mxu1  ;;  %v6432_v47 = vld [vmem:[%s8008_s2 + $0x40] sm:$0xff] }
 0x32a   :  { %v3076_v23 = vadd.f32 %v3072_v13, %v2909_v62  ;;  %v3075_v21 = vmul.f32 %v7219_v49, %v3069_v55  ;;  %v6433_v49 = vld [vmem:[%s8008_s2 + $0x48] sm:$0xff] }
 0x32b   :  { %v3077_v56 = vadd.f32 %v3073_v19, %v2910_v41  ;;  %v3078_v28 = vadd.f32 %v3074_v17, %v2911_v7  ;;  %v3159_v29 = vpop.f32.mrb[36].mxu0  ;;  %v6453_v7 = vld [vmem:[%s8007_s1 + $0xb0] sm:$0xff] }
 0x32c   :  { %v3079_v24 = vadd.f32 %v3075_v21, %v2912_v11  ;;  %v3080_v30 = vmul.f32 0.2, %v3076_v23  ;;  %v3161_v58 = vpop.f32.mrb[37].mxu0  ;;  %v3230_v18 = vpop.f32.mrb[36].mxu1 }
 0x32d   :  { %v3081_v31 = vmul.f32 0.2, %v3077_v56  ;;  %v3082_v32 = vmul.f32 0.2, %v3078_v28  ;;  %v3232_v46 = vpop.f32.mrb[37].mxu1 }
 0x32e   :  { %v3084_v34 = vmax.f32 %v3076_v23, %v3080_v30  ;;  %v3083_v20 = vmul.f32 0.2, %v3079_v24  ;;  %v6460_v23 = vld [vmem:[%s8007_s1 + $0xb8] sm:$0xff] }
 0x32f   :  { %v3085_v48 = vmax.f32 %v3077_v56, %v3081_v31  ;;  %v3086_v8 = vmax.f32 %v3078_v28, %v3082_v32 }
 0x330   :  { %v3235_v22 = vadd.f32 %v3159_v29, %v3084_v34  ;;  %v3087_v35 = vmax.f32 %v3079_v24, %v3083_v20 }
 0x331   :  { %v3236_v9 = vadd.f32 %v3161_v58, %v3085_v48  ;;  %v3237_v39 = vadd.f32 %v3230_v18, %v3086_v8  ;;  %v6474_v48 = vld [vmem:[%s8007_s1 + $0xc8] sm:$0xff] }
 0x332   :  { %v7500_v44 = vadd.f32 %v6432_v47, %v3235_v22  ;;  %v3238_v45 = vadd.f32 %v3232_v46, %v3087_v35  ;;  %v6467_v46 = vld [vmem:[%s8007_s1 + $0xc0] sm:$0xff] }
 0x333   :  { %v7505_v50 = vadd.f32 %v6433_v49, %v3236_v9  ;;  %v7514_v25 = vadd.f32 %v6434_v12, %v3237_v39 }
 0x334   :  { %v7507_v51 = vadd.f32 %v6435_v10, %v3238_v45  ;;  %3404 = vrot.lane.b32.xlu0 %v7500_v44, %s6732_s15  ;;  %v6477_v10 = vld [vmem:[%s8007_s1 + $0xd0] sm:$0xff] }
 0x335   :  { %3406 = vrot.lane.b32.xlu1 %v7505_v50, %s6732_s15  ;;  %3258 = vmatprep.subr.mxu0 %v7505_v50 }
 0x336   :  { %3259 = vmatpush1.msra.mxu0 %v7500_v44  ;;  %3329 = vmatprep.subr.mxu1 %v7507_v51 }
 0x337   :  { %3330 = vmatpush1.msra.mxu1 %v7514_v25  ;;  %6441 = vmatmul.mubr.msk.f32.vlgmr.msra.gmra.mrb[38].mxu0 %vm60_vm1, %v6436_v52 }
 0x338   :  { %3408 = vrot.lane.b32.xlu0 %v7514_v25, %s6732_s15  ;;  %6442 = vmatmul.mubr.msk.f32.vlgmr.msra.gmra.mrb[38].mxu1 %vm60_vm1, %v6436_v52  ;;  %v6484_v52 = vld [vmem:[%s8007_s1 + $0xd8] sm:$0xff] }
 0x339   :  { %3410 = vrot.lane.b32.xlu1 %v7507_v51, %s6732_s15  ;;  %3485 = vmatprep.mubr.f32.mxu0 %v6731_v2  ;;  %s6740_s15 = smov 14  }
 0x33a   :  { %3556 = vmatprep.mubr.f32.mxu1 %v6731_v2 }
 0x33c   :  { %3571 = vrot.lane.b32.xlu0 %v7500_v44, %s6733_s19 }
 0x33d   :  { %3573 = vrot.lane.b32.xlu1 %v7505_v50, %s6733_s19 }
 0x340   :  { %3575 = vrot.lane.b32.xlu0 %v7514_v25, %s6733_s19 }
 0x341   :  { %3577 = vrot.lane.b32.xlu1 %v7507_v51, %s6733_s19  ;;  %s6741_s19 = smov 126  }
 0x344   :  { %3742 = vrot.lane.b32.xlu0 %v7500_v44, %s6734_s20 }
 0x345   :  { %3744 = vrot.lane.b32.xlu1 %v7505_v50, %s6734_s20 }
 0x348   :  { %3746 = vrot.lane.b32.xlu0 %v7514_v25, %s6734_s20 }
 0x349   :  { %3748 = vrot.lane.b32.xlu1 %v7507_v51, %s6734_s20  ;;  %s6742_s20 = smov 110  }
 0x34c   :  { %3913 = vrot.lane.b32.xlu0 %v7500_v44, %s6740_s15 }
 0x34d   :  { %3915 = vrot.lane.b32.xlu1 %v7505_v50, %s6740_s15 }
 0x350   :  { %3917 = vrot.lane.b32.xlu0 %v7514_v25, %s6740_s15 }
 0x351   :  { %3919 = vrot.lane.b32.xlu1 %v7507_v51, %s6740_s15 }
 0x354   :  { %4086 = vrot.lane.b32.xlu0 %v7500_v44, %s6735_s21 }
 0x355   :  { %4088 = vrot.lane.b32.xlu1 %v7505_v50, %s6735_s21 }
 0x358   :  { %4090 = vrot.lane.b32.xlu0 %v7514_v25, %s6735_s21 }
 0x359   :  { %4092 = vrot.lane.b32.xlu1 %v7507_v51, %s6735_s21  ;;  %s6743_s21 = smov 97  }
 0x35c   :  { %4408 = vrot.lane.b32.xlu0 %v7500_v44, %s6736_s22 }
 0x35d   :  { %4410 = vrot.lane.b32.xlu1 %v7505_v50, %s6736_s22 }
 0x360   :  { %4412 = vrot.lane.b32.xlu0 %v7514_v25, %s6736_s22 }
 0x361   :  { %4414 = vrot.lane.b32.xlu1 %v7507_v51, %s6736_s22  ;;  %s6744_s22 = smov 96  }
 0x364   :  { %4579 = vrot.lane.b32.xlu0 %v7500_v44, %s6741_s19 }
 0x365   :  { %4581 = vrot.lane.b32.xlu1 %v7505_v50, %s6741_s19 }
 0x368   :  { %4583 = vrot.lane.b32.xlu0 %v7514_v25, %s6741_s19 }
 0x369   :  { %4585 = vrot.lane.b32.xlu1 %v7507_v51, %s6741_s19 }
 0x36c   :  { %4752 = vrot.lane.b32.xlu0 %v7500_v44, %s6737_s23 }
 0x36d   :  { %4754 = vrot.lane.b32.xlu1 %v7505_v50, %s6737_s23 }
 0x370   :  { %4756 = vrot.lane.b32.xlu0 %v7514_v25, %s6737_s23 }
 0x371   :  { %4758 = vrot.lane.b32.xlu1 %v7507_v51, %s6737_s23  ;;  %s6745_s23 = smov 95  }
 0x374   :  { %4923 = vrot.lane.b32.xlu0 %v7500_v44, %s6738_s24 }
 0x375   :  { %4925 = vrot.lane.b32.xlu1 %v7505_v50, %s6738_s24 }
 0x378   :  { %4927 = vrot.lane.b32.xlu0 %v7514_v25, %s6738_s24 }
 0x379   :  { %4929 = vrot.lane.b32.xlu1 %v7507_v51, %s6738_s24  ;;  %s6746_s24 = smov 94  }
 0x37c   :  { %5094 = vrot.lane.b32.xlu0 %v7500_v44, %s6739_s25 }
 0x37d   :  { %5096 = vrot.lane.b32.xlu1 %v7505_v50, %s6739_s25 }
 0x380   :  { %5098 = vrot.lane.b32.xlu0 %v7514_v25, %s6739_s25 }
 0x381   :  { %5100 = vrot.lane.b32.xlu1 %v7507_v51, %s6739_s25 }
 0x384   :  { %5265 = vrot.lane.b32.xlu0 %v7500_v44, %s6742_s20 }
 0x385   :  { %5267 = vrot.lane.b32.xlu1 %v7505_v50, %s6742_s20 }
 0x388   :  { %5269 = vrot.lane.b32.xlu0 %v7514_v25, %s6742_s20 }
 0x389   :  { %5271 = vrot.lane.b32.xlu1 %v7507_v51, %s6742_s20 }
 0x38c   :  { %5438 = vrot.lane.b32.xlu0 %v7500_v44, %s6743_s21 }
 0x38d   :  { %5440 = vrot.lane.b32.xlu1 %v7505_v50, %s6743_s21 }
 0x390   :  { %5442 = vrot.lane.b32.xlu0 %v7514_v25, %s6743_s21 }
 0x391   :  { %5444 = vrot.lane.b32.xlu1 %v7507_v51, %s6743_s21 }
 0x394   :  { %5611 = vrot.lane.b32.xlu0 %v7500_v44, %s6744_s22 }
 0x395   :  { %5613 = vrot.lane.b32.xlu1 %v7505_v50, %s6744_s22 }
 0x398   :  { %5615 = vrot.lane.b32.xlu0 %v7514_v25, %s6744_s22 }
 0x399   :  { %5617 = vrot.lane.b32.xlu1 %v7507_v51, %s6744_s22 }
 0x39c   :  { %5784 = vrot.lane.b32.xlu0 %v7500_v44, %s6745_s23 }
 0x39d   :  { %5786 = vrot.lane.b32.xlu1 %v7505_v50, %s6745_s23 }
 0x3a0   :  { %5788 = vrot.lane.b32.xlu0 %v7514_v25, %s6745_s23 }
 0x3a1   :  { %5790 = vrot.lane.b32.xlu1 %v7507_v51, %s6745_s23 }
 0x3a4   :  { %5957 = vrot.lane.b32.xlu0 %v7500_v44, %s6746_s24 }
 0x3a5   :  { %5959 = vrot.lane.b32.xlu1 %v7505_v50, %s6746_s24 }
 0x3a6   :  { %v3405_v53 = vpop.permute.xlu0 %3404 }
 0x3a7   :  { %v3407_v16 = vpop.permute.xlu1 %3406 }
 0x3a8   :  { %5961 = vrot.lane.b32.xlu0 %v7514_v25, %s6746_s24  ;;  %v3414_v27 = vsel %vm54_vm0, %v3405_v53, %v3407_v16 }
 0x3a9   :  { %5963 = vrot.lane.b32.xlu1 %v7507_v51, %s6746_s24  ;;  %3421 = vmatprep.subr.mxu0 %v3414_v27 }
 0x3aa   :  { %v3409_v14 = vpop.permute.xlu0 %3408 }
 0x3ab   :  { %v3411_v57 = vpop.permute.xlu1 %3410  ;;  %v3413_v42 = vsel %vm54_vm0, %v3407_v16, %v3409_v14 }
 0x3ac   :  { %v3415_v26 = vsel %vm54_vm0, %v3411_v57, %v3405_v53  ;;  %v3412_v59 = vsel %vm54_vm0, %v3409_v14, %v3411_v57 }
 0x3ad   :  { %3422 = vmatpush1.msra.mxu0 %v3415_v26  ;;  %3492 = vmatprep.subr.mxu1 %v3412_v59  ;;  %v6491_v59 = vld [vmem:[%s8007_s1 + $0xe0] sm:$0xff] }
 0x3ae   :  { %v3572_v40 = vpop.permute.xlu0 %3571  ;;  %3493 = vmatpush1.msra.mxu1 %v3413_v42  ;;  %6444 = vmatmul.mubr.msk.f32.vlgmr.msra.gmra.mrb[40].mxu0 %vm60_vm1, %v6443_v38 }
 0x3af   :  { %v3574_v33 = vpop.permute.xlu1 %3573  ;;  %6445 = vmatmul.mubr.msk.f32.vlgmr.msra.gmra.mrb[40].mxu1 %vm60_vm1, %v6443_v38  ;;  %3652 = vmatprep.mubr.f32.mxu0 %v6731_v2 }
 0x3b0   :  { %v3581_v0 = vsel %vm226_vm2, %v3572_v40, %v3574_v33  ;;  %3723 = vmatprep.mubr.f32.mxu1 %v6731_v2 }
 0x3b1   :  { %3588 = vmatprep.subr.mxu0 %v3581_v0 }
 0x3b2   :  { %v3576_v1 = vpop.permute.xlu0 %3575 }
 0x3b3   :  { %v3578_v43 = vpop.permute.xlu1 %3577  ;;  %v3580_v60 = vsel %vm226_vm2, %v3574_v33, %v3576_v1 }
 0x3b4   :  { %v3582_v37 = vsel %vm226_vm2, %v3578_v43, %v3572_v40  ;;  %v3579_v3 = vsel %vm226_vm2, %v3576_v1, %v3578_v43 }
 0x3b5   :  { %3589 = vmatpush1.msra.mxu0 %v3582_v37  ;;  %3659 = vmatprep.subr.mxu1 %v3579_v3  ;;  %v6498_v3 = vld [vmem:[%s8007_s1 + $0xe8] sm:$0xff] }
 0x3b6   :  { %v3743_v4 = vpop.permute.xlu0 %3742  ;;  %3660 = vmatpush1.msra.mxu1 %v3580_v60  ;;  %6447 = vmatmul.mubr.msk.f32.vlgmr.msra.gmra.mrb[42].mxu0 %vm60_vm1, %v6446_v36 }
 0x3b7   :  { %v3745_v5 = vpop.permute.xlu1 %3744  ;;  %6448 = vmatmul.mubr.msk.f32.vlgmr.msra.gmra.mrb[42].mxu1 %vm60_vm1, %v6446_v36  ;;  %3823 = vmatprep.mubr.f32.mxu0 %v6731_v2 }
 0x3b8   :  { %v3752_v62 = vsel %vm399_vm3, %v3743_v4, %v3745_v5  ;;  %3894 = vmatprep.mubr.f32.mxu1 %v6731_v2 }
 0x3b9   :  { %3759 = vmatprep.subr.mxu0 %v3752_v62 }
 0x3ba   :  { %v3747_v61 = vpop.permute.xlu0 %3746 }
 0x3bb   :  { %v3749_v41 = vpop.permute.xlu1 %3748  ;;  %v3751_v13 = vsel %vm399_vm3, %v3745_v5, %v3747_v61 }
 0x3bc   :  { %v3753_v11 = vsel %vm399_vm3, %v3749_v41, %v3743_v4  ;;  %v3750_v63 = vsel %vm399_vm3, %v3747_v61, %v3749_v41 }
 0x3bd   :  { %3760 = vmatpush1.msra.mxu0 %v3753_v11  ;;  %3830 = vmatprep.subr.mxu1 %v3750_v63  ;;  %v6505_v63 = vld [vmem:[%s8007_s1 + $0xf0] sm:$0xff] }
 0x3be   :  { %v3914_v54 = vpop.permute.xlu0 %3913  ;;  %3831 = vmatpush1.msra.mxu1 %v3751_v13  ;;  %6454 = vmatmul.mubr.msk.f32.vlgmr.msra.gmra.mrb[44].mxu0 %vm60_vm1, %v6453_v7 }
 0x3bf   :  { %v3916_v15 = vpop.permute.xlu1 %3915  ;;  %6455 = vmatmul.mubr.msk.f32.vlgmr.msra.gmra.mrb[44].mxu1 %vm60_vm1, %v6453_v7  ;;  %3995 = vmatprep.mubr.f32.mxu0 %v6731_v2 }
 0x3c0   :  { %v3924_v19 = vsel %vm3921_vm9, %v3914_v54, %v3916_v15  ;;  %4066 = vmatprep.mubr.f32.mxu1 %v6731_v2 }
 0x3c1   :  { %3931 = vmatprep.subr.mxu0 %v3924_v19 }
 0x3c2   :  { %v3918_v17 = vpop.permute.xlu0 %3917 }
 0x3c3   :  { %v3920_v55 = vpop.permute.xlu1 %3919  ;;  %v3923_v28 = vsel %vm3921_vm9, %v3916_v15, %v3918_v17 }
 0x3c4   :  { %v3925_v21 = vsel %vm3921_vm9, %v3920_v55, %v3914_v54  ;;  %v3922_v56 = vsel %vm3921_vm9, %v3918_v17, %v3920_v55 }
 0x3c5   :  { %3932 = vmatpush1.msra.mxu0 %v3925_v21  ;;  %4002 = vmatprep.subr.mxu1 %v3922_v56  ;;  %v6512_v56 = vld [vmem:[%s8007_s1 + $0xf8] sm:$0xff] }
 0x3c6   :  { %v4087_v29 = vpop.permute.xlu0 %4086  ;;  %4003 = vmatpush1.msra.mxu1 %v3923_v28  ;;  %6461 = vmatmul.mubr.msk.f32.vlgmr.msra.gmra.mrb[46].mxu0 %vm60_vm1, %v6460_v23 }
 0x3c7   :  { %v4089_v24 = vpop.permute.xlu1 %4088  ;;  %6462 = vmatmul.mubr.msk.f32.vlgmr.msra.gmra.mrb[46].mxu1 %vm60_vm1, %v6460_v23  ;;  %4167 = vmatprep.mubr.f32.mxu0 %v6731_v2 }
 0x3c8   :  { %v4096_v30 = vsel %vm572_vm4, %v4087_v29, %v4089_v24  ;;  %4238 = vmatprep.mubr.f32.mxu1 %v6731_v2 }
 0x3c9   :  { %4103 = vmatprep.subr.mxu0 %v4096_v30 }
 0x3ca   :  { %v4091_v58 = vpop.permute.xlu0 %4090 }
 0x3cb   :  { %v4093_v18 = vpop.permute.xlu1 %4092  ;;  %v4095_v34 = vsel %vm572_vm4, %v4089_v24, %v4091_v58 }
 0x3cc   :  { %v4097_v31 = vsel %vm572_vm4, %v4093_v18, %v4087_v29  ;;  %v4094_v32 = vsel %vm572_vm4, %v4091_v58, %v4093_v18 }
 0x3cd   :  { %4104 = vmatpush1.msra.mxu0 %v4097_v31  ;;  %4174 = vmatprep.subr.mxu1 %v4094_v32 }
 0x3ce   :  { %v4409_v20 = vpop.permute.xlu0 %4408  ;;  %4175 = vmatpush1.msra.mxu1 %v4095_v34  ;;  %4262 = vmatprep.subr.mxu0 %v7505_v50 }
 0x3cf   :  { %6468 = vmatmul.mubr.msk.f32.vlgmr.msra.gmra.mrb[48].mxu0 %vm60_vm1, %v6467_v46  ;;  %4333 = vmatprep.subr.mxu1 %v7507_v51  ;;  %v4411_v47 = vpop.permute.xlu1 %4410 }
 0x3d0   :  { %4263 = vmatpush1.msra.mxu0 %v7500_v44  ;;  %6469 = vmatmul.mubr.msk.f32.vlgmr.msra.gmra.mrb[48].mxu1 %vm60_vm1, %v6467_v46  ;;  %v4418_v35 = vsel %vm896_vm5, %v4409_v20, %v4411_v47  ;;  %v6519_v46 = vld [vmem:[%s8007_s1 + $0x100] sm:$0xff] }
 0x3d1   :  { %4334 = vmatpush1.msra.mxu1 %v7514_v25  ;;  %4326 = vmatprep.mubr.f32.mxu0 %v6731_v2 }
 0x3d2   :  { %v4413_v8 = vpop.permute.xlu0 %4412  ;;  %4397 = vmatprep.mubr.f32.mxu1 %v6731_v2 }
 0x3d3   :  { %v4415_v22 = vpop.permute.xlu1 %4414  ;;  %v4417_v49 = vsel %vm896_vm5, %v4411_v47, %v4413_v8  ;;  %6475 = vmatmul.mubr.msk.f32.vlgmr.msra.gmra.mrb[50].mxu0 %vm60_vm1, %v6474_v48 }
 0x3d4   :  { %v4416_v9 = vsel %vm896_vm5, %v4413_v8, %v4415_v22  ;;  %4425 = vmatprep.subr.mxu0 %v4417_v49  ;;  %v4419_v39 = vsel %vm896_vm5, %v4415_v22, %v4409_v20  ;;  %6476 = vmatmul.mubr.msk.f32.vlgmr.msra.gmra.mrb[50].mxu1 %vm60_vm1, %v6474_v48  ;;  %v6437_v22 = vld [vmem:[%s8008_s2 + $0x60] sm:$0xff]  ;;  %v6439_v49 = vld [vmem:[%s8008_s2 + $0x70] sm:$0xff] }
 0x3d5   :  { %4426 = vmatpush1.msra.mxu0 %v4418_v35  ;;  %4496 = vmatprep.subr.mxu1 %v4419_v39  ;;  %v6438_v39 = vld [vmem:[%s8008_s2 + $0x68] sm:$0xff] }
 0x3d6   :  { %v4580_v44 = vpop.permute.xlu0 %4579  ;;  %4497 = vmatpush1.msra.mxu1 %v4416_v9  ;;  %4489 = vmatprep.mubr.f32.mxu0 %v6731_v2 }
 0x3d7   :  { %v4582_v12 = vpop.permute.xlu1 %4581  ;;  %6478 = vmatmul.mubr.msk.f32.vlgmr.msra.gmra.mrb[52].mxu0 %vm60_vm1, %v6477_v10  ;;  %4560 = vmatprep.mubr.f32.mxu1 %v6731_v2 }
 0x3d8   :  { %6479 = vmatmul.mubr.msk.f32.vlgmr.msra.gmra.mrb[52].mxu1 %vm60_vm1, %v6477_v10  ;;  %4661 = vmatprep.mubr.f32.mxu0 %v6731_v2  ;;  %v4590_v25 = vsel %vm4587_vm10, %v4580_v44, %v4582_v12  ;;  %v6440_v10 = vld [vmem:[%s8008_s2 + $0x78] sm:$0xff] }
 0x3d9   :  { %4732 = vmatprep.mubr.f32.mxu1 %v6731_v2 }
 0x3da   :  { %v4584_v45 = vpop.permute.xlu0 %4583 }
 0x3db   :  { %v4586_v50 = vpop.permute.xlu1 %4585  ;;  %v4589_v51 = vsel %vm4587_vm10, %v4582_v12, %v4584_v45 }
 0x3dc   :  { %v4588_v53 = vsel %vm4587_vm10, %v4584_v45, %v4586_v50  ;;  %4597 = vmatprep.subr.mxu0 %v4589_v51  ;;  %v4591_v16 = vsel %vm4587_vm10, %v4586_v50, %v4580_v44  ;;  %v6526_v45 = vld [vmem:[%s8007_s1 + $0x108] sm:$0xff] }
 0x3dd   :  { %4598 = vmatpush1.msra.mxu0 %v4590_v25  ;;  %4668 = vmatprep.subr.mxu1 %v4591_v16 }
 0x3de   :  { %v4753_v27 = vpop.permute.xlu0 %4752  ;;  %4669 = vmatpush1.msra.mxu1 %v4588_v53  ;;  %6485 = vmatmul.mubr.msk.f32.vlgmr.msra.gmra.mrb[54].mxu0 %vm60_vm1, %v6484_v52 }
 0x3df   :  { %v4755_v14 = vpop.permute.xlu1 %4754  ;;  %6486 = vmatmul.mubr.msk.f32.vlgmr.msra.gmra.mrb[54].mxu1 %vm60_vm1, %v6484_v52  ;;  %4833 = vmatprep.mubr.f32.mxu0 %v6731_v2 }
 0x3e0   :  { %4904 = vmatprep.mubr.f32.mxu1 %v6731_v2  ;;  %v4762_v42 = vsel %vm1069_vm6, %v4753_v27, %v4755_v14 }
 0x3e2   :  { %v4757_v57 = vpop.permute.xlu0 %4756 }
 0x3e3   :  { %v4759_v38 = vpop.permute.xlu1 %4758  ;;  %v4761_v26 = vsel %vm1069_vm6, %v4755_v14, %v4757_v57 }
 0x3e4   :  { %v4760_v40 = vsel %vm1069_vm6, %v4757_v57, %v4759_v38  ;;  %4769 = vmatprep.subr.mxu0 %v4761_v26  ;;  %v4763_v33 = vsel %vm1069_vm6, %v4759_v38, %v4753_v27 }
 0x3e5   :  { %4770 = vmatpush1.msra.mxu0 %v4762_v42  ;;  %4840 = vmatprep.subr.mxu1 %v4763_v33 }
 0x3e6   :  { %v4924_v0 = vpop.permute.xlu0 %4923  ;;  %4841 = vmatpush1.msra.mxu1 %v4760_v40  ;;  %6492 = vmatmul.mubr.msk.f32.vlgmr.msra.gmra.mrb[56].mxu0 %vm60_vm1, %v6491_v59 }
 0x3e7   :  { %v4926_v1 = vpop.permute.xlu1 %4925  ;;  %6493 = vmatmul.mubr.msk.f32.vlgmr.msra.gmra.mrb[56].mxu1 %vm60_vm1, %v6491_v59  ;;  %5004 = vmatprep.mubr.f32.mxu0 %v6731_v2 }
 0x3e8   :  { %5075 = vmatprep.mubr.f32.mxu1 %v6731_v2  ;;  %v4933_v60 = vsel %vm1242_vm7, %v4924_v0, %v4926_v1 }
 0x3ea   :  { %v4928_v43 = vpop.permute.xlu0 %4927 }
 0x3eb   :  { %v4930_v36 = vpop.permute.xlu1 %4929  ;;  %v4932_v37 = vsel %vm1242_vm7, %v4926_v1, %v4928_v43 }
 0x3ec   :  { %v4931_v4 = vsel %vm1242_vm7, %v4928_v43, %v4930_v36  ;;  %4940 = vmatprep.subr.mxu0 %v4932_v37  ;;  %v4934_v5 = vsel %vm1242_vm7, %v4930_v36, %v4924_v0  ;;  %v6533_v0 = vld [vmem:[%s8007_s1 + $0x110] sm:$0xff] }
 0x3ed   :  { %4941 = vmatpush1.msra.mxu0 %v4933_v60  ;;  %5011 = vmatprep.subr.mxu1 %v4934_v5 }
 0x3ee   :  { %v5095_v62 = vpop.permute.xlu0 %5094  ;;  %5012 = vmatpush1.msra.mxu1 %v4931_v4  ;;  %6499 = vmatmul.mubr.msk.f32.vlgmr.msra.gmra.mrb[58].mxu0 %vm60_vm1, %v6498_v3 }
 0x3ef   :  { %v5097_v61 = vpop.permute.xlu1 %5096  ;;  %6500 = vmatmul.mubr.msk.f32.vlgmr.msra.gmra.mrb[58].mxu1 %vm60_vm1, %v6498_v3  ;;  %5175 = vmatprep.mubr.f32.mxu0 %v6731_v2 }
 0x3f0   :  { %5246 = vmatprep.mubr.f32.mxu1 %v6731_v2  ;;  %v5104_v13 = vsel %vm1415_vm8, %v5095_v62, %v5097_v61 }
 0x3f2   :  { %v5099_v41 = vpop.permute.xlu0 %5098 }
 0x3f3   :  { %v5101_v7 = vpop.permute.xlu1 %5100  ;;  %v5103_v11 = vsel %vm1415_vm8, %v5097_v61, %v5099_v41 }
 0x3f4   :  { %v5102_v54 = vsel %vm1415_vm8, %v5099_v41, %v5101_v7  ;;  %5111 = vmatprep.subr.mxu0 %v5103_v11  ;;  %v5105_v15 = vsel %vm1415_vm8, %v5101_v7, %v5095_v62  ;;  %v6540_v62 = vld [vmem:[%s8007_s1 + $0x118] sm:$0xff] }
 0x3f5   :  { %5112 = vmatpush1.msra.mxu0 %v5104_v13  ;;  %5182 = vmatprep.subr.mxu1 %v5105_v15  ;;  %v6131_v13 = vld [vmem:[#allocation2 + $0x8] sm:$0xff] }
 0x3f6   :  { %v5266_v19 = vpop.permute.xlu0 %5265  ;;  %5183 = vmatpush1.msra.mxu1 %v5102_v54  ;;  %6506 = vmatmul.mubr.msk.f32.vlgmr.msra.gmra.mrb[60].mxu0 %vm60_vm1, %v6505_v63  ;;  %v6178_v54 = vld [vmem:[#allocation2 + $0x180] sm:$0xff] }
 0x3f7   :  { %6507 = vmatmul.mubr.msk.f32.vlgmr.msra.gmra.mrb[60].mxu1 %vm60_vm1, %v6505_v63  ;;  %v5268_v17 = vpop.permute.xlu1 %5267  ;;  %5347 = vmatprep.mubr.f32.mxu0 %v6731_v2  ;;  %v6130_v63 = vld [vmem:[#allocation2] sm:$0xff] }
 0x3f8   :  { %5418 = vmatprep.mubr.f32.mxu1 %v6731_v2  ;;  %v5276_v28 = vsel %vm5273_vm11, %v5266_v19, %v5268_v17  ;;  %v6619_v15 = vpack.c.bf16 %v6131_v13, %v6130_v63  ;;  %v6189_v63 = vld [vmem:[#allocation2 + $0x1d8] sm:$0xff]  ;;  %v6172_v13 = vld [vmem:[#allocation2 + $0x150] sm:$0xff] }
 0x3fa   :  { %v5270_v55 = vpop.permute.xlu0 %5269 }
 0x3fb   :  { %v5272_v23 = vpop.permute.xlu1 %5271  ;;  %v5275_v21 = vsel %vm5273_vm11, %v5268_v17, %v5270_v55  ;;  %v6162_v17 = vld [vmem:[#allocation2 + $0x100] sm:$0xff] }
 0x3fc   :  { %v5274_v29 = vsel %vm5273_vm11, %v5270_v55, %v5272_v23  ;;  %5283 = vmatprep.subr.mxu0 %v5275_v21  ;;  %v5277_v24 = vsel %vm5273_vm11, %v5272_v23, %v5266_v19  ;;  %v6179_v19 = vld [vmem:[#allocation2 + $0x188] sm:$0xff] }
 0x3fd   :  { %5284 = vmatpush1.msra.mxu0 %v5276_v28  ;;  %5354 = vmatprep.subr.mxu1 %v5277_v24  ;;  %v6163_v55 = vld [vmem:[#allocation2 + $0x108] sm:$0xff]  ;;  %v6649_v23 = vpack.c.bf16 %v6179_v19, %v6178_v54  ;;  %v6149_v28 = vld [vmem:[#allocation2 + $0x98] sm:$0xff]  ;;  %v6132_v24 = vld [vmem:[#allocation2 + $0x10] sm:$0xff] }
 0x3fe   :  { %v5439_v30 = vpop.permute.xlu0 %5438  ;;  %6513 = vmatmul.mubr.msk.f32.vlgmr.msra.gmra.mrb[62].mxu0 %vm60_vm1, %v6512_v56  ;;  %5355 = vmatpush1.msra.mxu1 %v5274_v29  ;;  %v6651_v21 = vpack.c.bf16 %v6163_v55, %v6162_v17  ;;  %v6173_v54 = vld [vmem:[#allocation2 + $0x158] sm:$0xff]  ;;  %v6158_v17 = vld [vmem:[#allocation2 + $0xe0] sm:$0xff]  ;;  %v6159_v55 = vld [vmem:[#allocation2 + $0xe8] sm:$0xff] }
 0x3ff   :  { %6514 = vmatmul.mubr.msk.f32.vlgmr.msra.gmra.mrb[62].mxu1 %vm60_vm1, %v6512_v56  ;;  %v5441_v58 = vpop.permute.xlu1 %5440  ;;  %5520 = vmatprep.mubr.f32.mxu0 %v6731_v2  ;;  %v6148_v56 = vld [vmem:[#allocation2 + $0x90] sm:$0xff]  ;;  %v6671_v19 = vpack.c.bf16 %v6173_v54, %v6172_v13 }
 0x400   :  { %5591 = vmatprep.mubr.f32.mxu1 %v6731_v2  ;;  %v5449_v34 = vsel %vm5446_vm12, %v5439_v30, %v5441_v58  ;;  %v6621_v29 = vpack.c.bf16 %v6149_v28, %v6148_v56  ;;  %v6143_v56 = vld [vmem:[#allocation2 + $0x68] sm:$0xff]  ;;  %v6190_v28 = vld [vmem:[#allocation2 + $0x1e0] sm:$0xff] }
 0x402   :  { %v5443_v18 = vpop.permute.xlu0 %5442 }
 0x403   :  { %v5445_v31 = vpop.permute.xlu1 %5444  ;;  %v5448_v32 = vsel %vm5446_vm12, %v5441_v58, %v5443_v18  ;;  %v6180_v58 = vld [vmem:[#allocation2 + $0x190] sm:$0xff] }
 0x404   :  { %v5447_v20 = vsel %vm5446_vm12, %v5443_v18, %v5445_v31  ;;  %5456 = vmatprep.subr.mxu0 %v5448_v32  ;;  %v5450_v47 = vsel %vm5446_vm12, %v5445_v31, %v5439_v30  ;;  %v6133_v30 = vld [vmem:[#allocation2 + $0x18] sm:$0xff]  ;;  %v6164_v32 = vld [vmem:[#allocation2 + $0x110] sm:$0xff] }
 0x405   :  { %5457 = vmatpush1.msra.mxu0 %v5449_v34  ;;  %5527 = vmatprep.subr.mxu1 %v5450_v47  ;;  %v6623_v18 = vpack.c.bf16 %v6133_v30, %v6132_v24  ;;  %v6181_v31 = vld [vmem:[#allocation2 + $0x198] sm:$0xff]  ;;  %v6150_v47 = vld [vmem:[#allocation2 + $0xa0] sm:$0xff]  ;;  %v6191_v24 = vld [vmem:[#allocation2 + $0x1e8] sm:$0xff] }
 0x406   :  { %v5612_v48 = vpop.permute.xlu0 %5611  ;;  %6520 = vmatmul.mubr.msk.f32.vlgmr.msra.gmra.mrb[64].mxu0 %vm60_vm1, %v6519_v46  ;;  %5528 = vmatpush1.msra.mxu1 %v5447_v20  ;;  %v6653_v34 = vpack.c.bf16 %v6181_v31, %v6180_v58  ;;  %v6174_v30 = vld [vmem:[#allocation2 + $0x160] sm:$0xff]  ;;  %v6175_v58 = vld [vmem:[#allocation2 + $0x168] sm:$0xff] }
 0x407   :  { %6521 = vmatmul.mubr.msk.f32.vlgmr.msra.gmra.mrb[64].mxu1 %vm60_vm1, %v6519_v46  ;;  %v5614_v8 = vpop.permute.xlu1 %5613  ;;  %5693 = vmatprep.mubr.f32.mxu0 %v6731_v2  ;;  %v6165_v46 = vld [vmem:[#allocation2 + $0x118] sm:$0xff]  ;;  %v6675_v31 = vpack.c.bf16 %v6175_v58, %v6174_v30 }
 0x408   :  { %5764 = vmatprep.mubr.f32.mxu1 %v6731_v2  ;;  %v5622_v52 = vsel %vm5619_vm13, %v5612_v48, %v5614_v8  ;;  %v6655_v20 = vpack.c.bf16 %v6165_v46, %v6164_v32  ;;  %v6160_v32 = vld [vmem:[#allocation2 + $0xf0] sm:$0xff]  ;;  %v6161_v46 = vld [vmem:[#allocation2 + $0xf8] sm:$0xff] }
 0x409   :  { %v6466_v30 = vld [vmem:[%s8009_s3 + $0x78] sm:$0xff] }
 0x40a   :  { %v5616_v35 = vpop.permute.xlu0 %5615  ;;  %v3324_v9 = vpop.f32.mrb[38].mxu0 }
 0x40b   :  { %v5618_v44 = vpop.permute.xlu1 %5617  ;;  %v5621_v12 = vsel %vm5619_vm13, %v5614_v8, %v5616_v35  ;;  %v3325_v50 = vadd.f32 %v6437_v22, %v3324_v9  ;;  %v3395_v51 = vpop.f32.mrb[38].mxu1  ;;  %v6134_v22 = vld [vmem:[#allocation2 + $0x20] sm:$0xff] }
 0x40c   :  { %v5620_v25 = vsel %vm5619_vm13, %v5616_v35, %v5618_v44  ;;  %5629 = vmatprep.subr.mxu0 %v5621_v12  ;;  %v5623_v53 = vsel %vm5619_vm13, %v5618_v44, %v5612_v48  ;;  %v3396_v16 = vadd.f32 %v6439_v49, %v3395_v51  ;;  %v3326_v27 = vpop.f32.mrb[39].mxu0  ;;  %v3397_v14 = vpop.f32.mrb[39].mxu1  ;;  %v6151_v48 = vld [vmem:[#allocation2 + $0xa8] sm:$0xff]  ;;  %v6182_v35 = vld [vmem:[#allocation2 + $0x1a0] sm:$0xff]  ;;  %v6153_v51 = vld [vmem:[#allocation2 + $0xb8] sm:$0xff] }
 0x40d   :  { %5630 = vmatpush1.msra.mxu0 %v5622_v52  ;;  %5700 = vmatprep.subr.mxu1 %v5623_v53  ;;  %3400 = vst [vmem:[%s8011_s5] sm:$0xff] %v3325_v50  ;;  %v3327_v57 = vadd.f32 %v6438_v39, %v3326_v27  ;;  %v3398_v38 = vadd.f32 %v6440_v10, %v3397_v14  ;;  %v6135_v49 = vld [vmem:[#allocation2 + $0x28] sm:$0xff]  ;;  %v6166_v10 = vld [vmem:[#allocation2 + $0x120] sm:$0xff]  ;;  %v6152_v50 = vld [vmem:[#allocation2 + $0xb0] sm:$0xff] }
 0x40e   :  { %v5785_v26 = vpop.permute.xlu0 %5784  ;;  %6527 = vmatmul.mubr.msk.f32.vlgmr.msra.gmra.mrb[66].mxu0 %vm60_vm1, %v6526_v45  ;;  %5701 = vmatpush1.msra.mxu1 %v5620_v25  ;;  %3402 = vst [vmem:[%s8011_s5 + $0x10] sm:$0xff] %v3396_v16  ;;  %v6625_v8 = vpack.c.bf16 %v6151_v48, %v6150_v47  ;;  %v6627_v9 = vpack.c.bf16 %v6135_v49, %v6134_v22  ;;  %v6183_v39 = vld [vmem:[#allocation2 + $0x1a8] sm:$0xff]  ;;  %v6136_v25 = vld [vmem:[#allocation2 + $0x30] sm:$0xff]  ;;  %v6137_v53 = vld [vmem:[#allocation2 + $0x38] sm:$0xff] }
 0x40f   :  { %6528 = vmatmul.mubr.msk.f32.vlgmr.msra.gmra.mrb[66].mxu1 %vm60_vm1, %v6526_v45  ;;  %v5787_v59 = vpop.permute.xlu1 %5786  ;;  %5866 = vmatprep.mubr.f32.mxu0 %v6731_v2  ;;  %3401 = vst [vmem:[%s8011_s5 + $0x8] sm:$0xff] %v3327_v57  ;;  %3403 = vst [vmem:[%s8011_s5 + $0x18] sm:$0xff] %v3398_v38  ;;  %v6167_v44 = vld [vmem:[#allocation2 + $0x128] sm:$0xff]  ;;  %v6657_v12 = vpack.c.bf16 %v6183_v39, %v6182_v35  ;;  %v6629_v52 = vpack.c.bf16 %v6153_v51, %v6152_v50  ;;  %v6184_v16 = vld [vmem:[#allocation2 + $0x1b0] sm:$0xff] }
 0x410   :  { %5937 = vmatprep.mubr.f32.mxu1 %v6731_v2  ;;  %v5795_v1 = vsel %vm5792_vm14, %v5785_v26, %v5787_v59  ;;  %v6659_v45 = vpack.c.bf16 %v6167_v44, %v6166_v10  ;;  %v6631_v27 = vpack.c.bf16 %v6137_v53, %v6136_v25  ;;  %v6185_v14 = vld [vmem:[#allocation2 + $0x1b8] sm:$0xff]  ;;  %v6168_v57 = vld [vmem:[#allocation2 + $0x130] sm:$0xff]  ;;  %v3563_v50 = vld [vmem:[%s8009_s3] sm:$0xff] }
 0x411   :  { %v6169_v38 = vld [vmem:[#allocation2 + $0x138] sm:$0xff]  ;;  %v6192_v48 = vld [vmem:[#allocation2 + $0x1f0] sm:$0xff]  ;;  %v6449_v53 = vld [vmem:[%s8009_s3 + $0x20] sm:$0xff] }
 0x412   :  { %v5789_v42 = vpop.permute.xlu0 %5788  ;;  %v6145_v47 = vld [vmem:[#allocation2 + $0x78] sm:$0xff]  ;;  %v6176_v49 = vld [vmem:[#allocation2 + $0x170] sm:$0xff] }
 0x413   :  { %v5791_v40 = vpop.permute.xlu1 %5790  ;;  %v5794_v33 = vsel %vm5792_vm14, %v5787_v59, %v5789_v42  ;;  %v6663_v59 = vpack.c.bf16 %v6169_v38, %v6168_v57  ;;  %v6193_v22 = vld [vmem:[#allocation2 + $0x1f8] sm:$0xff]  ;;  %v3565_v51 = vld [vmem:[%s8009_s3 + $0x10] sm:$0xff] }
 0x414   :  { %v5793_v43 = vsel %vm5792_vm14, %v5789_v42, %v5791_v40  ;;  %5802 = vmatprep.subr.mxu0 %v5794_v33  ;;  %v5796_v36 = vsel %vm5792_vm14, %v5791_v40, %v5785_v26  ;;  %v6661_v26 = vpack.c.bf16 %v6185_v14, %v6184_v16  ;;  %v6154_v42 = vld [vmem:[#allocation2 + $0xc0] sm:$0xff]  ;;  %v6155_v40 = vld [vmem:[#allocation2 + $0xc8] sm:$0xff]  ;;  %v6177_v35 = vld [vmem:[#allocation2 + $0x178] sm:$0xff] }
 0x415   :  { %5803 = vmatpush1.msra.mxu0 %v5795_v1  ;;  %5873 = vmatprep.subr.mxu1 %v5796_v36  ;;  %v6633_v33 = vpack.c.bf16 %v6155_v40, %v6154_v42  ;;  %v6139_v1 = vld [vmem:[#allocation2 + $0x48] sm:$0xff]  ;;  %v6679_v39 = vpack.c.bf16 %v6177_v35, %v6176_v49  ;;  %v3566_v25 = vld [vmem:[%s8009_s3 + $0x18] sm:$0xff]  ;;  %v6470_v49 = vld [vmem:[%s8009_s3 + $0x80] sm:$0xff] }
 0x416   :  { %v5958_v37 = vpop.permute.xlu0 %5957  ;;  %6534 = vmatmul.mubr.msk.f32.vlgmr.msra.gmra.mrb[68].mxu0 %vm60_vm1, %v6533_v0  ;;  %5874 = vmatpush1.msra.mxu1 %v5793_v43  ;;  %v6186_v43 = vld [vmem:[#allocation2 + $0x1c0] sm:$0xff]  ;;  %v6450_v14 = vld [vmem:[%s8009_s3 + $0x28] sm:$0xff]  ;;  %v6472_v35 = vld [vmem:[%s8009_s3 + $0x90] sm:$0xff] }
 0x417   :  { %6535 = vmatmul.mubr.msk.f32.vlgmr.msra.gmra.mrb[68].mxu1 %vm60_vm1, %v6533_v0  ;;  %v5960_v3 = vpop.permute.xlu1 %5959  ;;  %6039 = vmatprep.mubr.f32.mxu0 %v6731_v2  ;;  %v6138_v0 = vld [vmem:[#allocation2 + $0x40] sm:$0xff] }
 0x418   :  { %6110 = vmatprep.mubr.f32.mxu1 %v6731_v2  ;;  %v5968_v61 = vsel %vm5965_vm15, %v5958_v37, %v5960_v3  ;;  %v6146_v2 = vld [vmem:[#allocation2 + $0x80] sm:$0xff]  ;;  %v6635_v36 = vpack.c.bf16 %v6139_v1, %v6138_v0 }
 0x419   :  { %v6617_v11 = vpack.c.bf16 %v6147_v6, %v6146_v2  ;;  %v6141_v2 = vld [vmem:[#allocation2 + $0x58] sm:$0xff]  ;;  %v6188_v6 = vld [vmem:[#allocation2 + $0x1d0] sm:$0xff] }
 0x41a   :  { %v5962_v60 = vpop.permute.xlu0 %5961 }
 0x41b   :  { %v5964_v4 = vpop.permute.xlu1 %5963  ;;  %v5967_v5 = vsel %vm5965_vm15, %v5960_v3, %v5962_v60  ;;  %v6170_v3 = vld [vmem:[#allocation2 + $0x140] sm:$0xff] }
 0x41c   :  { %v5966_v41 = vsel %vm5965_vm15, %v5962_v60, %v5964_v4  ;;  %5975 = vmatprep.subr.mxu0 %v5967_v5  ;;  %v5969_v7 = vsel %vm5965_vm15, %v5964_v4, %v5958_v37  ;;  %v6187_v37 = vld [vmem:[#allocation2 + $0x1c8] sm:$0xff] }
 0x41d   :  { %5976 = vmatpush1.msra.mxu0 %v5968_v61  ;;  %6046 = vmatprep.subr.mxu1 %v5969_v7  ;;  %v6171_v60 = vld [vmem:[#allocation2 + $0x148] sm:$0xff]  ;;  %v6665_v4 = vpack.c.bf16 %v6187_v37, %v6186_v43  ;;  %v6157_v61 = vld [vmem:[#allocation2 + $0xd8] sm:$0xff]  ;;  %v6140_v7 = vld [vmem:[#allocation2 + $0x50] sm:$0xff] }
 0x41e   :  { %6541 = vmatmul.mubr.msk.f32.vlgmr.msra.gmra.mrb[70].mxu0 %vm60_vm1, %v6540_v62  ;;  %6047 = vmatpush1.msra.mxu1 %v5966_v41  ;;  %v6667_v5 = vpack.c.bf16 %v6171_v60, %v6170_v3 }
 0x41f   :  { %6542 = vmatmul.mubr.msk.f32.vlgmr.msra.gmra.mrb[70].mxu1 %vm60_vm1, %v6540_v62  ;;  %6618 = vmatprep.subr.bf16.mxu0 %v6617_v11  ;;  %v6156_v62 = vld [vmem:[#allocation2 + $0xd0] sm:$0xff]  ;;  %v6639_v11 = vpack.c.bf16 %v6141_v2, %v6140_v7  ;;  %v6459_v2 = vld [vmem:[%s8009_s3 + $0x58] sm:$0xff] }
 0x420   :  { %6620 = vmatpush3.bf16.msra.mxu0 %v6619_v15  ;;  %6650 = vmatprep.subr.bf16.mxu1 %v6649_v23  ;;  %v6637_v41 = vpack.c.bf16 %v6157_v61, %v6156_v62  ;;  %v6669_v15 = vpack.c.bf16 %v6189_v63, %v6188_v6  ;;  %v6641_v23 = vpack.c.bf16 %v6159_v55, %v6158_v17  ;;  %v6456_v62 = vld [vmem:[%s8009_s3 + $0x40] sm:$0xff]  ;;  %v6458_v61 = vld [vmem:[%s8009_s3 + $0x50] sm:$0xff] }
 0x421   :  { %6652 = vmatpush3.bf16.msra.mxu1 %v6651_v21  ;;  %6622 = vmatprep.subr.bf16.mxu0 %v6621_v29  ;;  %v6142_v21 = vld [vmem:[#allocation2 + $0x60] sm:$0xff] }
 0x422   :  { %6654 = vmatprep.subr.bf16.mxu1 %v6653_v34  ;;  %v6643_v29 = vpack.c.bf16 %v6143_v56, %v6142_v21  ;;  %v6645_v34 = vpack.c.bf16 %v6161_v46, %v6160_v32  ;;  %v6463_v56 = vld [vmem:[%s8009_s3 + $0x60] sm:$0xff] }
 0x424   :  { %6624 = vmatpush3.bf16.msra.mxu0 %v6623_v18  ;;  %v6673_v18 = vpack.c.bf16 %v6191_v24, %v6190_v28  ;;  %v6465_v28 = vld [vmem:[%s8009_s3 + $0x70] sm:$0xff] }
 0x425   :  { %6656 = vmatpush3.bf16.msra.mxu1 %v6655_v20  ;;  %6626 = vmatprep.subr.bf16.mxu0 %v6625_v8  ;;  %v6144_v20 = vld [vmem:[#allocation2 + $0x70] sm:$0xff] }
 0x426   :  { %6658 = vmatprep.subr.bf16.mxu1 %v6657_v12  ;;  %v6647_v8 = vpack.c.bf16 %v6145_v47, %v6144_v20 }
 0x428   :  { %6628 = vmatpush3.bf16.msra.mxu0 %v6627_v9  ;;  %v6677_v9 = vpack.c.bf16 %v6193_v22, %v6192_v48 }
 0x429   :  { %6660 = vmatpush3.bf16.msra.mxu1 %v6659_v45  ;;  %6630 = vmatprep.subr.bf16.mxu0 %v6629_v52  ;;  %v3564_v52 = vld [vmem:[%s8009_s3 + $0x8] sm:$0xff] }
 0x42a   :  { %6662 = vmatprep.subr.bf16.mxu1 %v6661_v26 }
 0x42c   :  { %6632 = vmatpush3.bf16.msra.mxu0 %v6631_v27  ;;  %v6451_v27 = vld [vmem:[%s8009_s3 + $0x30] sm:$0xff] }
 0x42d   :  { %6664 = vmatpush3.bf16.msra.mxu1 %v6663_v59  ;;  %6634 = vmatprep.subr.bf16.mxu0 %v6633_v33  ;;  %v6452_v59 = vld [vmem:[%s8009_s3 + $0x38] sm:$0xff] }
 0x42e   :  { %6666 = vmatprep.subr.bf16.mxu1 %v6665_v4 }
 0x430   :  { %6636 = vmatpush3.bf16.msra.mxu0 %v6635_v36 }
 0x431   :  { %6668 = vmatpush3.bf16.msra.mxu1 %v6667_v5  ;;  %6638 = vmatprep.subr.bf16.mxu0 %v6637_v41  ;;  %v6457_v41 = vld [vmem:[%s8009_s3 + $0x48] sm:$0xff] }
 0x432   :  { %6670 = vmatprep.subr.bf16.mxu1 %v6669_v15 }
 0x434   :  { %6640 = vmatpush3.bf16.msra.mxu0 %v6639_v11 }
 0x435   :  { %6672 = vmatpush3.bf16.msra.mxu1 %v6671_v19  ;;  %6642 = vmatprep.subr.bf16.mxu0 %v6641_v23 }
 0x436   :  { %6674 = vmatprep.subr.bf16.mxu1 %v6673_v18 }
 0x438   :  { %6644 = vmatpush3.bf16.msra.mxu0 %v6643_v29  ;;  %v6464_v29 = vld [vmem:[%s8009_s3 + $0x68] sm:$0xff] }
 0x439   :  { %6676 = vmatpush3.bf16.msra.mxu1 %v6675_v31  ;;  %6646 = vmatprep.subr.bf16.mxu0 %v6645_v34 }
 0x43a   :  { %6678 = vmatprep.subr.bf16.mxu1 %v6677_v9  ;;  %v6471_v9 = vld [vmem:[%s8009_s3 + $0x88] sm:$0xff] }
 0x43c   :  { %6648 = vmatpush3.bf16.msra.mxu0 %v6647_v8 }
 0x43d   :  { %6680 = vmatpush3.bf16.msra.mxu1 %v6679_v39 }
 0x481   :  { %v3487_v10 = vpop.f32.mrb[40].mxu0 }
 0x482   :  { %v3558_v44 = vpop.f32.mrb[40].mxu1  ;;  %v3489_v12 = vpop.f32.mrb[41].mxu0  ;;  %v3567_v16 = vmul.f32 %v3563_v50, %v3487_v10  ;;  %v6473_v10 = vld [vmem:[%s8009_s3 + $0x98] sm:$0xff] }
 0x483   :  { %v3560_v45 = vpop.f32.mrb[41].mxu1  ;;  %v3569_v57 = vmul.f32 %v3565_v51, %v3558_v44  ;;  %v3568_v38 = vmul.f32 %v3564_v52, %v3489_v12 }
 0x484   :  { %v3570_v42 = vmul.f32 %v3566_v25, %v3560_v45 }
 0x489   :  { %v3654_v26 = vpop.f32.mrb[42].mxu0 }
 0x48a   :  { %v3734_v40 = vmul.f32 %v6449_v53, %v3654_v26  ;;  %v3725_v33 = vpop.f32.mrb[42].mxu1  ;;  %v3656_v0 = vpop.f32.mrb[43].mxu0 }
 0x48b   :  { %v3736_v1 = vmul.f32 %v6451_v27, %v3725_v33  ;;  %v3735_v43 = vmul.f32 %v6450_v14, %v3656_v0  ;;  %v3727_v36 = vpop.f32.mrb[43].mxu1  ;;  %v6480_v0 = vld [vmem:[%s8009_s3 + $0xc0] sm:$0xff] }
 0x48c   :  { %v3738_v37 = vadd.f32 %v3734_v40, %v3567_v16  ;;  %v3737_v3 = vmul.f32 %v6452_v59, %v3727_v36  ;;  %v6481_v36 = vld [vmem:[%s8009_s3 + $0xc8] sm:$0xff] }
 0x48d   :  { %v3740_v60 = vadd.f32 %v3736_v1, %v3569_v57  ;;  %v3739_v4 = vadd.f32 %v3735_v43, %v3568_v38  ;;  %v6482_v43 = vld [vmem:[%s8009_s3 + $0xd0] sm:$0xff] }
 0x48e   :  { %v3741_v5 = vadd.f32 %v3737_v3, %v3570_v42  ;;  %v6483_v3 = vld [vmem:[%s8009_s3 + $0xd8] sm:$0xff] }
 0x491   :  { %v3825_v7 = vpop.f32.mrb[44].mxu0 }
 0x492   :  { %v3905_v6 = vmul.f32 %v6456_v62, %v3825_v7  ;;  %v3896_v11 = vpop.f32.mrb[44].mxu1  ;;  %v3827_v63 = vpop.f32.mrb[45].mxu0 }
 0x493   :  { %v3907_v13 = vmul.f32 %v6458_v61, %v3896_v11  ;;  %v3906_v54 = vmul.f32 %v6457_v41, %v3827_v63  ;;  %v3898_v15 = vpop.f32.mrb[45].mxu1 }
 0x494   :  { %v3909_v19 = vadd.f32 %v3905_v6, %v3738_v37  ;;  %v3908_v17 = vmul.f32 %v6459_v2, %v3898_v15  ;;  %v6488_v15 = vld [vmem:[%s8009_s3 + $0xe8] sm:$0xff] }
 0x495   :  { %v3911_v55 = vadd.f32 %v3907_v13, %v3740_v60  ;;  %v3910_v23 = vadd.f32 %v3906_v54, %v3739_v4  ;;  %v6487_v13 = vld [vmem:[%s8009_s3 + $0xe0] sm:$0xff]  ;;  %v6489_v54 = vld [vmem:[%s8009_s3 + $0xf0] sm:$0xff] }
 0x496   :  { %v3912_v21 = vadd.f32 %v3908_v17, %v3741_v5  ;;  %v6490_v17 = vld [vmem:[%s8009_s3 + $0xf8] sm:$0xff] }
 0x499   :  { %v3997_v24 = vpop.f32.mrb[46].mxu0 }
 0x49a   :  { %v4078_v58 = vmul.f32 %v6463_v56, %v3997_v24  ;;  %v4068_v18 = vpop.f32.mrb[46].mxu1  ;;  %v3999_v31 = vpop.f32.mrb[47].mxu0 }
 0x49b   :  { %v4080_v32 = vmul.f32 %v6465_v28, %v4068_v18  ;;  %v4079_v46 = vmul.f32 %v6464_v29, %v3999_v31  ;;  %v4070_v34 = vpop.f32.mrb[47].mxu1 }
 0x49c   :  { %v4082_v20 = vadd.f32 %v4078_v58, %v3909_v19  ;;  %v4081_v47 = vmul.f32 %v6466_v30, %v4070_v34  ;;  %v6495_v34 = vld [vmem:[%s8009_s3 + $0x108] sm:$0xff] }
 0x49d   :  { %v4084_v48 = vadd.f32 %v4080_v32, %v3911_v55  ;;  %v4083_v8 = vadd.f32 %v4079_v46, %v3910_v23  ;;  %v6494_v32 = vld [vmem:[%s8009_s3 + $0x100] sm:$0xff]  ;;  %v6496_v46 = vld [vmem:[%s8009_s3 + $0x110] sm:$0xff] }
 0x49e   :  { %v4085_v22 = vadd.f32 %v4081_v47, %v3912_v21  ;;  %v6497_v47 = vld [vmem:[%s8009_s3 + $0x118] sm:$0xff] }
 0x4a2   :  { %v4169_v39 = vpop.f32.mrb[48].mxu0 }
 0x4a3   :  { %v4249_v44 = vmul.f32 %v6470_v49, %v4169_v39  ;;  %v4240_v12 = vpop.f32.mrb[48].mxu1  ;;  %v4171_v45 = vpop.f32.mrb[49].mxu0 }
 0x4a4   :  { %v4251_v50 = vmul.f32 %v6472_v35, %v4240_v12  ;;  %v4250_v51 = vmul.f32 %v6471_v9, %v4171_v45  ;;  %v4242_v52 = vpop.f32.mrb[49].mxu1 }
 0x4a5   :  { %v4252_v25 = vmul.f32 %v6473_v10, %v4242_v52  ;;  %v4253_v53 = vadd.f32 %v4249_v44, %v4082_v20  ;;  %v6502_v52 = vld [vmem:[%s8009_s3 + $0x128] sm:$0xff] }
 0x4a6   :  { %v4328_v16 = vpop.f32.mrb[50].mxu0  ;;  %v4255_v27 = vadd.f32 %v4251_v50, %v4084_v48  ;;  %v4254_v14 = vadd.f32 %v4250_v51, %v4083_v8  ;;  %v6501_v50 = vld [vmem:[%s8009_s3 + $0x120] sm:$0xff]  ;;  %v6503_v51 = vld [vmem:[%s8009_s3 + $0x130] sm:$0xff] }
 0x4a7   :  { %v4404_v57 = vadd.f32 %v4328_v16, %v4253_v53  ;;  %v4399_v38 = vpop.f32.mrb[50].mxu1  ;;  %v4330_v26 = vpop.f32.mrb[51].mxu0  ;;  %v4256_v59 = vadd.f32 %v4252_v25, %v4085_v22  ;;  %v6504_v53 = vld [vmem:[%s8009_s3 + $0x138] sm:$0xff] }
 0x4a8   :  { %v4406_v42 = vadd.f32 %v4399_v38, %v4255_v27  ;;  %v4405_v40 = vadd.f32 %v4330_v26, %v4254_v14  ;;  %v4401_v33 = vpop.f32.mrb[51].mxu1 }
 0x4a9   :  { %v4407_v1 = vadd.f32 %v4401_v33, %v4256_v59 }
 0x4aa   :  { %v4491_v37 = vpop.f32.mrb[52].mxu0 }
 0x4ab   :  { %v4571_v60 = vmul.f32 %v6480_v0, %v4491_v37  ;;  %v4562_v4 = vpop.f32.mrb[52].mxu1  ;;  %v4493_v5 = vpop.f32.mrb[53].mxu0 }
 0x4ac   :  { %v4573_v62 = vmul.f32 %v6482_v43, %v4562_v4  ;;  %v4572_v61 = vmul.f32 %v6481_v36, %v4493_v5  ;;  %v4564_v41 = vpop.f32.mrb[53].mxu1  ;;  %v6510_v43 = vld [vmem:[%s8009_s3 + $0x150] sm:$0xff]  ;;  %v6509_v36 = vld [vmem:[%s8009_s3 + $0x148] sm:$0xff] }
 0x4ad   :  { %v4575_v7 = vadd.f32 %v4571_v60, %v4404_v57  ;;  %v4574_v2 = vmul.f32 %v6483_v3, %v4564_v41  ;;  %v6511_v3 = vld [vmem:[%s8009_s3 + $0x158] sm:$0xff] }
 0x4ae   :  { %v4577_v6 = vadd.f32 %v4573_v62, %v4406_v42  ;;  %v4576_v11 = vadd.f32 %v4572_v61, %v4405_v40 }
 0x4af   :  { %v4578_v63 = vadd.f32 %v4574_v2, %v4407_v1  ;;  %v6508_v1 = vld [vmem:[%s8009_s3 + $0x140] sm:$0xff] }
 0x4b1   :  { %v4663_v19 = vpop.f32.mrb[54].mxu0 }
 0x4b2   :  { %v4744_v55 = vmul.f32 %v6487_v13, %v4663_v19  ;;  %v4734_v23 = vpop.f32.mrb[54].mxu1  ;;  %v4665_v21 = vpop.f32.mrb[55].mxu0  ;;  %v6515_v13 = vld [vmem:[%s8009_s3 + $0x160] sm:$0xff] }
 0x4b3   :  { %v4746_v56 = vmul.f32 %v6489_v54, %v4734_v23  ;;  %v4745_v28 = vmul.f32 %v6488_v15, %v4665_v21  ;;  %v4736_v29 = vpop.f32.mrb[55].mxu1  ;;  %v6516_v54 = vld [vmem:[%s8009_s3 + $0x168] sm:$0xff]  ;;  %v6517_v15 = vld [vmem:[%s8009_s3 + $0x170] sm:$0xff] }
 0x4b4   :  { %v4748_v24 = vadd.f32 %v4744_v55, %v4575_v7  ;;  %v4747_v30 = vmul.f32 %v6490_v17, %v4736_v29  ;;  %v6518_v17 = vld [vmem:[%s8009_s3 + $0x178] sm:$0xff] }
 0x4b5   :  { %v4750_v58 = vadd.f32 %v4746_v56, %v4577_v6  ;;  %v4749_v18 = vadd.f32 %v4745_v28, %v4576_v11 }
 0x4b6   :  { %v4751_v31 = vadd.f32 %v4747_v30, %v4578_v63 }
 0x4b9   :  { %v4835_v20 = vpop.f32.mrb[56].mxu0 }
 0x4ba   :  { %v4915_v48 = vmul.f32 %v6494_v32, %v4835_v20  ;;  %v4906_v8 = vpop.f32.mrb[56].mxu1  ;;  %v4837_v22 = vpop.f32.mrb[57].mxu0  ;;  %v6522_v32 = vld [vmem:[%s8009_s3 + $0x180] sm:$0xff] }
 0x4bb   :  { %v4917_v49 = vmul.f32 %v6496_v46, %v4906_v8  ;;  %v4916_v35 = vmul.f32 %v6495_v34, %v4837_v22  ;;  %v4908_v9 = vpop.f32.mrb[57].mxu1  ;;  %v6523_v46 = vld [vmem:[%s8009_s3 + $0x188] sm:$0xff]  ;;  %v6524_v34 = vld [vmem:[%s8009_s3 + $0x190] sm:$0xff] }
 0x4bc   :  { %v4919_v39 = vadd.f32 %v4915_v48, %v4748_v24  ;;  %v4918_v10 = vmul.f32 %v6497_v47, %v4908_v9  ;;  %v6525_v47 = vld [vmem:[%s8009_s3 + $0x198] sm:$0xff] }
 0x4bd   :  { %v4921_v44 = vadd.f32 %v4917_v49, %v4750_v58  ;;  %v4920_v12 = vadd.f32 %v4916_v35, %v4749_v18 }
 0x4be   :  { %v4922_v45 = vadd.f32 %v4918_v10, %v4751_v31 }
 0x4c1   :  { %v5006_v25 = vpop.f32.mrb[58].mxu0 }
 0x4c2   :  { %v5086_v16 = vmul.f32 %v6501_v50, %v5006_v25  ;;  %v5077_v27 = vpop.f32.mrb[58].mxu1  ;;  %v5008_v14 = vpop.f32.mrb[59].mxu0  ;;  %v6529_v50 = vld [vmem:[%s8009_s3 + $0x1a0] sm:$0xff] }
 0x4c3   :  { %v5088_v57 = vmul.f32 %v6503_v51, %v5077_v27  ;;  %v5087_v38 = vmul.f32 %v6502_v52, %v5008_v14  ;;  %v5079_v26 = vpop.f32.mrb[59].mxu1  ;;  %v6530_v51 = vld [vmem:[%s8009_s3 + $0x1a8] sm:$0xff]  ;;  %v6531_v52 = vld [vmem:[%s8009_s3 + $0x1b0] sm:$0xff] }
 0x4c4   :  { %v5090_v59 = vadd.f32 %v5086_v16, %v4919_v39  ;;  %v5089_v42 = vmul.f32 %v6504_v53, %v5079_v26  ;;  %v6532_v53 = vld [vmem:[%s8009_s3 + $0x1b8] sm:$0xff] }
 0x4c5   :  { %v5092_v40 = vadd.f32 %v5088_v57, %v4921_v44  ;;  %v5091_v33 = vadd.f32 %v5087_v38, %v4920_v12 }
 0x4c6   :  { %v5093_v0 = vadd.f32 %v5089_v42, %v4922_v45 }
 0x4c9   :  { %v5177_v37 = vpop.f32.mrb[60].mxu0 }
 0x4ca   :  { %v5257_v60 = vmul.f32 %v6508_v1, %v5177_v37  ;;  %v5248_v4 = vpop.f32.mrb[60].mxu1  ;;  %v5179_v5 = vpop.f32.mrb[61].mxu0  ;;  %v6536_v1 = vld [vmem:[%s8009_s3 + $0x1c0] sm:$0xff] }
 0x4cb   :  { %v5259_v62 = vmul.f32 %v6510_v43, %v5248_v4  ;;  %v5258_v61 = vmul.f32 %v6509_v36, %v5179_v5  ;;  %v5250_v41 = vpop.f32.mrb[61].mxu1  ;;  %v6537_v43 = vld [vmem:[%s8009_s3 + $0x1c8] sm:$0xff]  ;;  %v6538_v36 = vld [vmem:[%s8009_s3 + $0x1d0] sm:$0xff] }
 0x4cc   :  { %v5261_v7 = vadd.f32 %v5257_v60, %v5090_v59  ;;  %v5260_v2 = vmul.f32 %v6511_v3, %v5250_v41  ;;  %v6539_v3 = vld [vmem:[%s8009_s3 + $0x1d8] sm:$0xff] }
 0x4cd   :  { %v5263_v6 = vadd.f32 %v5259_v62, %v5092_v40  ;;  %v5262_v11 = vadd.f32 %v5258_v61, %v5091_v33 }
 0x4ce   :  { %v5264_v63 = vadd.f32 %v5260_v2, %v5093_v0 }
 0x4d1   :  { %v5349_v19 = vpop.f32.mrb[62].mxu0 }
 0x4d2   :  { %v5430_v55 = vmul.f32 %v6515_v13, %v5349_v19  ;;  %v5351_v23 = vpop.f32.mrb[63].mxu0  ;;  %v5420_v21 = vpop.f32.mrb[62].mxu1  ;;  %v6543_v13 = vld [vmem:[%s8009_s3 + $0x1e0] sm:$0xff] }
 0x4d3   :  { %v5431_v56 = vmul.f32 %v6516_v54, %v5351_v23  ;;  %v5432_v28 = vmul.f32 %v6517_v15, %v5420_v21  ;;  %v5422_v29 = vpop.f32.mrb[63].mxu1  ;;  %v6544_v54 = vld [vmem:[%s8009_s3 + $0x1e8] sm:$0xff]  ;;  %v6545_v15 = vld [vmem:[%s8009_s3 + $0x1f0] sm:$0xff] }
 0x4d4   :  { %v5434_v24 = vadd.f32 %v5430_v55, %v5261_v7  ;;  %v5433_v30 = vmul.f32 %v6518_v17, %v5422_v29  ;;  %v6546_v17 = vld [vmem:[%s8009_s3 + $0x1f8] sm:$0xff] }
 0x4d5   :  { %v5435_v58 = vadd.f32 %v5431_v56, %v5262_v11  ;;  %v5436_v18 = vadd.f32 %v5432_v28, %v5263_v6 }
 0x4d6   :  { %v5437_v31 = vadd.f32 %v5433_v30, %v5264_v63 }
 0x4d9   :  { %v5522_v20 = vpop.f32.mrb[64].mxu0 }
 0x4da   :  { %v5603_v48 = vmul.f32 %v6522_v32, %v5522_v20  ;;  %v5524_v8 = vpop.f32.mrb[65].mxu0  ;;  %v5593_v22 = vpop.f32.mrb[64].mxu1 }
 0x4db   :  { %v5604_v49 = vmul.f32 %v6523_v46, %v5524_v8  ;;  %v5605_v35 = vmul.f32 %v6524_v34, %v5593_v22  ;;  %v5595_v9 = vpop.f32.mrb[65].mxu1 }
 0x4dc   :  { %v5607_v39 = vadd.f32 %v5603_v48, %v5434_v24  ;;  %v5606_v10 = vmul.f32 %v6525_v47, %v5595_v9 }
 0x4dd   :  { %v5608_v44 = vadd.f32 %v5604_v49, %v5435_v58  ;;  %v5609_v12 = vadd.f32 %v5605_v35, %v5436_v18 }
 0x4de   :  { %v5610_v45 = vadd.f32 %v5606_v10, %v5437_v31 }
 0x4e1   :  { %v5695_v25 = vpop.f32.mrb[66].mxu0 }
 0x4e2   :  { %v5776_v16 = vmul.f32 %v6529_v50, %v5695_v25  ;;  %v5697_v27 = vpop.f32.mrb[67].mxu0  ;;  %v5766_v14 = vpop.f32.mrb[66].mxu1 }
 0x4e3   :  { %v5777_v57 = vmul.f32 %v6530_v51, %v5697_v27  ;;  %v5778_v38 = vmul.f32 %v6531_v52, %v5766_v14  ;;  %v5768_v26 = vpop.f32.mrb[67].mxu1 }
 0x4e4   :  { %v5780_v59 = vadd.f32 %v5776_v16, %v5607_v39  ;;  %v5779_v42 = vmul.f32 %v6532_v53, %v5768_v26 }
 0x4e5   :  { %v5781_v40 = vadd.f32 %v5777_v57, %v5608_v44  ;;  %v5782_v33 = vadd.f32 %v5778_v38, %v5609_v12 }
 0x4e6   :  { %v5783_v0 = vadd.f32 %v5779_v42, %v5610_v45 }
 0x4e9   :  { %v5868_v37 = vpop.f32.mrb[68].mxu0 }
 0x4ea   :  { %v5949_v60 = vmul.f32 %v6536_v1, %v5868_v37  ;;  %v5870_v4 = vpop.f32.mrb[69].mxu0  ;;  %v5939_v5 = vpop.f32.mrb[68].mxu1 }
 0x4eb   :  { %v5950_v62 = vmul.f32 %v6537_v43, %v5870_v4  ;;  %v5951_v61 = vmul.f32 %v6538_v36, %v5939_v5  ;;  %v5941_v41 = vpop.f32.mrb[69].mxu1 }
 0x4ec   :  { %v5953_v7 = vadd.f32 %v5949_v60, %v5780_v59  ;;  %v5952_v2 = vmul.f32 %v6539_v3, %v5941_v41 }
 0x4ed   :  { %v5954_v6 = vadd.f32 %v5950_v62, %v5781_v40  ;;  %v5955_v11 = vadd.f32 %v5951_v61, %v5782_v33 }
 0x4ee   :  { %v5956_v63 = vadd.f32 %v5952_v2, %v5783_v0 }
 0x4f1   :  { %v6041_v19 = vpop.f32.mrb[70].mxu0 }
 0x4f2   :  { %v6122_v55 = vmul.f32 %v6543_v13, %v6041_v19  ;;  %v6043_v23 = vpop.f32.mrb[71].mxu0  ;;  %v6112_v21 = vpop.f32.mrb[70].mxu1 }
 0x4f3   :  { %v6123_v56 = vmul.f32 %v6544_v54, %v6043_v23  ;;  %v6124_v28 = vmul.f32 %v6545_v15, %v6112_v21  ;;  %v6114_v29 = vpop.f32.mrb[71].mxu1 }
 0x4f4   :  { %v6126_v24 = vadd.f32 %v6122_v55, %v5953_v7  ;;  %v6125_v30 = vmul.f32 %v6546_v17, %v6114_v29 }
 0x4f5   :  { %v6127_v58 = vadd.f32 %v6123_v56, %v5954_v6  ;;  %v6128_v18 = vadd.f32 %v6124_v28, %v5955_v11 }
 0x4f6   :  { %v6129_v31 = vadd.f32 %v6125_v30, %v5956_v63 }
 0x4f7   :  { %6258 = vmatprep.mubr.f32.mxu0 %v6127_v58 }
 0x4f8   :  { %6259 = vmatmul.mubr.f32.vlgmr.msra.gmra.mrb[72].mxu0 %v6126_v24  ;;  %6328 = vmatprep.mubr.f32.mxu1 %v6129_v31 }
 0x4f9   :  { %6329 = vmatmul.mubr.f32.vlgmr.msra.gmra.mrb[72].mxu1 %v6128_v18 }
 0x5cb   :  { %v6579_v32 = vpop.f32.mrb[72].mxu0 }
 0x5cc   :  { %v6580_v46 = vpop.f32.mrb[73].mxu0  ;;  %v6614_v34 = vpop.f32.mrb[72].mxu1 }
 0x5cd   :  { %v6581_v20 = vadd.f32 %v6580_v46, %v6579_v32  ;;  %v6615_v47 = vpop.f32.mrb[73].mxu1 }
 0x5ce   :  { %v6616_v48 = vadd.f32 %v6615_v47, %v6614_v34 }
 0x5d0   :  { %v6331_v8 = vadd.f32 %v6616_v48, %v6581_v20 }
 0x5d2   :  { %6334 = vst [vmem:[%s8012_s6] sm:$0xff] %v6331_v8 }
 0x5d3   :  { %6343 = vsyncpa [#allocation3], 1 }

</bundles_post_ra>
